<compile_context>
chip_gen: v7x
topology: tpu7x:2x2x1
jax: 0.10.0
libtpu: 0.0.40
codegen_flags: <defaults>
</compile_context>

<pallas_src>
import jax
import jax.numpy as jnp
from jax.experimental import pallas as pl
from jax.experimental.pallas import tpu as pltpu

_H1, _H1P = 400, 512          # hidden-1 true / lane-padded
_H2, _H2P = 300, 384          # hidden-2 true / lane-padded
_OUTP = 128                   # fused output lanes (q1 -> lane 0, q2 -> lane 1)
_MAX_TB = 1024                # batch tile cap (see header comment)


def _round_up(x, m):
    return (x + m - 1) // m * m


def _pick_tile(batch):
    """Pick (tile, padded_batch).  >=2 tiles for large batches (v7x megacore)."""
    b8 = _round_up(batch, 8)
    if b8 < 2 * 512:
        tb = b8                                   # one tile; work is tiny anyway
    else:
        tb = min(_MAX_TB, _round_up(b8 // 2, 256))  # >=2 grid steps, tb in [512,1024]
    return tb, _round_up(b8, tb)


def _critic_kernel(s_ref, a_ref,
                   w1s_ref, w1a_ref, b14_ref,
                   w2_ref, b2_ref, w5_ref, b5_ref,
                   w36_ref, b36_ref,
                   q_ref):
    cd = w1s_ref.dtype
    s = s_ref[...].astype(cd)                     # (TB, Ds) bf16 (cast on VPU)
    a = a_ref[...].astype(cd)                     # (TB, Da) bf16

    # Fused layer 1 of both heads: (TB, 1024), f32 accumulate.
    h = jnp.dot(s, w1s_ref[...], preferred_element_type=jnp.float32)
    h = h + jnp.dot(a, w1a_ref[...], preferred_element_type=jnp.float32)
    h = jnp.maximum(h + b14_ref[...], 0.0).astype(w2_ref.dtype)

    h1 = h[:, :_H1P]                              # head-1 activations (lane-aligned)
    h2 = h[:, _H1P:]                              # head-2 activations

    # Layer 2 (per head), f32 accumulate + ReLU.
    g1 = jnp.maximum(
        jnp.dot(h1, w2_ref[...], preferred_element_type=jnp.float32) + b2_ref[...],
        0.0).astype(w36_ref.dtype)
    g2 = jnp.maximum(
        jnp.dot(h2, w5_ref[...], preferred_element_type=jnp.float32) + b5_ref[...],
        0.0).astype(w36_ref.dtype)

    # Fused layer 3: one lane-dense (TB, 128) output, q1 in lane 0, q2 in lane 1.
    g = jnp.concatenate([g1, g2], axis=-1)        # (TB, 768), 128-aligned concat
    q = jnp.dot(g, w36_ref[...], preferred_element_type=jnp.float32) + b36_ref[...]
    q_ref[...] = q.astype(q_ref.dtype)


def critic_forward(state, action, params):
    """Twin-Q Critic forward.  Returns (q1, q2), each (B, 1) float32."""
    B, state_dim = state.shape
    action_dim = action.shape[1]

    tb, b_pad = _pick_tile(B)
    nb = b_pad // tb
    if b_pad != B:
        state = jnp.pad(state, ((0, b_pad - B), (0, 0)))
        action = jnp.pad(action, ((0, b_pad - B), (0, 0)))

    weights = (params["w1s"], params["w1a"], params["b14"],
               params["w2"], params["b2"], params["w5"], params["b5"],
               params["w36"], params["b36"])

    def run(single_buffer_weights):
        if single_buffer_weights:
            # Constant block index across the grid -> single VMEM buffer is enough.
            w_specs = [pl.BlockSpec(w.shape, lambda i: (0, 0),
                                    pipeline_mode=pl.Buffered(1))
                       for w in weights]
        else:
            w_specs = [pl.BlockSpec(w.shape, lambda i: (0, 0)) for w in weights]

        grid_spec = pltpu.PrefetchScalarGridSpec(
            num_scalar_prefetch=0,
            grid=(nb,),
            in_specs=[pl.BlockSpec((tb, state_dim), lambda i: (i, 0)),
                      pl.BlockSpec((tb, action_dim), lambda i: (i, 0))] + w_specs,
            out_specs=pl.BlockSpec((tb, _OUTP), lambda i: (i, 0)),
        )
        return pl.pallas_call(
            _critic_kernel,
            out_shape=jax.ShapeDtypeStruct((b_pad, _OUTP), jnp.float32),
            grid_spec=grid_spec,
            compiler_params=pltpu.CompilerParams(
                dimension_semantics=("parallel",),
                vmem_limit_bytes=32 * 1024 * 1024),
        )(state, action, *weights)

    try:
        q12 = run(single_buffer_weights=True)
    except Exception:
        # Fallback if this JAX build rejects BlockSpec(pipeline_mode=Buffered(1)).
        q12 = run(single_buffer_weights=False)

    return q12[:B, 0:1], q12[:B, 1:2]


def critic_q1(state, action, params):
    """Matches Critic.Q1 in the PyTorch module."""
    # TODO(synk): a Q1-only variant could skip the head-2 matmuls entirely.
    return critic_forward(state, action, params)[0]


def init_critic_params(key, state_dim, action_dim):
    """Raw f32 params, PyTorch-default-Linear-like init, weights stored (in, out)."""
    sa_dim = state_dim + action_dim
    keys = jax.random.split(key, 12)

    def linear(kw, kb, fan_in, fan_out):
        bound = 1.0 / jnp.sqrt(jnp.float32(fan_in))
        w = jax.random.uniform(kw, (fan_in, fan_out), jnp.float32, -bound, bound)
        b = jax.random.uniform(kb, (fan_out,), jnp.float32, -bound, bound)
        return w, b

    w1, b1 = linear(keys[0], keys[1], sa_dim, _H1)
    w2, b2 = linear(keys[2], keys[3], _H1, _H2)
    w3, b3 = linear(keys[4], keys[5], _H2, 1)
    w4, b4 = linear(keys[6], keys[7], sa_dim, _H1)
    w5, b5 = linear(keys[8], keys[9], _H1, _H2)
    w6, b6 = linear(keys[10], keys[11], _H2, 1)
    return dict(w1=w1, b1=b1, w2=w2, b2=b2, w3=w3, b3=b3,
                w4=w4, b4=b4, w5=w5, b5=b5, w6=w6, b6=b6)


def prepare_critic_params(raw, state_dim, compute_dtype=jnp.bfloat16):
    """Build fused, lane-padded kernel params.  Padding is zero -> numerics unchanged."""
    cd = compute_dtype
    sa_dim = raw["w1"].shape[0]

    def pad_w(w, rows, cols, col_off=0):
        r, c = w.shape
        return jnp.pad(w, ((0, rows - r), (col_off, cols - c - col_off)))

    def pad_b(b, cols):
        b2d = b.reshape(1, -1)
        return jnp.pad(b2d, ((0, 0), (0, cols - b2d.shape[1]))).astype(jnp.float32)

    # Fused first layer: lanes [0:512) = head-1 (l1), [512:1024) = head-2 (l4).
    w14 = jnp.concatenate([pad_w(raw["w1"], sa_dim, _H1P),
                           pad_w(raw["w4"], sa_dim, _H1P)], axis=1)   # (sa, 1024)
    b14 = jnp.concatenate([pad_b(raw["b1"], _H1P),
                           pad_b(raw["b4"], _H1P)], axis=1)           # (1, 1024)
    # Row-split so state / action can be fed to the kernel without concatenating.
    w1s = w14[:state_dim].astype(cd)
    w1a = w14[state_dim:].astype(cd)

    # Second layers (per head).
    w2 = pad_w(raw["w2"], _H1P, _H2P).astype(cd)
    b2 = pad_b(raw["b2"], _H2P)
    w5 = pad_w(raw["w5"], _H1P, _H2P).astype(cd)
    b5 = pad_b(raw["b5"], _H2P)

    # Fused last layer: rows [0:384) = l3 -> lane 0, rows [384:768) = l6 -> lane 1.
    w3f = pad_w(raw["w3"], _H2P, _OUTP, col_off=0)
    w6f = pad_w(raw["w6"], _H2P, _OUTP, col_off=1)
    w36 = jnp.concatenate([w3f, w6f], axis=0).astype(cd)              # (768, 128)
    b36 = (jnp.zeros((1, _OUTP), jnp.float32)
           .at[0, 0].set(raw["b3"][0])
           .at[0, 1].set(raw["b6"][0]))

    return dict(w1s=w1s, w1a=w1a, b14=b14, w2=w2, b2=b2, w5=w5, b5=b5,
                w36=w36, b36=b36)


def critic_forward_ref(state, action, params):
    """Pure-JAX reference mirroring the kernel math on the SAME fused bf16 params."""
    cd = params["w2"].dtype
    s = state.astype(cd)
    a = action.astype(cd)
    h = jnp.dot(s, params["w1s"], preferred_element_type=jnp.float32)
    h = h + jnp.dot(a, params["w1a"], preferred_element_type=jnp.float32)
    h = jnp.maximum(h + params["b14"], 0.0).astype(cd)
    g1 = jnp.maximum(
        jnp.dot(h[:, :_H1P], params["w2"], preferred_element_type=jnp.float32)
        + params["b2"], 0.0).astype(cd)
    g2 = jnp.maximum(
        jnp.dot(h[:, _H1P:], params["w5"], preferred_element_type=jnp.float32)
        + params["b5"], 0.0).astype(cd)
    g = jnp.concatenate([g1, g2], axis=-1)
    q = jnp.dot(g, params["w36"], preferred_element_type=jnp.float32) + params["b36"]
    return q[:, 0:1], q[:, 1:2]


def critic_forward_f32_ref(state, action, raw):
    """Pure-f32 reference on the unpadded params (original module semantics)."""
    sa = jnp.concatenate([state, action], axis=1)

    def head(wa, ba, wb, bb, wc, bc):
        h = jnp.maximum(sa @ wa + ba, 0.0)
        h = jnp.maximum(h @ wb + bb, 0.0)
        return h @ wc + bc

    q1 = head(raw["w1"], raw["b1"], raw["w2"], raw["b2"], raw["w3"], raw["b3"])
    q2 = head(raw["w4"], raw["b4"], raw["w5"], raw["b5"], raw["w6"], raw["b6"])
    return q1, q2


if __name__ == "__main__":
    key = jax.random.PRNGKey(0)
    k_params, k_state, k_action = jax.random.split(key, 3)

    batch = 8
    state_dim = 16
    action_dim = 8

    raw = init_critic_params(k_params, state_dim, action_dim)
    params = prepare_critic_params(raw, state_dim, jnp.bfloat16)

    state = jax.random.normal(k_state, (batch, state_dim), jnp.float32)
    action = jax.random.normal(k_action, (batch, action_dim), jnp.float32)

    q1, q2 = critic_forward(state, action, params)
    q1 = jax.block_until_ready(q1)
    q2 = jax.block_until_ready(q2)
    assert q1.shape == (batch, 1) and q2.shape == (batch, 1)

    # Exact-math check vs a pure-JAX reference using the same fused bf16 params.
    r1, r2 = critic_forward_ref(state, action, params)
    assert jnp.allclose(q1, r1, atol=2e-3, rtol=2e-3)
    assert jnp.allclose(q2, r2, atol=2e-3, rtol=2e-3)

    # Sanity check vs the full-f32 original-semantics reference (bf16 quant noise).
    f1, f2 = critic_forward_f32_ref(state, action, raw)
    assert jnp.allclose(q1, f1, atol=5e-2, rtol=5e-2)
    assert jnp.allclose(q2, f2, atol=5e-2, rtol=5e-2)

    # Q1-only path matches.
    q1_only = critic_q1(state, action, params)
    q1_only = jax.block_until_ready(q1_only)
    assert jnp.allclose(q1_only, q1)

    print("KERNEL_OK")
</pallas_src>

<mosaic_0001>
module attributes {stable_mosaic.version = 11 : i64} {
  func.func @_critic_kernel(%arg0: i32, %arg1: memref<8x16xf32, #tpu.memory_space<vmem>>, %arg2: memref<8x8xf32, #tpu.memory_space<vmem>>, %arg3: memref<16x1024xbf16, #tpu.memory_space<vmem>>, %arg4: memref<8x1024xbf16, #tpu.memory_space<vmem>>, %arg5: memref<1x1024xf32, #tpu.memory_space<vmem>>, %arg6: memref<512x384xbf16, #tpu.memory_space<vmem>>, %arg7: memref<1x384xf32, #tpu.memory_space<vmem>>, %arg8: memref<512x384xbf16, #tpu.memory_space<vmem>>, %arg9: memref<1x384xf32, #tpu.memory_space<vmem>>, %arg10: memref<768x128xbf16, #tpu.memory_space<vmem>>, %arg11: memref<1x128xf32, #tpu.memory_space<vmem>>, %arg12: memref<8x128xf32, #tpu.memory_space<vmem>>) attributes {dimension_semantics = [#tpu.dimension_semantics<parallel>], iteration_bounds = array<i64: 1>, scalar_prefetch = 0 : i64, scratch_operands = 0 : i64, tpu.core_type = #tpu.core_type<tc>, window_params = [{transform_indices = @transform_0, window_bounds = array<i64: 8, 16>}, {transform_indices = @transform_1, window_bounds = array<i64: 8, 8>}, {pipeline_mode = #tpu.pipeline_mode<synchronous>, transform_indices = @transform_2, window_bounds = array<i64: 16, 1024>}, {pipeline_mode = #tpu.pipeline_mode<synchronous>, transform_indices = @transform_3, window_bounds = array<i64: 8, 1024>}, {pipeline_mode = #tpu.pipeline_mode<synchronous>, transform_indices = @transform_4, window_bounds = array<i64: 1, 1024>}, {pipeline_mode = #tpu.pipeline_mode<synchronous>, transform_indices = @transform_5, window_bounds = array<i64: 512, 384>}, {pipeline_mode = #tpu.pipeline_mode<synchronous>, transform_indices = @transform_6, window_bounds = array<i64: 1, 384>}, {pipeline_mode = #tpu.pipeline_mode<synchronous>, transform_indices = @transform_7, window_bounds = array<i64: 512, 384>}, {pipeline_mode = #tpu.pipeline_mode<synchronous>, transform_indices = @transform_8, window_bounds = array<i64: 1, 384>}, {pipeline_mode = #tpu.pipeline_mode<synchronous>, transform_indices = @transform_9, window_bounds = array<i64: 768, 128>}, {pipeline_mode = #tpu.pipeline_mode<synchronous>, transform_indices = @transform_10, window_bounds = array<i64: 1, 128>}, {transform_indices = @transform_11, window_bounds = array<i64: 8, 128>}]} {
    %c0 = arith.constant 0 : index
    %c0_0 = arith.constant 0 : index
    %0 = vector.load %arg1[%c0, %c0_0] : memref<8x16xf32, #tpu.memory_space<vmem>>, vector<8x16xf32>
    %1 = arith.truncf %0 : vector<8x16xf32> to vector<8x16xbf16>
    %c0_1 = arith.constant 0 : index
    %c0_2 = arith.constant 0 : index
    %2 = vector.load %arg2[%c0_1, %c0_2] : memref<8x8xf32, #tpu.memory_space<vmem>>, vector<8x8xf32>
    %3 = arith.truncf %2 : vector<8x8xf32> to vector<8x8xbf16>
    %c0_3 = arith.constant 0 : index
    %c0_4 = arith.constant 0 : index
    %4 = vector.load %arg3[%c0_3, %c0_4] : memref<16x1024xbf16, #tpu.memory_space<vmem>>, vector<16x1024xbf16>
    %cst = arith.constant dense<0.000000e+00> : vector<8x1024xf32>
    %5 = tpu.matmul %1, %4, %cst {dimension_numbers = #tpu.dot_dimension_numbers<[1], [0], [0], [1], [0, 0, 1, 1], [], []>} : vector<8x16xbf16>, vector<16x1024xbf16>, vector<8x1024xf32> -> vector<8x1024xf32>
    %c0_5 = arith.constant 0 : index
    %c0_6 = arith.constant 0 : index
    %6 = vector.load %arg4[%c0_5, %c0_6] : memref<8x1024xbf16, #tpu.memory_space<vmem>>, vector<8x1024xbf16>
    %cst_7 = arith.constant dense<0.000000e+00> : vector<8x1024xf32>
    %7 = tpu.matmul %3, %6, %cst_7 {dimension_numbers = #tpu.dot_dimension_numbers<[1], [0], [0], [1], [0, 0, 1, 1], [], []>} : vector<8x8xbf16>, vector<8x1024xbf16>, vector<8x1024xf32> -> vector<8x1024xf32>
    %8 = arith.addf %5, %7 : vector<8x1024xf32>
    %c0_8 = arith.constant 0 : index
    %c0_9 = arith.constant 0 : index
    %9 = vector.load %arg5[%c0_8, %c0_9] : memref<1x1024xf32, #tpu.memory_space<vmem>>, vector<1x1024xf32>
    %10 = vector.broadcast %9 : vector<1x1024xf32> to vector<8x1024xf32>
    %11 = arith.addf %8, %10 : vector<8x1024xf32>
    %cst_10 = arith.constant 0.000000e+00 : f32
    %12 = vector.broadcast %cst_10 : f32 to vector<8x1024xf32>
    %13 = arith.maximumf %11, %12 : vector<8x1024xf32>
    %14 = arith.truncf %13 : vector<8x1024xf32> to vector<8x1024xbf16>
    %15 = vector.extract_strided_slice %14 {offsets = [0, 0], sizes = [8, 512], strides = [1, 1]} : vector<8x1024xbf16> to vector<8x512xbf16>
    %16 = vector.extract_strided_slice %14 {offsets = [0, 512], sizes = [8, 512], strides = [1, 1]} : vector<8x1024xbf16> to vector<8x512xbf16>
    %c0_11 = arith.constant 0 : index
    %c0_12 = arith.constant 0 : index
    %17 = vector.load %arg6[%c0_11, %c0_12] : memref<512x384xbf16, #tpu.memory_space<vmem>>, vector<512x384xbf16>
    %cst_13 = arith.constant dense<0.000000e+00> : vector<8x384xf32>
    %18 = tpu.matmul %15, %17, %cst_13 {dimension_numbers = #tpu.dot_dimension_numbers<[1], [0], [0], [1], [0, 0, 1, 1], [], []>} : vector<8x512xbf16>, vector<512x384xbf16>, vector<8x384xf32> -> vector<8x384xf32>
    %c0_14 = arith.constant 0 : index
    %c0_15 = arith.constant 0 : index
    %19 = vector.load %arg7[%c0_14, %c0_15] : memref<1x384xf32, #tpu.memory_space<vmem>>, vector<1x384xf32>
    %20 = vector.broadcast %19 : vector<1x384xf32> to vector<8x384xf32>
    %21 = arith.addf %18, %20 : vector<8x384xf32>
    %cst_16 = arith.constant 0.000000e+00 : f32
    %22 = vector.broadcast %cst_16 : f32 to vector<8x384xf32>
    %23 = arith.maximumf %21, %22 : vector<8x384xf32>
    %24 = arith.truncf %23 : vector<8x384xf32> to vector<8x384xbf16>
    %c0_17 = arith.constant 0 : index
    %c0_18 = arith.constant 0 : index
    %25 = vector.load %arg8[%c0_17, %c0_18] : memref<512x384xbf16, #tpu.memory_space<vmem>>, vector<512x384xbf16>
    %cst_19 = arith.constant dense<0.000000e+00> : vector<8x384xf32>
    %26 = tpu.matmul %16, %25, %cst_19 {dimension_numbers = #tpu.dot_dimension_numbers<[1], [0], [0], [1], [0, 0, 1, 1], [], []>} : vector<8x512xbf16>, vector<512x384xbf16>, vector<8x384xf32> -> vector<8x384xf32>
    %c0_20 = arith.constant 0 : index
    %c0_21 = arith.constant 0 : index
    %27 = vector.load %arg9[%c0_20, %c0_21] : memref<1x384xf32, #tpu.memory_space<vmem>>, vector<1x384xf32>
    %28 = vector.broadcast %27 : vector<1x384xf32> to vector<8x384xf32>
    %29 = arith.addf %26, %28 : vector<8x384xf32>
    %cst_22 = arith.constant 0.000000e+00 : f32
    %30 = vector.broadcast %cst_22 : f32 to vector<8x384xf32>
    %31 = arith.maximumf %29, %30 : vector<8x384xf32>
    %32 = arith.truncf %31 : vector<8x384xf32> to vector<8x384xbf16>
    %33 = tpu.concatenate %24, %32 in 1 : vector<8x384xbf16>, vector<8x384xbf16> -> vector<8x768xbf16>
    %c0_23 = arith.constant 0 : index
    %c0_24 = arith.constant 0 : index
    %34 = vector.load %arg10[%c0_23, %c0_24] : memref<768x128xbf16, #tpu.memory_space<vmem>>, vector<768x128xbf16>
    %cst_25 = arith.constant dense<0.000000e+00> : vector<8x128xf32>
    %35 = tpu.matmul %33, %34, %cst_25 {dimension_numbers = #tpu.dot_dimension_numbers<[1], [0], [0], [1], [0, 0, 1, 1], [], []>} : vector<8x768xbf16>, vector<768x128xbf16>, vector<8x128xf32> -> vector<8x128xf32>
    %c0_26 = arith.constant 0 : index
    %c0_27 = arith.constant 0 : index
    %36 = vector.load %arg11[%c0_26, %c0_27] : memref<1x128xf32, #tpu.memory_space<vmem>>, vector<1x128xf32>
    %37 = vector.broadcast %36 : vector<1x128xf32> to vector<8x128xf32>
    %38 = arith.addf %35, %37 : vector<8x128xf32>
    %c0_28 = arith.constant 0 : index
    %c0_29 = arith.constant 0 : index
    %39 = vector.load %arg12[%c0_28, %c0_29] : memref<8x128xf32, #tpu.memory_space<vmem>>, vector<8x128xf32>
    tpu.vector_store %arg12[%c0_28, %c0_29], %38 {strides = array<i32>} : memref<8x128xf32, #tpu.memory_space<vmem>>, vector<8x128xf32>,
    return
  }
  func.func @transform_0(%arg0: i32) -> (i32, i32) {
    %c0_i32 = arith.constant 0 : i32
    %c0_i32_0 = arith.constant 0 : i32
    return %arg0, %c0_i32 : i32, i32
  }
  func.func @transform_1(%arg0: i32) -> (i32, i32) {
    %c0_i32 = arith.constant 0 : i32
    %c0_i32_0 = arith.constant 0 : i32
    return %arg0, %c0_i32 : i32, i32
  }
  func.func @transform_2(%arg0: i32) -> (i32, i32) {
    %c0_i32 = arith.constant 0 : i32
    %c0_i32_0 = arith.constant 0 : i32
    %c0_i32_1 = arith.constant 0 : i32
    return %c0_i32, %c0_i32_0 : i32, i32
  }
  func.func @transform_3(%arg0: i32) -> (i32, i32) {
    %c0_i32 = arith.constant 0 : i32
    %c0_i32_0 = arith.constant 0 : i32
    %c0_i32_1 = arith.constant 0 : i32
    return %c0_i32, %c0_i32_0 : i32, i32
  }
  func.func @transform_4(%arg0: i32) -> (i32, i32) {
    %c0_i32 = arith.constant 0 : i32
    %c0_i32_0 = arith.constant 0 : i32
    %c0_i32_1 = arith.constant 0 : i32
    return %c0_i32, %c0_i32_0 : i32, i32
  }
  func.func @transform_5(%arg0: i32) -> (i32, i32) {
    %c0_i32 = arith.constant 0 : i32
    %c0_i32_0 = arith.constant 0 : i32
    %c0_i32_1 = arith.constant 0 : i32
    return %c0_i32, %c0_i32_0 : i32, i32
  }
  func.func @transform_6(%arg0: i32) -> (i32, i32) {
    %c0_i32 = arith.constant 0 : i32
    %c0_i32_0 = arith.constant 0 : i32
    %c0_i32_1 = arith.constant 0 : i32
    return %c0_i32, %c0_i32_0 : i32, i32
  }
  func.func @transform_7(%arg0: i32) -> (i32, i32) {
    %c0_i32 = arith.constant 0 : i32
    %c0_i32_0 = arith.constant 0 : i32
    %c0_i32_1 = arith.constant 0 : i32
    return %c0_i32, %c0_i32_0 : i32, i32
  }
  func.func @transform_8(%arg0: i32) -> (i32, i32) {
    %c0_i32 = arith.constant 0 : i32
    %c0_i32_0 = arith.constant 0 : i32
    %c0_i32_1 = arith.constant 0 : i32
    return %c0_i32, %c0_i32_0 : i32, i32
  }
  func.func @transform_9(%arg0: i32) -> (i32, i32) {
    %c0_i32 = arith.constant 0 : i32
    %c0_i32_0 = arith.constant 0 : i32
    %c0_i32_1 = arith.constant 0 : i32
    return %c0_i32, %c0_i32_0 : i32, i32
  }
  func.func @transform_10(%arg0: i32) -> (i32, i32) {
    %c0_i32 = arith.constant 0 : i32
    %c0_i32_0 = arith.constant 0 : i32
    %c0_i32_1 = arith.constant 0 : i32
    return %c0_i32, %c0_i32_0 : i32, i32
  }
  func.func @transform_11(%arg0: i32) -> (i32, i32) {
    %c0_i32 = arith.constant 0 : i32
    %c0_i32_0 = arith.constant 0 : i32
    return %arg0, %c0_i32 : i32, i32
  }
}

module attributes {stable_mosaic.version = 11 : i64} {
  func.func @_critic_kernel(%arg0: i32, %arg1: memref<8x16xf32, #tpu.memory_space<vmem>>, %arg2: memref<8x8xf32, #tpu.memory_space<vmem>>, %arg3: memref<16x1024xbf16, #tpu.memory_space<vmem>>, %arg4: memref<8x1024xbf16, #tpu.memory_space<vmem>>, %arg5: memref<1x1024xf32, #tpu.memory_space<vmem>>, %arg6: memref<512x384xbf16, #tpu.memory_space<vmem>>, %arg7: memref<1x384xf32, #tpu.memory_space<vmem>>, %arg8: memref<512x384xbf16, #tpu.memory_space<vmem>>, %arg9: memref<1x384xf32, #tpu.memory_space<vmem>>, %arg10: memref<768x128xbf16, #tpu.memory_space<vmem>>, %arg11: memref<1x128xf32, #tpu.memory_space<vmem>>, %arg12: memref<8x128xf32, #tpu.memory_space<vmem>>) attributes {dimension_semantics = [#tpu.dimension_semantics<parallel>], iteration_bounds = array<i64: 1>, scalar_prefetch = 0 : i64, scratch_operands = 0 : i64, tpu.core_type = #tpu.core_type<tc>, window_params = [{transform_indices = @transform_0, window_bounds = array<i64: 8, 16>}, {transform_indices = @transform_1, window_bounds = array<i64: 8, 8>}, {pipeline_mode = #tpu.pipeline_mode<synchronous>, transform_indices = @transform_2, window_bounds = array<i64: 16, 1024>}, {pipeline_mode = #tpu.pipeline_mode<synchronous>, transform_indices = @transform_3, window_bounds = array<i64: 8, 1024>}, {pipeline_mode = #tpu.pipeline_mode<synchronous>, transform_indices = @transform_4, window_bounds = array<i64: 1, 1024>}, {pipeline_mode = #tpu.pipeline_mode<synchronous>, transform_indices = @transform_5, window_bounds = array<i64: 512, 384>}, {pipeline_mode = #tpu.pipeline_mode<synchronous>, transform_indices = @transform_6, window_bounds = array<i64: 1, 384>}, {pipeline_mode = #tpu.pipeline_mode<synchronous>, transform_indices = @transform_7, window_bounds = array<i64: 512, 384>}, {pipeline_mode = #tpu.pipeline_mode<synchronous>, transform_indices = @transform_8, window_bounds = array<i64: 1, 384>}, {pipeline_mode = #tpu.pipeline_mode<synchronous>, transform_indices = @transform_9, window_bounds = array<i64: 768, 128>}, {pipeline_mode = #tpu.pipeline_mode<synchronous>, transform_indices = @transform_10, window_bounds = array<i64: 1, 128>}, {transform_indices = @transform_11, window_bounds = array<i64: 8, 128>}]} {
    %c0 = arith.constant 0 : index
    %c0_0 = arith.constant 0 : index
    %0 = vector.load %arg1[%c0, %c0_0] : memref<8x16xf32, #tpu.memory_space<vmem>>, vector<8x16xf32>
    %1 = arith.truncf %0 : vector<8x16xf32> to vector<8x16xbf16>
    %c0_1 = arith.constant 0 : index
    %c0_2 = arith.constant 0 : index
    %2 = vector.load %arg2[%c0_1, %c0_2] : memref<8x8xf32, #tpu.memory_space<vmem>>, vector<8x8xf32>
    %3 = arith.truncf %2 : vector<8x8xf32> to vector<8x8xbf16>
    %c0_3 = arith.constant 0 : index
    %c0_4 = arith.constant 0 : index
    %4 = vector.load %arg3[%c0_3, %c0_4] : memref<16x1024xbf16, #tpu.memory_space<vmem>>, vector<16x1024xbf16>
    %cst = arith.constant dense<0.000000e+00> : vector<8x1024xf32>
    %5 = tpu.matmul %1, %4, %cst {dimension_numbers = #tpu.dot_dimension_numbers<[1], [0], [0], [1], [0, 0, 1, 1], [], []>} : vector<8x16xbf16>, vector<16x1024xbf16>, vector<8x1024xf32> -> vector<8x1024xf32>
    %c0_5 = arith.constant 0 : index
    %c0_6 = arith.constant 0 : index
    %6 = vector.load %arg4[%c0_5, %c0_6] : memref<8x1024xbf16, #tpu.memory_space<vmem>>, vector<8x1024xbf16>
    %cst_7 = arith.constant dense<0.000000e+00> : vector<8x1024xf32>
    %7 = tpu.matmul %3, %6, %cst_7 {dimension_numbers = #tpu.dot_dimension_numbers<[1], [0], [0], [1], [0, 0, 1, 1], [], []>} : vector<8x8xbf16>, vector<8x1024xbf16>, vector<8x1024xf32> -> vector<8x1024xf32>
    %8 = arith.addf %5, %7 : vector<8x1024xf32>
    %c0_8 = arith.constant 0 : index
    %c0_9 = arith.constant 0 : index
    %9 = vector.load %arg5[%c0_8, %c0_9] : memref<1x1024xf32, #tpu.memory_space<vmem>>, vector<1x1024xf32>
    %10 = vector.broadcast %9 : vector<1x1024xf32> to vector<8x1024xf32>
    %11 = arith.addf %8, %10 : vector<8x1024xf32>
    %cst_10 = arith.constant 0.000000e+00 : f32
    %12 = vector.broadcast %cst_10 : f32 to vector<8x1024xf32>
    %13 = arith.maximumf %11, %12 : vector<8x1024xf32>
    %14 = arith.truncf %13 : vector<8x1024xf32> to vector<8x1024xbf16>
    %15 = vector.extract_strided_slice %14 {offsets = [0, 0], sizes = [8, 512], strides = [1, 1]} : vector<8x1024xbf16> to vector<8x512xbf16>
    %16 = vector.extract_strided_slice %14 {offsets = [0, 512], sizes = [8, 512], strides = [1, 1]} : vector<8x1024xbf16> to vector<8x512xbf16>
    %c0_11 = arith.constant 0 : index
    %c0_12 = arith.constant 0 : index
    %17 = vector.load %arg6[%c0_11, %c0_12] : memref<512x384xbf16, #tpu.memory_space<vmem>>, vector<512x384xbf16>
    %cst_13 = arith.constant dense<0.000000e+00> : vector<8x384xf32>
    %18 = tpu.matmul %15, %17, %cst_13 {dimension_numbers = #tpu.dot_dimension_numbers<[1], [0], [0], [1], [0, 0, 1, 1], [], []>} : vector<8x512xbf16>, vector<512x384xbf16>, vector<8x384xf32> -> vector<8x384xf32>
    %c0_14 = arith.constant 0 : index
    %c0_15 = arith.constant 0 : index
    %19 = vector.load %arg7[%c0_14, %c0_15] : memref<1x384xf32, #tpu.memory_space<vmem>>, vector<1x384xf32>
    %20 = vector.broadcast %19 : vector<1x384xf32> to vector<8x384xf32>
    %21 = arith.addf %18, %20 : vector<8x384xf32>
    %cst_16 = arith.constant 0.000000e+00 : f32
    %22 = vector.broadcast %cst_16 : f32 to vector<8x384xf32>
    %23 = arith.maximumf %21, %22 : vector<8x384xf32>
    %24 = arith.truncf %23 : vector<8x384xf32> to vector<8x384xbf16>
    %c0_17 = arith.constant 0 : index
    %c0_18 = arith.constant 0 : index
    %25 = vector.load %arg8[%c0_17, %c0_18] : memref<512x384xbf16, #tpu.memory_space<vmem>>, vector<512x384xbf16>
    %cst_19 = arith.constant dense<0.000000e+00> : vector<8x384xf32>
    %26 = tpu.matmul %16, %25, %cst_19 {dimension_numbers = #tpu.dot_dimension_numbers<[1], [0], [0], [1], [0, 0, 1, 1], [], []>} : vector<8x512xbf16>, vector<512x384xbf16>, vector<8x384xf32> -> vector<8x384xf32>
    %c0_20 = arith.constant 0 : index
    %c0_21 = arith.constant 0 : index
    %27 = vector.load %arg9[%c0_20, %c0_21] : memref<1x384xf32, #tpu.memory_space<vmem>>, vector<1x384xf32>
    %28 = vector.broadcast %27 : vector<1x384xf32> to vector<8x384xf32>
    %29 = arith.addf %26, %28 : vector<8x384xf32>
    %cst_22 = arith.constant 0.000000e+00 : f32
    %30 = vector.broadcast %cst_22 : f32 to vector<8x384xf32>
    %31 = arith.maximumf %29, %30 : vector<8x384xf32>
    %32 = arith.truncf %31 : vector<8x384xf32> to vector<8x384xbf16>
    %33 = tpu.concatenate %24, %32 in 1 : vector<8x384xbf16>, vector<8x384xbf16> -> vector<8x768xbf16>
    %c0_23 = arith.constant 0 : index
    %c0_24 = arith.constant 0 : index
    %34 = vector.load %arg10[%c0_23, %c0_24] : memref<768x128xbf16, #tpu.memory_space<vmem>>, vector<768x128xbf16>
    %cst_25 = arith.constant dense<0.000000e+00> : vector<8x128xf32>
    %35 = tpu.matmul %33, %34, %cst_25 {dimension_numbers = #tpu.dot_dimension_numbers<[1], [0], [0], [1], [0, 0, 1, 1], [], []>} : vector<8x768xbf16>, vector<768x128xbf16>, vector<8x128xf32> -> vector<8x128xf32>
    %c0_26 = arith.constant 0 : index
    %c0_27 = arith.constant 0 : index
    %36 = vector.load %arg11[%c0_26, %c0_27] : memref<1x128xf32, #tpu.memory_space<vmem>>, vector<1x128xf32>
    %37 = vector.broadcast %36 : vector<1x128xf32> to vector<8x128xf32>
    %38 = arith.addf %35, %37 : vector<8x128xf32>
    %c0_28 = arith.constant 0 : index
    %c0_29 = arith.constant 0 : index
    %39 = vector.load %arg12[%c0_28, %c0_29] : memref<8x128xf32, #tpu.memory_space<vmem>>, vector<8x128xf32>
    tpu.vector_store %arg12[%c0_28, %c0_29], %38 {strides = array<i32>} : memref<8x128xf32, #tpu.memory_space<vmem>>, vector<8x128xf32>,
    return
  }
  func.func @transform_0(%arg0: i32) -> (i32, i32) {
    %c0_i32 = arith.constant 0 : i32
    %c0_i32_0 = arith.constant 0 : i32
    return %arg0, %c0_i32 : i32, i32
  }
  func.func @transform_1(%arg0: i32) -> (i32, i32) {
    %c0_i32 = arith.constant 0 : i32
    %c0_i32_0 = arith.constant 0 : i32
    return %arg0, %c0_i32 : i32, i32
  }
  func.func @transform_2(%arg0: i32) -> (i32, i32) {
    %c0_i32 = arith.constant 0 : i32
    %c0_i32_0 = arith.constant 0 : i32
    %c0_i32_1 = arith.constant 0 : i32
    return %c0_i32, %c0_i32_0 : i32, i32
  }
  func.func @transform_3(%arg0: i32) -> (i32, i32) {
    %c0_i32 = arith.constant 0 : i32
    %c0_i32_0 = arith.constant 0 : i32
    %c0_i32_1 = arith.constant 0 : i32
    return %c0_i32, %c0_i32_0 : i32, i32
  }
  func.func @transform_4(%arg0: i32) -> (i32, i32) {
    %c0_i32 = arith.constant 0 : i32
    %c0_i32_0 = arith.constant 0 : i32
    %c0_i32_1 = arith.constant 0 : i32
    return %c0_i32, %c0_i32_0 : i32, i32
  }
  func.func @transform_5(%arg0: i32) -> (i32, i32) {
    %c0_i32 = arith.constant 0 : i32
    %c0_i32_0 = arith.constant 0 : i32
    %c0_i32_1 = arith.constant 0 : i32
    return %c0_i32, %c0_i32_0 : i32, i32
  }
  func.func @transform_6(%arg0: i32) -> (i32, i32) {
    %c0_i32 = arith.constant 0 : i32
    %c0_i32_0 = arith.constant 0 : i32
    %c0_i32_1 = arith.constant 0 : i32
    return %c0_i32, %c0_i32_0 : i32, i32
  }
  func.func @transform_7(%arg0: i32) -> (i32, i32) {
    %c0_i32 = arith.constant 0 : i32
    %c0_i32_0 = arith.constant 0 : i32
    %c0_i32_1 = arith.constant 0 : i32
    return %c0_i32, %c0_i32_0 : i32, i32
  }
  func.func @transform_8(%arg0: i32) -> (i32, i32) {
    %c0_i32 = arith.constant 0 : i32
    %c0_i32_0 = arith.constant 0 : i32
    %c0_i32_1 = arith.constant 0 : i32
    return %c0_i32, %c0_i32_0 : i32, i32
  }
  func.func @transform_9(%arg0: i32) -> (i32, i32) {
    %c0_i32 = arith.constant 0 : i32
    %c0_i32_0 = arith.constant 0 : i32
    %c0_i32_1 = arith.constant 0 : i32
    return %c0_i32, %c0_i32_0 : i32, i32
  }
  func.func @transform_10(%arg0: i32) -> (i32, i32) {
    %c0_i32 = arith.constant 0 : i32
    %c0_i32_0 = arith.constant 0 : i32
    %c0_i32_1 = arith.constant 0 : i32
    return %c0_i32, %c0_i32_0 : i32, i32
  }
  func.func @transform_11(%arg0: i32) -> (i32, i32) {
    %c0_i32 = arith.constant 0 : i32
    %c0_i32_0 = arith.constant 0 : i32
    return %arg0, %c0_i32 : i32, i32
  }
}

</mosaic_0001>

<bundles_post_ra>
// kernel: tpu_custom_call.1
= control target key start
LH: loop header
LB: loop body
LE: loop exit
PB: predicated region body
PF: predicated region fallthrough
CT: control target
= control target key end

     0   :  { %16 = vsyncpa [#allocation3], 0  ;;  %s4046_s0 = inlined_call_operand.hbm [shape: f32[8,16], index: 0, kind: input, shape index: {}]   ;;  %s4047_s1 = inlined_call_operand.hbm [shape: f32[8,8], index: 1, kind: input, shape index: {}]   ;;  %s4048_s2 = inlined_call_operand.hbm [shape: bf16[16,1024], index: 2, kind: input, shape index: {}]   ;;  %s4049_s3 = inlined_call_operand.hbm [shape: bf16[8,1024], index: 3, kind: input, shape index: {}]   ;;  %s4050_s4 = inlined_call_operand.vmem [shape: f32[1,1024], index: 4, kind: input, shape index: {}]   ;;  %s4051_s5 = inlined_call_operand.hbm [shape: bf16[512,384], index: 5, kind: input, shape index: {}]   ;;  %s4052_s6 = inlined_call_operand.vmem [shape: f32[1,384], index: 6, kind: input, shape index: {}]   ;;  %s4053_s7 = inlined_call_operand.hbm [shape: bf16[512,384], index: 7, kind: input, shape index: {}]   ;;  %s4054_s8 = inlined_call_operand.vmem [shape: f32[1,384], index: 8, kind: input, shape index: {}]   ;;  %s4055_s9 = inlined_call_operand.hbm [shape: bf16[768,128], index: 9, kind: input, shape index: {}]   ;;  %s4056_s10 = inlined_call_operand.vmem [shape: f32[1,128], index: 10, kind: input, shape index: {}]   ;;  %s4057_s11 = inlined_call_operand.hbm [shape: f32[8,128], index: 11, kind: output, shape index: {}]  }
   0x1   :  { %17 = vsyncpa [#allocation6], 0 }
   0x2   :  { %18 = vsyncpa [#allocation9], 0 }
   0x3   :  { %19 = vsyncpa [#allocation12], 0 }
   0x4   :  { %20 = vsyncpa [#allocation4], 0  ;;  %s3760_s17 = smov [#allocation5]   ;;  %s3761_s19 = smov [#allocation8]  }
   0x5   :  { %s37_s18 = sshll.u32 %s3760_s17, 4  ;;  %s59_s20 = sshll.u32 %s3761_s19, 4  ;;  %s38_s18 = int_to_ptr.vmem [resolvable:$true] %s37_s18  ;;  %s60_s20 = int_to_ptr.vmem [resolvable:$true] %s59_s20 }
   0x6   :  { %s3574_s23 = scalar_lea.hbm %s4047_s1, 128 }
   0x7   :  { %p3575_p0 = scmp.ne.s32.totalorder %s4047_s1, %s3574_s23  ;;  %p3578_p1 = scmp.lt.u32.totalorder %s3574_s23, %s4047_s1 }
   0x9   :  { %p3580_p2 = pnand %p3578_p1, %p3575_p0 }
   0xb   :  { %3583 = shalt.err (!%p3580_p2)
}
   0xc   :  { %s3584_s28 = scalar_lea.vmem %s38_s18, 128  ;;  %p3589_p4 = scmp.lt.s32.totalorder %s38_s18, %s38_s18 }
   0xd   :  { %p3585_p3 = scmp.ne.s32.totalorder %s38_s18, %s3584_s28  ;;  %p3590_p5 = scmp.lt.s32.totalorder %s3584_s28, %s3584_s28 }
   0xf   :  { %p3591_p6 = por %p3590_p5, %p3589_p4 }
  0x11   :  { %p3592_p7 = pnand %p3591_p6, %p3585_p3 }
  0x13   :  { %3595 = shalt.err (!%p3592_p7)
}
  0x14   :  { %40 = dma.hbm_to_vmem [thread:$0]  %s4047_s1, 128, %s38_s18, [#allocation6]  }
  0x15   :  { %s3596_s14 = scalar_lea.hbm %s4049_s3, 512 }
  0x16   :  { %p3597_p8 = scmp.ne.s32.totalorder %s4049_s3, %s3596_s14  ;;  %p3600_p9 = scmp.lt.u32.totalorder %s3596_s14, %s4049_s3 }
  0x18   :  { %p3602_p10 = pnand %p3600_p9, %p3597_p8 }
  0x1a   :  { %3605 = shalt.err (!%p3602_p10)
}
  0x1b   :  { %s3606_s21 = scalar_lea.vmem %s60_s20, 512  ;;  %p3611_p12 = scmp.lt.s32.totalorder %s60_s20, %s60_s20 }
  0x1c   :  { %p3607_p11 = scmp.ne.s32.totalorder %s60_s20, %s3606_s21  ;;  %p3612_p13 = scmp.lt.s32.totalorder %s3606_s21, %s3606_s21 }
  0x1e   :  { %p3613_p0 = por %p3612_p13, %p3611_p12 }
  0x20   :  { %p3614_p1 = pnand %p3613_p0, %p3607_p11 }
  0x22   :  { %3617 = shalt.err (!%p3614_p1)
}
  0x23   :  { %62 = dma.hbm_to_vmem [thread:$0]  %s4049_s3, 512, %s60_s20, [#allocation9]  }
  0x24   :  { %s3762_s22 = smov [#allocation11]   ;;  %s3763_s24 = smov [#allocation2]  }
  0x25   :  { %s84_s23 = sshll.u32 %s3762_s22, 4  ;;  %s27_s25 = sshll.u32 %s3763_s24, 4  ;;  %s85_s23 = int_to_ptr.vmem [resolvable:$true] %s84_s23  ;;  %s28_s25 = int_to_ptr.vmem [resolvable:$true] %s27_s25 }
  0x26   :  { %s3618_s28 = scalar_lea.hbm %s4053_s7, 12288 }
  0x27   :  { %p3619_p2 = scmp.ne.s32.totalorder %s4053_s7, %s3618_s28  ;;  %p3622_p3 = scmp.lt.u32.totalorder %s3618_s28, %s4053_s7 }
  0x29   :  { %p3624_p4 = pnand %p3622_p3, %p3619_p2 }
  0x2b   :  { %3627 = shalt.err (!%p3624_p4)
}
  0x2c   :  { %s3628_s3 = scalar_lea.vmem %s85_s23, 12288  ;;  %p3633_p6 = scmp.lt.s32.totalorder %s85_s23, %s85_s23 }
  0x2d   :  { %p3629_p5 = scmp.ne.s32.totalorder %s85_s23, %s3628_s3  ;;  %p3634_p7 = scmp.lt.s32.totalorder %s3628_s3, %s3628_s3 }
  0x2f   :  { %p3635_p8 = por %p3634_p7, %p3633_p6 }
  0x31   :  { %p3636_p9 = pnand %p3635_p8, %p3629_p5 }
  0x33   :  { %3639 = shalt.err (!%p3636_p9)
}
  0x34   :  { %s3764_s20 = smov 192   ;;  %s3765_s14 = smov 12  }
  0x35   :  { %90 = dma.hbm_to_vmem [thread:$0]  %s4053_s7, 12288, %s85_s23, [#allocation12], %s3764_s20, %s3764_s20, %s3765_s14  }
  0x36   :  { %s3640_s21 = scalar_lea.hbm %s4046_s0, 128 }
  0x37   :  { %p3641_p10 = scmp.ne.s32.totalorder %s4046_s0, %s3640_s21  ;;  %p3644_p11 = scmp.lt.u32.totalorder %s3640_s21, %s4046_s0 }
  0x39   :  { %p3646_p12 = pnand %p3644_p11, %p3641_p10 }
  0x3b   :  { %3649 = shalt.err (!%p3646_p12)
}
  0x3c   :  { %s3650_s26 = scalar_lea.vmem %s28_s25, 128  ;;  %p3655_p0 = scmp.lt.s32.totalorder %s28_s25, %s28_s25 }
  0x3d   :  { %p3651_p13 = scmp.ne.s32.totalorder %s28_s25, %s3650_s26  ;;  %p3656_p1 = scmp.lt.s32.totalorder %s3650_s26, %s3650_s26 }
  0x3f   :  { %p3657_p2 = por %p3656_p1, %p3655_p0 }
  0x41   :  { %p3658_p3 = pnand %p3657_p2, %p3651_p13 }
  0x43   :  { %3661 = shalt.err (!%p3658_p3)
}
  0x44   :  { %30 = dma.hbm_to_vmem [thread:$0]  %s4046_s0, 128, %s28_s25, [#allocation3]  }
  0x45   :  { %s3766_s27 = smov [#allocation7]   ;;  %s3662_s12 = scalar_lea.hbm %s4048_s2, 1024 }
  0x46   :  { %s46_s28 = sshll.u32 %s3766_s27, 4  ;;  %p3663_p4 = scmp.ne.s32.totalorder %s4048_s2, %s3662_s12  ;;  %s47_s28 = int_to_ptr.vmem [resolvable:$true] %s46_s28 }
  0x47   :  { %p3666_p5 = scmp.lt.u32.totalorder %s3662_s12, %s4048_s2 }
  0x49   :  { %p3668_p6 = pnand %p3666_p5, %p3663_p4 }
  0x4b   :  { %3671 = shalt.err (!%p3668_p6)
}
  0x4c   :  { %s3672_s17 = scalar_lea.vmem %s47_s28, 1024  ;;  %p3677_p8 = scmp.lt.s32.totalorder %s47_s28, %s47_s28 }
  0x4d   :  { %p3673_p7 = scmp.ne.s32.totalorder %s47_s28, %s3672_s17  ;;  %p3678_p9 = scmp.lt.s32.totalorder %s3672_s17, %s3672_s17 }
  0x4f   :  { %p3679_p10 = por %p3678_p9, %p3677_p8 }
  0x51   :  { %p3680_p11 = pnand %p3679_p10, %p3673_p7 }
  0x53   :  { %3683 = shalt.err (!%p3680_p11)
}
  0x54   :  { %s3767_s0 = smov 512   ;;  %s3768_s25 = smov 32  }
  0x55   :  { %52 = dma.hbm_to_vmem [thread:$0]  %s4048_s2, 1024, %s47_s28, [#allocation6], %s3767_s0, %s3767_s0, %s3768_s25  }
  0x56   :  { %s3769_s1 = smov [#allocation10]   ;;  %s3770_s22 = smov [#allocation13]  }
  0x57   :  { %s70_s18 = sshll.u32 %s3769_s1, 4  ;;  %s98_s24 = sshll.u32 %s3770_s22, 4  ;;  %s71_s18 = int_to_ptr.vmem [resolvable:$true] %s70_s18  ;;  %s99_s24 = int_to_ptr.vmem [resolvable:$true] %s98_s24 }
  0x58   :  { %s3684_s23 = scalar_lea.hbm %s4051_s5, 12288 }
  0x59   :  { %p3685_p12 = scmp.ne.s32.totalorder %s4051_s5, %s3684_s23  ;;  %p3688_p13 = scmp.lt.u32.totalorder %s3684_s23, %s4051_s5 }
  0x5b   :  { %p3690_p0 = pnand %p3688_p13, %p3685_p12 }
  0x5d   :  { %3693 = shalt.err (!%p3690_p0)
}
  0x5e   :  { %s3694_s2 = scalar_lea.vmem %s71_s18, 12288  ;;  %p3699_p2 = scmp.lt.s32.totalorder %s71_s18, %s71_s18 }
  0x5f   :  { %p3695_p1 = scmp.ne.s32.totalorder %s71_s18, %s3694_s2  ;;  %p3700_p3 = scmp.lt.s32.totalorder %s3694_s2, %s3694_s2 }
  0x61   :  { %p3701_p4 = por %p3700_p3, %p3699_p2 }
  0x63   :  { %p3702_p5 = pnand %p3701_p4, %p3695_p1 }
  0x65   :  { %3705 = shalt.err (!%p3702_p5)
}
  0x66   :  { %76 = dma.hbm_to_vmem [thread:$0]  %s4051_s5, 12288, %s71_s18, [#allocation9], %s3764_s20, %s3764_s20, %s3765_s14  }
  0x67   :  { %s3706_s16 = scalar_lea.hbm %s4055_s9, 6144 }
  0x68   :  { %p3707_p6 = scmp.ne.s32.totalorder %s4055_s9, %s3706_s16  ;;  %p3710_p7 = scmp.lt.u32.totalorder %s3706_s16, %s4055_s9 }
  0x6a   :  { %p3712_p8 = pnand %p3710_p7, %p3707_p6 }
  0x6c   :  { %3715 = shalt.err (!%p3712_p8)
}
  0x6d   :  { %s3716_s21 = scalar_lea.vmem %s99_s24, 6144  ;;  %p3721_p10 = scmp.lt.s32.totalorder %s99_s24, %s99_s24 }
  0x6e   :  { %p3717_p9 = scmp.ne.s32.totalorder %s99_s24, %s3716_s21  ;;  %p3722_p11 = scmp.lt.s32.totalorder %s3716_s21, %s3716_s21 }
  0x70   :  { %p3723_p12 = por %p3722_p11, %p3721_p10 }
  0x72   :  { %p3724_p13 = pnand %p3723_p12, %p3717_p9 }
  0x74   :  { %3727 = shalt.err (!%p3724_p13)
}
  0x75   :  { %s3771_s5 = smov 64   ;;  %s3772_s20 = smov 4  }
  0x76   :  { %104 = dma.hbm_to_vmem [thread:$0]  %s4055_s9, 6144, %s99_s24, [#allocation12], %s3771_s5, %s3771_s5, %s3772_s20  }
  0x77   :  { %3750 = dma.done.wait [#allocation3], 128  }
  0x78   :  { %3751 = vsyncadd [#allocation3], 4294967168 }
  0x79   :  { %3752 = dma.done.wait [#allocation6], 1152  }
  0x7a   :  { %3753 = vsyncadd [#allocation6], 4294966144 }
  0x7b   :  { %3754 = dma.done.wait [#allocation9], 12800  }
  0x7c   :  { %3755 = vsyncadd [#allocation9], 4294954496 }
  0x7d   :  { %3756 = dma.done.wait [#allocation12], 18432  }
  0x7e   :  { %3757 = vsyncadd [#allocation12], 4294948864  ;;  %v3773_v0 = vmov 0   ;;  %v141_v1 = vld [vmem:[#allocation8] sm:$0xff]  ;;  %vm169_vm0 = vcmask 1043456   ;;  %v131_v8 = vld [vmem:[#allocation5] sm:$0xff] }
  0x7f   :  { %226 = vmatprep.mubr.bf16.mxu1 %v3773_v0  ;;  %434 = vmatprep.mubr.bf16.mxu0 %v3773_v0  ;;  %v133_v2 = vld [vmem:[#allocation7] sm:$0xff]  ;;  %v2813_v4 = vcombine.high %v141_v1, %v141_v1  ;;  %v2812_v6 = vcombine.low %v141_v1, %v141_v1  ;;  %v142_v9 = vld [vmem:[#allocation8 + $0x8] sm:$0xff]  ;;  %v129_v10 = vld [vmem:[#allocation2] sm:$0xff]  ;;  %v132_v17 = vpack.c.bf16 %v131_v8, %v131_v8  ;;  %vm165_vm1 = vcmask 64512   ;;  %s3774_s7 = smov [#allocation14]  }
  0x80   :  { %v137_v3 = vld [vmem:[#allocation7 + $0x20] sm:$0xff]  ;;  %v2815_v11 = vcombine.high %v142_v9, %v142_v9  ;;  %v2814_v12 = vcombine.low %v142_v9, %v142_v9  ;;  %v143_v13 = vld [vmem:[#allocation8 + $0x10] sm:$0xff]  ;;  %v3929_v18 = vpack.c.bf16 %v129_v10, %v129_v10  ;;  %vm398_vm2 = vcmask 130048   ;;  %v144_v25 = vld [vmem:[#allocation8 + $0x18] sm:$0xff]  ;;  %s2800_s23 = sshll.u32 %s3774_s7, 4  ;;  %s2801_s23 = int_to_ptr.vmem [resolvable:$true] %s2800_s23 }
  0x81   :  { %v2829_v5 = vcombine.high %v133_v2, %v137_v3  ;;  %v2828_v7 = vcombine.low %v133_v2, %v137_v3  ;;  %v135_v14 = vld [vmem:[#allocation7 + $0x10] sm:$0xff]  ;;  %2820 = vmatprep.subr.msk.bf16.mxu1 %vm169_vm0, %v2813_v4  ;;  %v171_v16 = vsel %vm169_vm0, %v2812_v6, 0  ;;  %v2817_v21 = vcombine.high %v143_v13, %v143_v13  ;;  %v3270_v28 = vld [vmem:[#allocation10] ss:$12 sps:$4 sm:$0xff]   ;;  %v3275_v29 = vld [vmem:[#allocation10 + $0x1c] ss:$12 sps:$4 sm:$0xff]   ;;  %p3733_p1 = scmp.lt.s32.totalorder %s2801_s23, %s2801_s23 }
  0x82   :  { %v139_v15 = vld [vmem:[#allocation7 + $0x30] sm:$0xff]  ;;  %195 = vmatpush1.bf16.msra.mxu1 %v171_v16  ;;  %v177_v20 = vsel %vm169_vm0, %v2814_v12, 0  ;;  %v2816_v24 = vcombine.low %v143_v13, %v143_v13  ;;  %v2819_v27 = vcombine.high %v144_v25, %v144_v25  ;;  %v2818_v30 = vcombine.low %v144_v25, %v144_v25  ;;  %v134_v31 = vld [vmem:[#allocation7 + $0x8] sm:$0xff]  ;;  %v3273_v33 = vld [vmem:[#allocation10 + $0x18] ss:$12 sps:$4 sm:$0xff]   ;;  %s3728_s27 = scalar_lea.vmem %s2801_s23, 128 }
  0x83   :  { %402 = vmatprep.subr.bf16.mxu0 %v2829_v5  ;;  %v2833_v19 = vcombine.high %v135_v14, %v139_v15  ;;  %2822 = vmatprep.subr.msk.bf16.mxu1 %vm169_vm0, %v2815_v11  ;;  %v2832_v22 = vcombine.low %v135_v14, %v139_v15  ;;  %v3272_v23 = vld [vmem:[#allocation10 + $0x4] ss:$12 sps:$4 sm:$0xff]   ;;  %v138_v32 = vld [vmem:[#allocation7 + $0x28] sm:$0xff]  ;;  %v3278_v34 = vld [vmem:[#allocation10 + $0x34] ss:$12 sps:$4 sm:$0xff]   ;;  %p3729_p0 = scmp.ne.s32.totalorder %s2801_s23, %s3728_s27  ;;  %p3734_p2 = scmp.lt.s32.totalorder %s3728_s27, %s3728_s27 }
  0x84   :  { %403 = vmatpush1.bf16.msra.mxu0 %v2828_v7  ;;  %v183_v26 = vsel %vm169_vm0, %v2816_v24, 0  ;;  %v189_v35 = vsel %vm169_vm0, %v2818_v30, 0  ;;  %v2831_v36 = vcombine.high %v134_v31, %v138_v32  ;;  %v3276_v37 = vld [vmem:[#allocation10 + $0x30] ss:$12 sps:$4 sm:$0xff]   ;;  %v3281_v38 = vld [vmem:[#allocation10 + $0x4c] ss:$12 sps:$4 sm:$0xff]   ;;  %v2830_v43 = vcombine.low %v134_v31, %v138_v32 }
  0x85   :  { %484 = vmatprep.subr.bf16.mxu0 %v2833_v19  ;;  %2821 = vmatmul.mubr.msk.bf16.vlgmr.msra.gmra.mrb[0].mxu1 %vm165_vm1, %v132_v17  ;;  %v136_v39 = vld [vmem:[#allocation7 + $0x18] sm:$0xff]  ;;  %v3279_v40 = vld [vmem:[#allocation10 + $0x48] ss:$12 sps:$4 sm:$0xff]   ;;  %v3284_v42 = vld [vmem:[#allocation10 + $0x64] ss:$12 sps:$4 sm:$0xff]   ;;  %p3735_p3 = por %p3734_p2, %p3733_p1 }
  0x86   :  { %236 = vmatpush1.bf16.msra.mxu1 %v177_v20  ;;  %267 = vmatprep.mubr.bf16.mxu1 %v3773_v0  ;;  %v140_v41 = vld [vmem:[#allocation7 + $0x38] sm:$0xff]  ;;  %v3282_v45 = vld [vmem:[#allocation10 + $0x60] ss:$12 sps:$4 sm:$0xff]   ;;  %v3297_v50 = vld [vmem:[#allocation10 + $0xc8] ss:$12 sps:$4 sm:$0xff]  }
  0x87   :  { %2836 = vmatmul.mubr.msk.bf16.vlgmr.msra.gmra.mrb[0].mxu0 %vm398_vm2, %v3929_v18  ;;  %2824 = vmatprep.subr.msk.bf16.mxu1 %vm169_vm0, %v2817_v21  ;;  %v2835_v44 = vcombine.high %v136_v39, %v140_v41  ;;  %v3287_v46 = vld [vmem:[#allocation10 + $0x7c] ss:$12 sps:$4 sm:$0xff]   ;;  %v3285_v47 = vld [vmem:[#allocation10 + $0x78] ss:$12 sps:$4 sm:$0xff]   ;;  %v3290_v48 = vld [vmem:[#allocation10 + $0x94] ss:$12 sps:$4 sm:$0xff]   ;;  %v2834_v51 = vcombine.low %v136_v39, %v140_v41  ;;  %p3736_p4 = pnand %p3735_p3, %p3729_p0 }
  0x88   :  { %485 = vmatpush1.bf16.msra.mxu0 %v2832_v22  ;;  %516 = vmatprep.mubr.bf16.mxu0 %v3773_v0  ;;  %v3288_v49 = vld [vmem:[#allocation10 + $0x90] ss:$12 sps:$4 sm:$0xff]   ;;  %v3293_v52 = vld [vmem:[#allocation10 + $0xac] ss:$12 sps:$4 sm:$0xff]   ;;  %v3291_v53 = vld [vmem:[#allocation10 + $0xa8] ss:$12 sps:$4 sm:$0xff]  }
  0x89   :  { %1289 = vmatprep.subr.bf16.mxu0 %v3272_v23  ;;  %v3296_v54 = vld [vmem:[#allocation10 + $0xc4] ss:$12 sps:$4 sm:$0xff]   ;;  %v3298_v55 = vld [vmem:[#allocation10 + $0x8] ss:$12 sps:$4 sm:$0xff]   ;;  %v3294_v56 = vld [vmem:[#allocation10 + $0xc0] ss:$12 sps:$4 sm:$0xff]   ;;  %v568_v23 = vlaneseq }
  0x8a   :  { %v3302_v57 = vld [vmem:[#allocation10 + $0xe0] ss:$12 sps:$4 sm:$0xff]   ;;  %v3301_v58 = vld [vmem:[#allocation10 + $0xdc] ss:$12 sps:$4 sm:$0xff]   ;;  %v3299_v60 = vld [vmem:[#allocation10 + $0xd8] ss:$12 sps:$4 sm:$0xff]  }
  0x8b   :  { %v3303_v59 = vld [vmem:[#allocation10 + $0x20] ss:$12 sps:$4 sm:$0xff]   ;;  %v3307_v61 = vld [vmem:[#allocation10 + $0xf8] ss:$12 sps:$4 sm:$0xff]   ;;  %v3312_v1 = vld [vmem:[#allocation10 + $0x110] ss:$12 sps:$4 sm:$0xff]  }
  0x8c   :  { %v3306_v62 = vld [vmem:[#allocation10 + $0xf4] ss:$12 sps:$4 sm:$0xff]   ;;  %v3308_v63 = vld [vmem:[#allocation10 + $0x38] ss:$12 sps:$4 sm:$0xff]   ;;  %v3313_v3 = vld [vmem:[#allocation10 + $0x50] ss:$12 sps:$4 sm:$0xff]  }
  0x8d   :  { %2823 = vmatmul.mubr.msk.bf16.vlgmr.msra.gmra.mrb[4].mxu1 %vm165_vm1, %v132_v17  ;;  %v3311_v2 = vld [vmem:[#allocation10 + $0x10c] ss:$12 sps:$4 sm:$0xff]   ;;  %v3309_v4 = vld [vmem:[#allocation10 + $0x108] ss:$12 sps:$4 sm:$0xff]   ;;  %v3316_v6 = vld [vmem:[#allocation10 + $0x124] ss:$12 sps:$4 sm:$0xff]  }
  0x8e   :  { %277 = vmatpush1.bf16.msra.mxu1 %v183_v26  ;;  %308 = vmatprep.mubr.bf16.mxu1 %v3773_v0  ;;  %v3317_v5 = vld [vmem:[#allocation10 + $0x128] ss:$12 sps:$4 sm:$0xff]   ;;  %v3314_v8 = vld [vmem:[#allocation10 + $0x120] ss:$12 sps:$4 sm:$0xff]   ;;  %v3319_v12 = vld [vmem:[#allocation10 + $0x138] ss:$12 sps:$4 sm:$0xff]  }
  0x8f   :  { %2838 = vmatmul.mubr.msk.bf16.vlgmr.msra.gmra.mrb[4].mxu0 %vm398_vm2, %v3929_v18  ;;  %2826 = vmatprep.subr.msk.bf16.mxu1 %vm169_vm0, %v2819_v27  ;;  %v3318_v7 = vld [vmem:[#allocation10 + $0x68] ss:$12 sps:$4 sm:$0xff]   ;;  %v3322_v9 = vld [vmem:[#allocation10 + $0x140] ss:$12 sps:$4 sm:$0xff]   ;;  %v3327_v14 = vld [vmem:[#allocation10 + $0x158] ss:$12 sps:$4 sm:$0xff]  }
  0x90   :  { %1290 = vmatpush1.bf16.msra.mxu0 %v3270_v28  ;;  %v3321_v10 = vld [vmem:[#allocation10 + $0x13c] ss:$12 sps:$4 sm:$0xff]   ;;  %v3323_v11 = vld [vmem:[#allocation10 + $0x80] ss:$12 sps:$4 sm:$0xff]   ;;  %v3328_v16 = vld [vmem:[#allocation10 + $0x98] ss:$12 sps:$4 sm:$0xff]  }
  0x91   :  { %1291 = vmatprep.subr.bf16.mxu0 %v3275_v29  ;;  %v3326_v13 = vld [vmem:[#allocation10 + $0x154] ss:$12 sps:$4 sm:$0xff]   ;;  %v3324_v15 = vld [vmem:[#allocation10 + $0x150] ss:$12 sps:$4 sm:$0xff]   ;;  %v3955_v24 = vshrl.u32 %v568_v23, 7 }
  0x92   :  { %v3329_v19 = vld [vmem:[#allocation10 + $0x168] ss:$12 sps:$4 sm:$0xff]   ;;  %v3333_v20 = vld [vmem:[#allocation10 + $0xb0] ss:$12 sps:$4 sm:$0xff]  }
  0x93   :  { %v3336_v21 = vld [vmem:[#allocation10 + $0x184] ss:$12 sps:$4 sm:$0xff]   ;;  %v3337_v22 = vld [vmem:[#allocation10 + $0x248] ss:$12 sps:$4 sm:$0xff]   ;;  %v586_v25 = vsub.s32 4, %v3955_v24  ;;  %v594_v28 = vsub.s32 6, %v3955_v24 }
  0x94   :  { %1292 = vmatpush1.bf16.msra.mxu0 %v3273_v33  ;;  %v3961_v26 = vld [vmem:[%s4050_s4] sm:$0xff]  ;;  %v598_v29 = vsub.s32 7, %v3955_v24  ;;  %v3973_v32 = vsub.s32 0, %v3955_v24  ;;  %v3976_v33 = vsub.s32 1, %v3955_v24  ;;  %v3361_v23 = vld [vmem:[#allocation10 + $0x1fc] ss:$12 sps:$4 sm:$0xff]  }
  0x95   :  { %1293 = vmatprep.subr.bf16.mxu0 %v3278_v34  ;;  %2825 = vmatmul.mubr.msk.bf16.vlgmr.msra.gmra.mrb[8].mxu1 %vm165_vm1, %v132_v17  ;;  %v587_v27 = vrot.slane %v3961_v26, %v586_v25  ;;  %v3967_v30 = vrot.slane %v3961_v26, %v594_v28  ;;  %v3362_v25 = vld [vmem:[#allocation10 + $0x2c0] ss:$12 sps:$4 sm:$0xff]   ;;  %v590_v28 = vsub.s32 5, %v3955_v24 }
  0x96   :  { %318 = vmatpush1.bf16.msra.mxu1 %v189_v35  ;;  %349 = vmatprep.mubr.bf16.mxu1 %v3773_v0  ;;  %v3970_v31 = vrot.slane %v3961_v26, %v598_v29  ;;  %v571_v34 = vrot.slane %v3961_v26, %v3973_v32 }
  0x97   :  { %443 = vmatprep.subr.bf16.mxu1 %v2831_v36 }
  0x98   :  { %1294 = vmatpush1.bf16.msra.mxu0 %v3276_v37  ;;  %v575_v37 = vrot.slane %v3961_v26, %v3976_v33 }
  0x99   :  { %1295 = vmatprep.subr.bf16.mxu0 %v3281_v38 }
  0x9c   :  { %1296 = vmatpush1.bf16.msra.mxu0 %v3279_v40 }
  0x9d   :  { %1297 = vmatprep.subr.bf16.mxu0 %v3284_v42  ;;  %2827 = vmatmul.mubr.msk.bf16.vlgmr.msra.gmra.mrb[12].mxu1 %vm165_vm1, %v132_v17  ;;  %v3331_v17 = vld [vmem:[#allocation10 + $0x16c] ss:$12 sps:$4 sm:$0xff]  }
  0x9e   :  { %444 = vmatpush1.bf16.msra.mxu1 %v2830_v43  ;;  %475 = vmatprep.mubr.bf16.mxu1 %v3773_v0 }
  0x9f   :  { %525 = vmatprep.subr.bf16.mxu1 %v2835_v44 }
  0xa0   :  { %1298 = vmatpush1.bf16.msra.mxu0 %v3282_v45 }
  0xa1   :  { %1299 = vmatprep.subr.bf16.mxu0 %v3287_v46 }
  0xa4   :  { %1300 = vmatpush1.bf16.msra.mxu0 %v3285_v47 }
  0xa5   :  { %1301 = vmatprep.subr.bf16.mxu0 %v3290_v48  ;;  %2837 = vmatmul.mubr.msk.bf16.vlgmr.msra.gmra.mrb[16].mxu1 %vm398_vm2, %v3929_v18 }
  0xa6   :  { %526 = vmatpush1.bf16.msra.mxu1 %v2834_v51  ;;  %557 = vmatprep.mubr.bf16.mxu1 %v3773_v0  ;;  %v3304_v0 = vld [vmem:[#allocation10 + $0xf0] ss:$12 sps:$4 sm:$0xff]  }
  0xa7   :  { %3081 = vmatprep.subr.bf16.mxu1 %v3297_v50 }
  0xa8   :  { %1302 = vmatpush1.bf16.msra.mxu0 %v3288_v49 }
  0xa9   :  { %1303 = vmatprep.subr.bf16.mxu0 %v3293_v52  ;;  %v3334_v52 = vld [vmem:[#allocation10 + $0x180] ss:$12 sps:$4 sm:$0xff]  }
  0xac   :  { %1304 = vmatpush1.bf16.msra.mxu0 %v3291_v53  ;;  %v3338_v53 = vld [vmem:[#allocation10 + $0x188] ss:$12 sps:$4 sm:$0xff]  }
  0xad   :  { %1305 = vmatprep.subr.bf16.mxu0 %v3296_v54  ;;  %2839 = vmatmul.mubr.msk.bf16.vlgmr.msra.gmra.mrb[20].mxu1 %vm398_vm2, %v3929_v18  ;;  %v3332_v18 = vld [vmem:[#allocation10 + $0x170] ss:$12 sps:$4 sm:$0xff]  }
  0xae   :  { %3082 = vmatpush3.bf16.msra.mxu1 %v3298_v55 }
  0xaf   :  { %3083 = vmatprep.subr.bf16.mxu1 %v3302_v57  ;;  %v3341_v57 = vld [vmem:[#allocation10 + $0x19c] ss:$12 sps:$4 sm:$0xff]  }
  0xb0   :  { %1306 = vmatpush1.bf16.msra.mxu0 %v3294_v56 }
  0xb1   :  { %1307 = vmatprep.subr.bf16.mxu0 %v3301_v58  ;;  %v3342_v58 = vld [vmem:[#allocation10 + $0x260] ss:$12 sps:$4 sm:$0xff]  }
  0xb2   :  { %3084 = vmatpush3.bf16.msra.mxu1 %v3303_v59 }
  0xb3   :  { %3085 = vmatprep.subr.bf16.mxu1 %v3307_v61 }
  0xb4   :  { %1308 = vmatpush1.bf16.msra.mxu0 %v3299_v60 }
  0xb5   :  { %1309 = vmatprep.subr.bf16.mxu0 %v3306_v62 }
  0xb6   :  { %3086 = vmatpush3.bf16.msra.mxu1 %v3308_v63 }
  0xb7   :  { %3087 = vmatprep.subr.bf16.mxu1 %v3312_v1  ;;  %v3343_v1 = vld [vmem:[#allocation10 + $0x1a0] ss:$12 sps:$4 sm:$0xff]  }
  0xb8   :  { %1310 = vmatpush1.bf16.msra.mxu0 %v3304_v0  ;;  %v3339_v0 = vld [vmem:[#allocation10 + $0x198] ss:$12 sps:$4 sm:$0xff]  }
  0xb9   :  { %1311 = vmatprep.subr.bf16.mxu0 %v3311_v2  ;;  %v3346_v2 = vld [vmem:[#allocation10 + $0x1b4] ss:$12 sps:$4 sm:$0xff]  }
  0xba   :  { %3088 = vmatpush3.bf16.msra.mxu1 %v3313_v3  ;;  %v3347_v3 = vld [vmem:[#allocation10 + $0x278] ss:$12 sps:$4 sm:$0xff]  }
  0xbb   :  { %3089 = vmatprep.subr.bf16.mxu1 %v3317_v5  ;;  %v3344_v5 = vld [vmem:[#allocation10 + $0x1b0] ss:$12 sps:$4 sm:$0xff]  }
  0xbc   :  { %1312 = vmatpush1.bf16.msra.mxu0 %v3309_v4 }
  0xbd   :  { %1313 = vmatprep.subr.bf16.mxu0 %v3316_v6  ;;  %v3348_v6 = vld [vmem:[#allocation10 + $0x1b8] ss:$12 sps:$4 sm:$0xff]  }
  0xbe   :  { %3090 = vmatpush3.bf16.msra.mxu1 %v3318_v7 }
  0xbf   :  { %3091 = vmatprep.subr.bf16.mxu1 %v3322_v9  ;;  %v3351_v9 = vld [vmem:[#allocation10 + $0x1cc] ss:$12 sps:$4 sm:$0xff]  }
  0xc0   :  { %1314 = vmatpush1.bf16.msra.mxu0 %v3314_v8 }
  0xc1   :  { %1315 = vmatprep.subr.bf16.mxu0 %v3321_v10  ;;  %v3352_v10 = vld [vmem:[#allocation10 + $0x290] ss:$12 sps:$4 sm:$0xff]  }
  0xc2   :  { %3092 = vmatpush3.bf16.msra.mxu1 %v3323_v11 }
  0xc3   :  { %3093 = vmatprep.subr.bf16.mxu1 %v3327_v14 }
  0xc4   :  { %1316 = vmatpush1.bf16.msra.mxu0 %v3319_v12 }
  0xc5   :  { %1317 = vmatprep.subr.bf16.mxu0 %v3326_v13 }
  0xc6   :  { %3094 = vmatpush3.bf16.msra.mxu1 %v3328_v16  ;;  %v3353_v16 = vld [vmem:[#allocation10 + $0x1d0] ss:$12 sps:$4 sm:$0xff]  }
  0xc7   :  { %3095 = vmatprep.subr.bf16.mxu1 %v3332_v18  ;;  %v3357_v18 = vld [vmem:[#allocation10 + $0x2a8] ss:$12 sps:$4 sm:$0xff]  }
  0xc8   :  { %1318 = vmatpush1.bf16.msra.mxu0 %v3324_v15  ;;  %v3349_v15 = vld [vmem:[#allocation10 + $0x1c8] ss:$12 sps:$4 sm:$0xff]  }
  0xc9   :  { %1319 = vmatprep.subr.bf16.mxu0 %v3331_v17  ;;  %v3356_v17 = vld [vmem:[#allocation10 + $0x1e4] ss:$12 sps:$4 sm:$0xff]  }
  0xca   :  { %3096 = vmatpush3.bf16.msra.mxu1 %v3333_v20  ;;  %v3354_v20 = vld [vmem:[#allocation10 + $0x1e0] ss:$12 sps:$4 sm:$0xff]  }
  0xcb   :  { %3103 = vmatprep.subr.bf16.mxu1 %v3337_v22 }
  0xcc   :  { %1320 = vmatpush1.bf16.msra.mxu0 %v3329_v19 }
  0xcd   :  { %1330 = vmatprep.subr.bf16.mxu0 %v3336_v21  ;;  %v3358_v21 = vld [vmem:[#allocation10 + $0x1e8] ss:$12 sps:$4 sm:$0xff]  }
 0x158   :  { %v228_v35 = vpop.f32.mrb[0].mxu1 }
 0x159   :  { %v230_v39 = vpop.f32.mrb[1].mxu1 }
 0x15a   :  { %v436_v36 = vpop.f32.mrb[0].mxu0  ;;  %v232_v42 = vpop.f32.mrb[2].mxu1 }
 0x15b   :  { %v437_v38 = vadd.f32 %v436_v36, %v228_v35  ;;  %v438_v40 = vpop.f32.mrb[1].mxu0  ;;  %v233_v45 = vpop.f32.mrb[3].mxu1  ;;  %v3359_v35 = vld [vmem:[#allocation10 + $0x1f8] ss:$12 sps:$4 sm:$0xff]   ;;  %v3363_v36 = vld [vmem:[#allocation10 + $0x200] ss:$12 sps:$4 sm:$0xff]  }
 0x15c   :  { %v439_v41 = vadd.f32 %v438_v40, %v230_v39  ;;  %v440_v43 = vpop.f32.mrb[2].mxu0  ;;  %v3367_v39 = vld [vmem:[#allocation10 + $0x2d8] ss:$12 sps:$4 sm:$0xff]   ;;  %v591_v40 = vrot.slane %v3961_v26, %v590_v28  ;;  %v3409_v28 = vld [vmem:[#allocation11 + $0x7c] ss:$12 sps:$4 sm:$0xff]  }
 0x15d   :  { %v608_v44 = vadd.f32 %v571_v34, %v437_v38  ;;  %v441_v46 = vpop.f32.mrb[3].mxu0  ;;  %v3990_v34 = vsub.s32 2, %v3955_v24  ;;  %v3366_v38 = vld [vmem:[#allocation10 + $0x214] ss:$12 sps:$4 sm:$0xff]   ;;  %v3368_v45 = vld [vmem:[#allocation10 + $0x218] ss:$12 sps:$4 sm:$0xff]  }
 0x15e   :  { %v609_v47 = vadd.f32 %v575_v37, %v439_v41  ;;  %v582_v37 = vsub.s32 3, %v3955_v24  ;;  %v3371_v24 = vld [vmem:[#allocation10 + $0x22c] ss:$12 sps:$4 sm:$0xff]  }
 0x15f   :  { %v616_v48 = vmax.f32 %v608_v44, 0.0  ;;  %v579_v41 = vrot.slane %v3961_v26, %v3990_v34  ;;  %v3364_v44 = vld [vmem:[#allocation10 + $0x210] ss:$12 sps:$4 sm:$0xff]  }
 0x160   :  { %v617_v49 = vmax.f32 %v609_v47, 0.0  ;;  %v3982_v51 = vpop.f32.mrb[4].mxu1  ;;  %v583_v43 = vrot.slane %v3961_v26, %v582_v37  ;;  %v3373_v26 = vld [vmem:[#allocation10 + $0x230] ss:$12 sps:$4 sm:$0xff]   ;;  %v3415_v37 = vld [vmem:[#allocation11 + $0x94] ss:$12 sps:$4 sm:$0xff]  }
 0x161   :  { %v624_v55 = vpack.c.bf16 %v616_v48, %v616_v48  ;;  %v3984_v56 = vpop.f32.mrb[5].mxu1  ;;  %v3372_v48 = vld [vmem:[#allocation10 + $0x2f0] ss:$12 sps:$4 sm:$0xff]  }
 0x162   :  { %v625_v50 = vpack.c.bf16 %v617_v49, %v617_v49  ;;  %v518_v54 = vpop.f32.mrb[4].mxu0  ;;  %v273_v60 = vpop.f32.mrb[6].mxu1 }
 0x163   :  { %v520_v59 = vpop.f32.mrb[5].mxu0  ;;  %v274_v62 = vpop.f32.mrb[7].mxu1 }
 0x164   :  { %1321 = vmatprep.mubr.bf16.mxu0 %v625_v50  ;;  %1403 = vmatprep.mubr.bf16.mxu1 %v625_v50  ;;  %v522_v61 = vpop.f32.mrb[6].mxu0 }
 0x165   :  { %1322 = vmatmul.mubr.bf16.vlgmr.msra.gmra.mrb[8].mxu0 %v624_v55  ;;  %1404 = vmatmul.mubr.bf16.vlgmr.msra.gmra.mrb[24].mxu1 %v624_v55  ;;  %v523_v63 = vpop.f32.mrb[7].mxu0 }
 0x166   :  { %1331 = vmatpush1.bf16.msra.mxu0 %v3334_v52  ;;  %3104 = vmatpush3.bf16.msra.mxu1 %v3338_v53  ;;  %v3374_v63 = vld [vmem:[#allocation10 + $0x240] ss:$12 sps:$4 sm:$0xff]  }
 0x167   :  { %1332 = vmatprep.subr.bf16.mxu0 %v3341_v57  ;;  %3105 = vmatprep.subr.bf16.mxu1 %v3342_v58  ;;  %v3369_v57 = vld [vmem:[#allocation10 + $0x228] ss:$12 sps:$4 sm:$0xff]  }
 0x168   :  { %v310_v4 = vpop.f32.mrb[8].mxu1 }
 0x169   :  { %v519_v7 = vadd.f32 %v518_v54, %v310_v4  ;;  %v312_v8 = vpop.f32.mrb[9].mxu1  ;;  %v3382_v4 = vld [vmem:[#allocation10 + $0x25c] ss:$12 sps:$4 sm:$0xff]  }
 0x16a   :  { %1333 = vmatpush1.bf16.msra.mxu0 %v3339_v0  ;;  %3106 = vmatpush3.bf16.msra.mxu1 %v3343_v1  ;;  %v521_v11 = vadd.f32 %v520_v59, %v312_v8  ;;  %v314_v12 = vpop.f32.mrb[10].mxu1  ;;  %v3379_v59 = vld [vmem:[#allocation11 + $0x4] ss:$12 sps:$4 sm:$0xff]   ;;  %v3377_v0 = vld [vmem:[#allocation11] ss:$12 sps:$4 sm:$0xff]  }
 0x16b   :  { %1334 = vmatprep.subr.bf16.mxu0 %v3346_v2  ;;  %3107 = vmatprep.subr.bf16.mxu1 %v3347_v3  ;;  %v3986_v13 = vadd.f32 %v587_v27, %v519_v7  ;;  %v315_v14 = vpop.f32.mrb[11].mxu1  ;;  %v3380_v12 = vld [vmem:[#allocation10 + $0x258] ss:$12 sps:$4 sm:$0xff]  }
 0x16c   :  { %v613_v52 = vadd.f32 %v591_v40, %v521_v11  ;;  %v3383_v14 = vld [vmem:[#allocation11 + $0x18] ss:$12 sps:$4 sm:$0xff]  }
 0x16d   :  { %v3418_v40 = vld [vmem:[#allocation10 + $0x2ec] ss:$12 sps:$4 sm:$0xff]  }
 0x16e   :  { %1335 = vmatpush1.bf16.msra.mxu0 %v3344_v5  ;;  %3108 = vmatpush3.bf16.msra.mxu1 %v3348_v6  ;;  %v621_v61 = vmax.f32 %v613_v52, 0.0  ;;  %v3385_v6 = vld [vmem:[#allocation11 + $0x1c] ss:$12 sps:$4 sm:$0xff]   ;;  %v3434_v52 = vld [vmem:[#allocation11 + $0xf4] ss:$12 sps:$4 sm:$0xff]  }
 0x16f   :  { %1336 = vmatprep.subr.bf16.mxu0 %v3351_v9  ;;  %3109 = vmatprep.subr.bf16.mxu1 %v3352_v10 }
 0x170   :  { %v351_v19 = vpop.f32.mrb[12].mxu1  ;;  %v4001_v8 = vpack.c.bf16 %v621_v61, %v621_v61  ;;  %v3442_v61 = vld [vmem:[#allocation11 + $0x120] ss:$12 sps:$4 sm:$0xff]  }
 0x171   :  { %v353_v22 = vpop.f32.mrb[13].mxu1 }
 0x172   :  { %1337 = vmatpush1.bf16.msra.mxu0 %v3349_v15  ;;  %3110 = vmatpush3.bf16.msra.mxu1 %v3353_v16  ;;  %v355_v27 = vpop.f32.mrb[14].mxu1  ;;  %v3388_v15 = vld [vmem:[#allocation10 + $0x274] ss:$12 sps:$4 sm:$0xff]  }
 0x173   :  { %1338 = vmatprep.subr.bf16.mxu0 %v3356_v17  ;;  %3111 = vmatprep.subr.bf16.mxu1 %v3357_v18  ;;  %v356_v29 = vpop.f32.mrb[15].mxu1  ;;  %v3391_v16 = vld [vmem:[#allocation11 + $0x34] ss:$12 sps:$4 sm:$0xff]   ;;  %v3389_v17 = vld [vmem:[#allocation11 + $0x30] ss:$12 sps:$4 sm:$0xff]  }
 0x174   :  { %v3394_v18 = vld [vmem:[#allocation10 + $0x28c] ss:$12 sps:$4 sm:$0xff]   ;;  %v3406_v27 = vld [vmem:[#allocation10 + $0x2bc] ss:$12 sps:$4 sm:$0xff]  }
 0x175   :  { %v3404_v29 = vld [vmem:[#allocation10 + $0x2b8] ss:$12 sps:$4 sm:$0xff]  }
 0x176   :  { %1339 = vmatpush1.bf16.msra.mxu0 %v3354_v20  ;;  %3112 = vmatpush3.bf16.msra.mxu1 %v3358_v21  ;;  %v3395_v20 = vld [vmem:[#allocation11 + $0x48] ss:$12 sps:$4 sm:$0xff]   ;;  %v3400_v21 = vld [vmem:[#allocation10 + $0x2a4] ss:$12 sps:$4 sm:$0xff]  }
 0x177   :  { %1340 = vmatprep.subr.bf16.mxu0 %v3361_v23  ;;  %3113 = vmatprep.subr.bf16.mxu1 %v3362_v25  ;;  %v3398_v23 = vld [vmem:[#allocation10 + $0x2a0] ss:$12 sps:$4 sm:$0xff]  }
 0x178   :  { %v477_v42 = vpop.f32.mrb[16].mxu1  ;;  %v3401_v25 = vld [vmem:[#allocation11 + $0x60] ss:$12 sps:$4 sm:$0xff]  }
 0x179   :  { %v478_v46 = vadd.f32 %v477_v42, %v3982_v51  ;;  %v479_v47 = vpop.f32.mrb[17].mxu1  ;;  %v3376_v51 = vld [vmem:[#allocation10 + $0x244] ss:$12 sps:$4 sm:$0xff]   ;;  %v3416_v42 = vld [vmem:[#allocation10 + $0x2e8] ss:$12 sps:$4 sm:$0xff]  }
 0x17a   :  { %1341 = vmatpush1.bf16.msra.mxu0 %v3359_v35  ;;  %3114 = vmatpush3.bf16.msra.mxu1 %v3363_v36  ;;  %v480_v49 = vadd.f32 %v479_v47, %v3984_v56  ;;  %v481_v50 = vpop.f32.mrb[18].mxu1  ;;  %v3407_v35 = vld [vmem:[#allocation11 + $0x78] ss:$12 sps:$4 sm:$0xff]   ;;  %v3412_v36 = vld [vmem:[#allocation10 + $0x2d4] ss:$12 sps:$4 sm:$0xff]  }
 0x17b   :  { %1342 = vmatprep.subr.bf16.mxu0 %v3366_v38  ;;  %3115 = vmatprep.subr.bf16.mxu1 %v3367_v39  ;;  %v610_v53 = vadd.f32 %v579_v41, %v478_v46  ;;  %v482_v54 = vpop.f32.mrb[19].mxu1  ;;  %v3410_v38 = vld [vmem:[#allocation10 + $0x2d0] ss:$12 sps:$4 sm:$0xff]   ;;  %v3421_v41 = vld [vmem:[#allocation11 + $0xac] ss:$12 sps:$4 sm:$0xff]  }
 0x17c   :  { %v611_v55 = vadd.f32 %v583_v43, %v480_v49  ;;  %v3413_v39 = vld [vmem:[#allocation11 + $0x90] ss:$12 sps:$4 sm:$0xff]   ;;  %v3419_v43 = vld [vmem:[#allocation11 + $0xa8] ss:$12 sps:$4 sm:$0xff]   ;;  %v3422_v46 = vld [vmem:[#allocation11 + $0xc0] ss:$12 sps:$4 sm:$0xff]  }
 0x17d   :  { %v618_v58 = vmax.f32 %v610_v53, 0.0  ;;  %v3426_v47 = vld [vmem:[#allocation11 + $0x8] ss:$12 sps:$4 sm:$0xff]   ;;  %v3427_v49 = vld [vmem:[#allocation11 + $0xd8] ss:$12 sps:$4 sm:$0xff]  }
 0x17e   :  { %1343 = vmatpush1.bf16.msra.mxu0 %v3364_v44  ;;  %3116 = vmatpush3.bf16.msra.mxu1 %v3368_v45  ;;  %v619_v60 = vmax.f32 %v611_v55, 0.0  ;;  %v3424_v44 = vld [vmem:[#allocation11 + $0xc4] ss:$12 sps:$4 sm:$0xff]   ;;  %v3425_v45 = vld [vmem:[#allocation11 + $0xc8] ss:$12 sps:$4 sm:$0xff]  }
 0x17f   :  { %1344 = vmatprep.subr.bf16.mxu0 %v3371_v24  ;;  %3117 = vmatprep.subr.bf16.mxu1 %v3372_v48  ;;  %v3999_v1 = vpack.c.bf16 %v618_v58, %v618_v58  ;;  %v3429_v24 = vld [vmem:[#allocation11 + $0xdc] ss:$12 sps:$4 sm:$0xff]   ;;  %v3430_v48 = vld [vmem:[#allocation11 + $0xe0] ss:$12 sps:$4 sm:$0xff]   ;;  %v3435_v53 = vld [vmem:[#allocation11 + $0xf8] ss:$12 sps:$4 sm:$0xff]  }
 0x180   :  { %v627_v62 = vpack.c.bf16 %v619_v60, %v619_v60  ;;  %v559_v56 = vpop.f32.mrb[20].mxu1  ;;  %v3431_v50 = vld [vmem:[#allocation11 + $0x20] ss:$12 sps:$4 sm:$0xff]   ;;  %v3432_v54 = vld [vmem:[#allocation11 + $0xf0] ss:$12 sps:$4 sm:$0xff]  }
 0x181   :  { %v560_v2 = vadd.f32 %v559_v56, %v351_v19  ;;  %v561_v3 = vpop.f32.mrb[21].mxu1  ;;  %v3397_v19 = vld [vmem:[#allocation11 + $0x4c] ss:$12 sps:$4 sm:$0xff]   ;;  %v3437_v58 = vld [vmem:[#allocation11 + $0x108] ss:$12 sps:$4 sm:$0xff]  }
 0x182   :  { %1345 = vmatpush1.bf16.msra.mxu0 %v3369_v57  ;;  %3118 = vmatpush3.bf16.msra.mxu1 %v3373_v26  ;;  %v562_v5 = vadd.f32 %v561_v3, %v353_v22  ;;  %v563_v7 = vpop.f32.mrb[22].mxu1  ;;  %v3403_v22 = vld [vmem:[#allocation11 + $0x64] ss:$12 sps:$4 sm:$0xff]   ;;  %v3439_v57 = vld [vmem:[#allocation11 + $0x10c] ss:$12 sps:$4 sm:$0xff]  }
 0x183   :  { %1346 = vmatprep.subr.bf16.mxu0 %v3376_v51  ;;  %2114 = vmatprep.subr.bf16.mxu1 %v3379_v59  ;;  %v4004_v9 = vadd.f32 %v3967_v30, %v560_v2  ;;  %v564_v10 = vpop.f32.mrb[23].mxu1  ;;  %v3386_v30 = vld [vmem:[#allocation10 + $0x270] ss:$12 sps:$4 sm:$0xff]   ;;  %v3436_v55 = vld [vmem:[#allocation11 + $0x38] ss:$12 sps:$4 sm:$0xff]  }
 0x184   :  { %1362 = vmatprep.mubr.bf16.mxu0 %v627_v62  ;;  %1443 = vmatprep.mubr.bf16.mxu1 %v627_v62  ;;  %v4008_v11 = vadd.f32 %v3970_v31, %v562_v5  ;;  %v3392_v31 = vld [vmem:[#allocation10 + $0x288] ss:$12 sps:$4 sm:$0xff]   ;;  %v3440_v26 = vld [vmem:[#allocation11 + $0x110] ss:$12 sps:$4 sm:$0xff]   ;;  %v3455_v3 = vld [vmem:[#allocation11 + $0x158] ss:$12 sps:$4 sm:$0xff]  }
 0x185   :  { %1444 = vmatmul.mubr.bf16.vlgmr.msra.gmra.mrb[28].mxu1 %v3999_v1  ;;  %v3441_v51 = vld [vmem:[#allocation11 + $0x50] ss:$12 sps:$4 sm:$0xff]   ;;  %v3445_v60 = vld [vmem:[#allocation11 + $0x128] ss:$12 sps:$4 sm:$0xff]   ;;  %v3456_v5 = vld [vmem:[#allocation11 + $0x98] ss:$12 sps:$4 sm:$0xff]  }
 0x186   :  { %1347 = vmatpush1.bf16.msra.mxu0 %v3374_v63  ;;  %2115 = vmatpush1.bf16.msra.mxu1 %v3377_v0  ;;  %v3444_v59 = vld [vmem:[#allocation11 + $0x124] ss:$12 sps:$4 sm:$0xff]   ;;  %v3446_v62 = vld [vmem:[#allocation11 + $0x68] ss:$12 sps:$4 sm:$0xff]   ;;  %v3450_v63 = vld [vmem:[#allocation11 + $0x140] ss:$12 sps:$4 sm:$0xff]  }
 0x187   :  { %2146 = vmatprep.mubr.bf16.mxu1 %v4001_v8  ;;  %1348 = vmatprep.subr.bf16.mxu0 %v3382_v4  ;;  %v3449_v56 = vld [vmem:[#allocation11 + $0x13c] ss:$12 sps:$4 sm:$0xff]   ;;  %v3447_v0 = vld [vmem:[#allocation11 + $0x138] ss:$12 sps:$4 sm:$0xff]   ;;  %v3454_v2 = vld [vmem:[#allocation11 + $0x154] ss:$12 sps:$4 sm:$0xff]  }
 0x188   :  { %2116 = vmatprep.subr.bf16.mxu1 %v3385_v6  ;;  %v3452_v4 = vld [vmem:[#allocation11 + $0x150] ss:$12 sps:$4 sm:$0xff]   ;;  %v3459_v6 = vld [vmem:[#allocation11 + $0x16c] ss:$12 sps:$4 sm:$0xff]  }
 0x189   :  { %v3460_v7 = vld [vmem:[#allocation11 + $0x170] ss:$12 sps:$4 sm:$0xff]  }
 0x18a   :  { %1349 = vmatpush1.bf16.msra.mxu0 %v3380_v12  ;;  %2117 = vmatpush1.bf16.msra.mxu1 %v3383_v14  ;;  %v3461_v10 = vld [vmem:[#allocation11 + $0xb0] ss:$12 sps:$4 sm:$0xff]   ;;  %v620_v12 = vmax.f32 %v3986_v13, 0.0  ;;  %v3467_v13 = vld [vmem:[#allocation11 + $0x198] ss:$12 sps:$4 sm:$0xff]  }
 0x18b   :  { %1350 = vmatprep.subr.bf16.mxu0 %v3388_v15  ;;  %2118 = vmatprep.subr.bf16.mxu1 %v3391_v16  ;;  %v3464_v14 = vld [vmem:[#allocation11 + $0x184] ss:$12 sps:$4 sm:$0xff]   ;;  %v3465_v15 = vld [vmem:[#allocation11 + $0x248] ss:$12 sps:$4 sm:$0xff]   ;;  %v623_v16 = vmax.f32 %v4008_v11, 0.0 }
 0x18c   :  { %v3475_v11 = vld [vmem:[#allocation11 + $0x278] ss:$12 sps:$4 sm:$0xff]  }
 0x18e   :  { %1351 = vmatpush1.bf16.msra.mxu0 %v3386_v30  ;;  %2119 = vmatpush1.bf16.msra.mxu1 %v3389_v17  ;;  %v3462_v30 = vld [vmem:[#allocation11 + $0x180] ss:$12 sps:$4 sm:$0xff]   ;;  %v628_v17 = vpack.c.bf16 %v620_v12, %v620_v12 }
 0x18f   :  { %1352 = vmatprep.subr.bf16.mxu0 %v3394_v18  ;;  %2120 = vmatprep.subr.bf16.mxu1 %v3397_v19  ;;  %v3466_v18 = vld [vmem:[#allocation11 + $0x188] ss:$12 sps:$4 sm:$0xff]   ;;  %v631_v19 = vpack.c.bf16 %v623_v16, %v623_v16  ;;  %v3520_v16 = vld [vmem:[#allocation11 + $0x2d0] ss:$12 sps:$4 sm:$0xff]  }
 0x190   :  { %v3522_v12 = vld [vmem:[#allocation11 + $0x2d4] ss:$12 sps:$4 sm:$0xff]  }
 0x192   :  { %1353 = vmatpush1.bf16.msra.mxu0 %v3392_v31  ;;  %2121 = vmatpush1.bf16.msra.mxu1 %v3395_v20  ;;  %v3469_v31 = vld [vmem:[#allocation11 + $0x19c] ss:$12 sps:$4 sm:$0xff]   ;;  %v3470_v20 = vld [vmem:[#allocation11 + $0x260] ss:$12 sps:$4 sm:$0xff]  }
 0x193   :  { %1354 = vmatprep.subr.bf16.mxu0 %v3400_v21  ;;  %2122 = vmatprep.subr.bf16.mxu1 %v3403_v22  ;;  %v3471_v21 = vld [vmem:[#allocation11 + $0x1a0] ss:$12 sps:$4 sm:$0xff]  }
 0x194   :  { %v3474_v22 = vld [vmem:[#allocation11 + $0x1b4] ss:$12 sps:$4 sm:$0xff]  }
 0x196   :  { %1355 = vmatpush1.bf16.msra.mxu0 %v3398_v23  ;;  %2123 = vmatpush1.bf16.msra.mxu1 %v3401_v25  ;;  %v3472_v23 = vld [vmem:[#allocation11 + $0x1b0] ss:$12 sps:$4 sm:$0xff]   ;;  %v3476_v25 = vld [vmem:[#allocation11 + $0x1b8] ss:$12 sps:$4 sm:$0xff]  }
 0x197   :  { %1356 = vmatprep.subr.bf16.mxu0 %v3406_v27  ;;  %2124 = vmatprep.subr.bf16.mxu1 %v3409_v28  ;;  %v3479_v27 = vld [vmem:[#allocation11 + $0x1cc] ss:$12 sps:$4 sm:$0xff]   ;;  %v3480_v28 = vld [vmem:[#allocation11 + $0x290] ss:$12 sps:$4 sm:$0xff]  }
 0x19a   :  { %1357 = vmatpush1.bf16.msra.mxu0 %v3404_v29  ;;  %2125 = vmatpush1.bf16.msra.mxu1 %v3407_v35  ;;  %v3477_v29 = vld [vmem:[#allocation11 + $0x1c8] ss:$12 sps:$4 sm:$0xff]   ;;  %v3481_v35 = vld [vmem:[#allocation11 + $0x1d0] ss:$12 sps:$4 sm:$0xff]  }
 0x19b   :  { %1358 = vmatprep.subr.bf16.mxu0 %v3412_v36  ;;  %2126 = vmatprep.subr.bf16.mxu1 %v3415_v37  ;;  %v3484_v36 = vld [vmem:[#allocation11 + $0x1e4] ss:$12 sps:$4 sm:$0xff]   ;;  %v3485_v37 = vld [vmem:[#allocation11 + $0x2a8] ss:$12 sps:$4 sm:$0xff]  }
 0x19e   :  { %1359 = vmatpush1.bf16.msra.mxu0 %v3410_v38  ;;  %2127 = vmatpush1.bf16.msra.mxu1 %v3413_v39  ;;  %v3482_v38 = vld [vmem:[#allocation11 + $0x1e0] ss:$12 sps:$4 sm:$0xff]   ;;  %v3486_v39 = vld [vmem:[#allocation11 + $0x1e8] ss:$12 sps:$4 sm:$0xff]  }
 0x19f   :  { %1360 = vmatprep.subr.bf16.mxu0 %v3418_v40  ;;  %2128 = vmatprep.subr.bf16.mxu1 %v3421_v41  ;;  %v3489_v40 = vld [vmem:[#allocation11 + $0x1fc] ss:$12 sps:$4 sm:$0xff]   ;;  %v3490_v41 = vld [vmem:[#allocation11 + $0x2c0] ss:$12 sps:$4 sm:$0xff]  }
 0x1a2   :  { %1361 = vmatpush1.bf16.msra.mxu0 %v3416_v42  ;;  %2129 = vmatpush1.bf16.msra.mxu1 %v3419_v43  ;;  %v3487_v42 = vld [vmem:[#allocation11 + $0x1f8] ss:$12 sps:$4 sm:$0xff]   ;;  %v3491_v43 = vld [vmem:[#allocation11 + $0x200] ss:$12 sps:$4 sm:$0xff]  }
 0x1a3   :  { %2130 = vmatprep.subr.bf16.mxu1 %v3424_v44  ;;  %3125 = vmatprep.subr.bf16.mxu0 %v3425_v45  ;;  %v3494_v44 = vld [vmem:[#allocation11 + $0x214] ss:$12 sps:$4 sm:$0xff]   ;;  %v3495_v45 = vld [vmem:[#allocation11 + $0x2d8] ss:$12 sps:$4 sm:$0xff]  }
 0x1a5   :  { %1363 = vmatmul.mubr.bf16.vlgmr.msra.gmra.mrb[8].mxu0 %v3999_v1  ;;  %v3451_v1 = vld [vmem:[#allocation11 + $0x80] ss:$12 sps:$4 sm:$0xff]  }
 0x1a6   :  { %2131 = vmatpush1.bf16.msra.mxu1 %v3422_v46  ;;  %3126 = vmatpush3.bf16.msra.mxu0 %v3426_v47  ;;  %v3492_v46 = vld [vmem:[#allocation11 + $0x210] ss:$12 sps:$4 sm:$0xff]   ;;  %v3496_v47 = vld [vmem:[#allocation11 + $0x218] ss:$12 sps:$4 sm:$0xff]  }
 0x1a7   :  { %2228 = vmatprep.mubr.bf16.mxu0 %v4001_v8  ;;  %2132 = vmatprep.subr.bf16.mxu1 %v3429_v24  ;;  %v3457_v8 = vld [vmem:[#allocation11 + $0x168] ss:$12 sps:$4 sm:$0xff]   ;;  %v3499_v24 = vld [vmem:[#allocation11 + $0x22c] ss:$12 sps:$4 sm:$0xff]  }
 0x1a8   :  { %3127 = vmatprep.subr.bf16.mxu0 %v3430_v48  ;;  %v3500_v48 = vld [vmem:[#allocation11 + $0x2f0] ss:$12 sps:$4 sm:$0xff]  }
 0x1aa   :  { %2133 = vmatpush1.bf16.msra.mxu1 %v3427_v49  ;;  %3128 = vmatpush3.bf16.msra.mxu0 %v3431_v50  ;;  %v3497_v49 = vld [vmem:[#allocation11 + $0x228] ss:$12 sps:$4 sm:$0xff]   ;;  %v3501_v50 = vld [vmem:[#allocation11 + $0x230] ss:$12 sps:$4 sm:$0xff]  }
 0x1ab   :  { %2134 = vmatprep.subr.bf16.mxu1 %v3434_v52  ;;  %3129 = vmatprep.subr.bf16.mxu0 %v3435_v53  ;;  %v3504_v52 = vld [vmem:[#allocation11 + $0x244] ss:$12 sps:$4 sm:$0xff]   ;;  %v622_v53 = vmax.f32 %v4004_v9, 0.0 }
 0x1ac   :  { %v3530_v9 = vld [vmem:[#allocation13 + $0x50] sm:$0xff]  }
 0x1ae   :  { %2135 = vmatpush1.bf16.msra.mxu1 %v3432_v54  ;;  %3130 = vmatpush3.bf16.msra.mxu0 %v3436_v55  ;;  %v3526_v54 = vld [vmem:[#allocation13 + $0x40] sm:$0xff]  }
 0x1af   :  { %2136 = vmatprep.subr.bf16.mxu1 %v3439_v57  ;;  %3131 = vmatprep.subr.bf16.mxu0 %v3440_v26  ;;  %v3502_v55 = vld [vmem:[#allocation11 + $0x240] ss:$12 sps:$4 sm:$0xff]   ;;  %v3507_v57 = vld [vmem:[#allocation11 + $0x25c] ss:$12 sps:$4 sm:$0xff]  }
 0x1b0   :  { %v3527_v26 = vld [vmem:[#allocation13] sm:$0xff]  }
 0x1b2   :  { %2137 = vmatpush1.bf16.msra.mxu1 %v3437_v58  ;;  %3132 = vmatpush3.bf16.msra.mxu0 %v3441_v51  ;;  %v630_v58 = vpack.c.bf16 %v622_v53, %v622_v53  ;;  %v3528_v51 = vld [vmem:[#allocation13 + $0x48] sm:$0xff]   ;;  %v3570_v53 = vld [vmem:[#allocation13 + $0xf8] sm:$0xff]  }
 0x1b3   :  { %2138 = vmatprep.subr.bf16.mxu1 %v3444_v59  ;;  %3133 = vmatprep.subr.bf16.mxu0 %v3445_v60  ;;  %v3505_v59 = vld [vmem:[#allocation11 + $0x258] ss:$12 sps:$4 sm:$0xff]   ;;  %v3510_v60 = vld [vmem:[#allocation11 + $0x274] ss:$12 sps:$4 sm:$0xff]  }
 0x1b6   :  { %2139 = vmatpush1.bf16.msra.mxu1 %v3442_v61  ;;  %3134 = vmatpush3.bf16.msra.mxu0 %v3446_v62  ;;  %v3529_v61 = vld [vmem:[#allocation13 + $0x8] sm:$0xff]   ;;  %v3508_v62 = vld [vmem:[#allocation11 + $0x270] ss:$12 sps:$4 sm:$0xff]  }
 0x1b7   :  { %2140 = vmatprep.subr.bf16.mxu1 %v3449_v56  ;;  %3135 = vmatprep.subr.bf16.mxu0 %v3450_v63  ;;  %v3513_v56 = vld [vmem:[#allocation11 + $0x28c] ss:$12 sps:$4 sm:$0xff]   ;;  %v3531_v63 = vld [vmem:[#allocation13 + $0x10] sm:$0xff]  }
 0x1ba   :  { %2141 = vmatpush1.bf16.msra.mxu1 %v3447_v0  ;;  %3136 = vmatpush3.bf16.msra.mxu0 %v3451_v1  ;;  %v3532_v0 = vld [vmem:[#allocation13 + $0x58] sm:$0xff]   ;;  %v3511_v1 = vld [vmem:[#allocation11 + $0x288] ss:$12 sps:$4 sm:$0xff]  }
 0x1bb   :  { %2142 = vmatprep.subr.bf16.mxu1 %v3454_v2  ;;  %3137 = vmatprep.subr.bf16.mxu0 %v3455_v3  ;;  %v3516_v2 = vld [vmem:[#allocation11 + $0x2a4] ss:$12 sps:$4 sm:$0xff]   ;;  %v3533_v3 = vld [vmem:[#allocation13 + $0x18] sm:$0xff]  }
 0x1be   :  { %2143 = vmatpush1.bf16.msra.mxu1 %v3452_v4  ;;  %3138 = vmatpush3.bf16.msra.mxu0 %v3456_v5  ;;  %v3534_v4 = vld [vmem:[#allocation13 + $0x60] sm:$0xff]  }
 0x1bf   :  { %2144 = vmatprep.subr.bf16.mxu1 %v3459_v6  ;;  %3139 = vmatprep.subr.bf16.mxu0 %v3460_v7  ;;  %v3514_v5 = vld [vmem:[#allocation11 + $0x2a0] ss:$12 sps:$4 sm:$0xff]   ;;  %v3519_v6 = vld [vmem:[#allocation11 + $0x2bc] ss:$12 sps:$4 sm:$0xff]  }
 0x1c0   :  { %v3535_v7 = vld [vmem:[#allocation13 + $0x20] sm:$0xff]  }
 0x1c2   :  { %2145 = vmatpush1.bf16.msra.mxu1 %v3457_v8  ;;  %3140 = vmatpush3.bf16.msra.mxu0 %v3461_v10  ;;  %v3536_v8 = vld [vmem:[#allocation13 + $0x68] sm:$0xff]   ;;  %v3517_v10 = vld [vmem:[#allocation11 + $0x2b8] ss:$12 sps:$4 sm:$0xff]  }
 0x1c3   :  { %2155 = vmatprep.subr.bf16.mxu1 %v3464_v14  ;;  %3147 = vmatprep.subr.bf16.mxu0 %v3465_v15  ;;  %v3537_v14 = vld [vmem:[#allocation13 + $0x28] sm:$0xff]   ;;  %v3538_v15 = vld [vmem:[#allocation13 + $0x70] sm:$0xff]  }
 0x1c5   :  { %2147 = vmatmul.mubr.bf16.vlgmr.msra.gmra.mrb[32].mxu1 %v628_v17  ;;  %2229 = vmatmul.mubr.bf16.vlgmr.msra.gmra.mrb[12].mxu0 %v628_v17  ;;  %v3539_v17 = vld [vmem:[#allocation13 + $0x30] sm:$0xff]  }
 0x1c6   :  { %2156 = vmatpush1.bf16.msra.mxu1 %v3462_v30  ;;  %2187 = vmatprep.mubr.bf16.mxu1 %v631_v19  ;;  %v3525_v30 = vld [vmem:[#allocation11 + $0x2ec] ss:$12 sps:$4 sm:$0xff]  }
 0x1c7   :  { %3148 = vmatpush3.bf16.msra.mxu0 %v3466_v18  ;;  %2268 = vmatprep.mubr.bf16.mxu0 %v631_v19  ;;  %v3540_v18 = vld [vmem:[#allocation13 + $0x78] sm:$0xff]   ;;  %v3523_v19 = vld [vmem:[#allocation11 + $0x2e8] ss:$12 sps:$4 sm:$0xff]  }
 0x1c8   :  { %2157 = vmatprep.subr.bf16.mxu1 %v3469_v31  ;;  %3149 = vmatprep.subr.bf16.mxu0 %v3470_v20  ;;  %v3541_v31 = vld [vmem:[#allocation13 + $0x38] sm:$0xff]   ;;  %v760_v20 = vld [vmem:[%s4052_s6] sm:$0x7] }
 0x1ca   :  { %2158 = vmatpush1.bf16.msra.mxu1 %v3467_v13 }
 0x1cb   :  { %3150 = vmatpush3.bf16.msra.mxu0 %v3471_v21  ;;  %2159 = vmatprep.subr.bf16.mxu1 %v3474_v22  ;;  %v773_v21 = vrot.slane %v760_v20, %v3990_v34 }
 0x1cc   :  { %3151 = vmatprep.subr.bf16.mxu0 %v3475_v11 }
 0x1ce   :  { %2160 = vmatpush1.bf16.msra.mxu1 %v3472_v23 }
 0x1cf   :  { %3152 = vmatpush3.bf16.msra.mxu0 %v3476_v25  ;;  %2161 = vmatprep.subr.bf16.mxu1 %v3479_v27 }
 0x1d0   :  { %3153 = vmatprep.subr.bf16.mxu0 %v3480_v28  ;;  %v3542_v28 = vld [vmem:[#allocation13 + $0xc0] sm:$0xff]  }
 0x1d2   :  { %2162 = vmatpush1.bf16.msra.mxu1 %v3477_v29  ;;  %v3543_v29 = vld [vmem:[#allocation13 + $0x140] sm:$0xff]  }
 0x1d3   :  { %3154 = vmatpush3.bf16.msra.mxu0 %v3481_v35  ;;  %2163 = vmatprep.subr.bf16.mxu1 %v3484_v36  ;;  %v3544_v35 = vld [vmem:[#allocation13 + $0x80] sm:$0xff]   ;;  %v3546_v36 = vld [vmem:[#allocation13 + $0xc8] sm:$0xff]  }
 0x1d4   :  { %3155 = vmatprep.subr.bf16.mxu0 %v3485_v37  ;;  %v3548_v37 = vld [vmem:[#allocation13 + $0x88] sm:$0xff]  }
 0x1d6   :  { %2164 = vmatpush1.bf16.msra.mxu1 %v3482_v38  ;;  %v3550_v38 = vld [vmem:[#allocation13 + $0xd0] sm:$0xff]  }
 0x1d7   :  { %3156 = vmatpush3.bf16.msra.mxu0 %v3486_v39  ;;  %2165 = vmatprep.subr.bf16.mxu1 %v3489_v40  ;;  %v3552_v39 = vld [vmem:[#allocation13 + $0x90] sm:$0xff]   ;;  %v3554_v40 = vld [vmem:[#allocation13 + $0xd8] sm:$0xff]  }
 0x1d8   :  { %3157 = vmatprep.subr.bf16.mxu0 %v3490_v41  ;;  %v3556_v41 = vld [vmem:[#allocation13 + $0x98] sm:$0xff]  }
 0x1da   :  { %2166 = vmatpush1.bf16.msra.mxu1 %v3487_v42  ;;  %v3558_v42 = vld [vmem:[#allocation13 + $0xe0] sm:$0xff]  }
 0x1db   :  { %3158 = vmatpush3.bf16.msra.mxu0 %v3491_v43  ;;  %2167 = vmatprep.subr.bf16.mxu1 %v3494_v44  ;;  %v3560_v43 = vld [vmem:[#allocation13 + $0xa0] sm:$0xff]   ;;  %v3562_v44 = vld [vmem:[#allocation13 + $0xe8] sm:$0xff]  }
 0x1dc   :  { %3159 = vmatprep.subr.bf16.mxu0 %v3495_v45  ;;  %v3564_v45 = vld [vmem:[#allocation13 + $0xa8] sm:$0xff]  }
 0x1de   :  { %2168 = vmatpush1.bf16.msra.mxu1 %v3492_v46  ;;  %v3566_v46 = vld [vmem:[#allocation13 + $0xf0] sm:$0xff]  }
 0x1df   :  { %3160 = vmatpush3.bf16.msra.mxu0 %v3496_v47  ;;  %2169 = vmatprep.subr.bf16.mxu1 %v3499_v24  ;;  %v3568_v24 = vld [vmem:[#allocation13 + $0xb0] sm:$0xff]  }
 0x1e0   :  { %3161 = vmatprep.subr.bf16.mxu0 %v3500_v48 }
 0x1e2   :  { %2170 = vmatpush1.bf16.msra.mxu1 %v3497_v49 }
 0x1e3   :  { %3162 = vmatpush3.bf16.msra.mxu0 %v3501_v50  ;;  %2171 = vmatprep.subr.bf16.mxu1 %v3504_v52 }
 0x1e4   :  { %3169 = vmatprep.subr.bf16.mxu0 %v3526_v54 }
 0x1e6   :  { %2269 = vmatmul.mubr.bf16.vlgmr.msra.gmra.mrb[16].mxu0 %v630_v58  ;;  %2172 = vmatpush1.bf16.msra.mxu1 %v3502_v55  ;;  %v3572_v55 = vld [vmem:[#allocation13 + $0xb8] sm:$0xff]  }
 0x1e7   :  { %2173 = vmatprep.subr.bf16.mxu1 %v3507_v57  ;;  %3170 = vmatpush3.bf16.msra.mxu0 %v3527_v26  ;;  %v765_v57 = vrot.slane %v760_v20, %v3973_v32  ;;  %v769_v26 = vrot.slane %v760_v20, %v3976_v33  ;;  %v3573_v20 = vld [vmem:[#allocation13 + $0x138] sm:$0xff]  }
 0x1e8   :  { %3171 = vmatprep.subr.bf16.mxu0 %v3528_v51 }
 0x1ea   :  { %2174 = vmatpush1.bf16.msra.mxu1 %v3505_v59 }
 0x1eb   :  { %2175 = vmatprep.subr.bf16.mxu1 %v3510_v60  ;;  %3172 = vmatpush3.bf16.msra.mxu0 %v3529_v61 }
 0x1ec   :  { %3173 = vmatprep.subr.bf16.mxu0 %v3530_v9 }
 0x1ee   :  { %2176 = vmatpush1.bf16.msra.mxu1 %v3508_v62 }
 0x1ef   :  { %2177 = vmatprep.subr.bf16.mxu1 %v3513_v56  ;;  %3174 = vmatpush3.bf16.msra.mxu0 %v3531_v63 }
 0x1f0   :  { %3175 = vmatprep.subr.bf16.mxu0 %v3532_v0  ;;  %v3545_v0 = vld [vmem:[#allocation13 + $0x100] sm:$0xff]  }
 0x1f2   :  { %2178 = vmatpush1.bf16.msra.mxu1 %v3511_v1 }
 0x1f3   :  { %2179 = vmatprep.subr.bf16.mxu1 %v3516_v2  ;;  %3176 = vmatpush3.bf16.msra.mxu0 %v3533_v3  ;;  %v3547_v2 = vld [vmem:[#allocation13 + $0x148] sm:$0xff]  }
 0x1f4   :  { %3177 = vmatprep.subr.bf16.mxu0 %v3534_v4  ;;  %v3549_v3 = vld [vmem:[#allocation13 + $0x108] sm:$0xff]   ;;  %v3551_v4 = vld [vmem:[#allocation13 + $0x150] sm:$0xff]  }
 0x1f6   :  { %2180 = vmatpush1.bf16.msra.mxu1 %v3514_v5  ;;  %v3553_v5 = vld [vmem:[#allocation13 + $0x110] sm:$0xff]  }
 0x1f7   :  { %2181 = vmatprep.subr.bf16.mxu1 %v3519_v6  ;;  %3178 = vmatpush3.bf16.msra.mxu0 %v3535_v7  ;;  %v3555_v6 = vld [vmem:[#allocation13 + $0x158] sm:$0xff]  }
 0x1f8   :  { %3179 = vmatprep.subr.bf16.mxu0 %v3536_v8  ;;  %v3557_v7 = vld [vmem:[#allocation13 + $0x118] sm:$0xff]   ;;  %v3559_v8 = vld [vmem:[#allocation13 + $0x160] sm:$0xff]  }
 0x1fa   :  { %2182 = vmatpush1.bf16.msra.mxu1 %v3517_v10  ;;  %v3561_v10 = vld [vmem:[#allocation13 + $0x120] sm:$0xff]  }
 0x1fb   :  { %2183 = vmatprep.subr.bf16.mxu1 %v3522_v12  ;;  %3180 = vmatpush3.bf16.msra.mxu0 %v3537_v14  ;;  %v3563_v12 = vld [vmem:[#allocation13 + $0x168] sm:$0xff]  }
 0x1fc   :  { %3181 = vmatprep.subr.bf16.mxu0 %v3538_v15  ;;  %v3565_v14 = vld [vmem:[#allocation13 + $0x128] sm:$0xff]   ;;  %v3567_v15 = vld [vmem:[#allocation13 + $0x170] sm:$0xff]  }
 0x1fe   :  { %2184 = vmatpush1.bf16.msra.mxu1 %v3520_v16  ;;  %v3569_v16 = vld [vmem:[#allocation13 + $0x130] sm:$0xff]  }
 0x1ff   :  { %2185 = vmatprep.subr.bf16.mxu1 %v3525_v30  ;;  %3182 = vmatpush3.bf16.msra.mxu0 %v3539_v17  ;;  %v3571_v30 = vld [vmem:[#allocation13 + $0x178] sm:$0xff]  }
 0x200   :  { %3183 = vmatprep.subr.bf16.mxu0 %v3540_v18 }
 0x202   :  { %2186 = vmatpush1.bf16.msra.mxu1 %v3523_v19 }
 0x203   :  { %3184 = vmatpush3.bf16.msra.mxu0 %v3541_v31  ;;  %3191 = vmatprep.subr.bf16.mxu1 %v3542_v28 }
 0x204   :  { %3213 = vmatprep.subr.bf16.mxu0 %v3543_v29 }
 0x205   :  { %2188 = vmatmul.mubr.bf16.vlgmr.msra.gmra.mrb[32].mxu1 %v630_v58 }
 0x206   :  { %3192 = vmatpush3.bf16.msra.mxu1 %v3544_v35 }
 0x207   :  { %3193 = vmatprep.subr.bf16.mxu1 %v3546_v36 }
 0x20a   :  { %3194 = vmatpush3.bf16.msra.mxu1 %v3548_v37 }
 0x20b   :  { %3195 = vmatprep.subr.bf16.mxu1 %v3550_v38 }
 0x20e   :  { %3196 = vmatpush3.bf16.msra.mxu1 %v3552_v39 }
 0x20f   :  { %3197 = vmatprep.subr.bf16.mxu1 %v3554_v40 }
 0x212   :  { %3198 = vmatpush3.bf16.msra.mxu1 %v3556_v41 }
 0x213   :  { %3199 = vmatprep.subr.bf16.mxu1 %v3558_v42 }
 0x216   :  { %3200 = vmatpush3.bf16.msra.mxu1 %v3560_v43 }
 0x217   :  { %3201 = vmatprep.subr.bf16.mxu1 %v3562_v44 }
 0x21a   :  { %3202 = vmatpush3.bf16.msra.mxu1 %v3564_v45 }
 0x21b   :  { %3203 = vmatprep.subr.bf16.mxu1 %v3566_v46 }
 0x21e   :  { %3204 = vmatpush3.bf16.msra.mxu1 %v3568_v24 }
 0x21f   :  { %3205 = vmatprep.subr.bf16.mxu1 %v3570_v53 }
 0x222   :  { %3206 = vmatpush3.bf16.msra.mxu1 %v3572_v55 }
 0x238   :  { %v3097_v13 = vpop.f32.mrb[24].mxu1 }
 0x239   :  { %v3098_v22 = vpop.f32.mrb[25].mxu1 }
 0x23a   :  { %v3099_v11 = vadd.f32 %v3098_v22, %v3097_v13  ;;  %v3100_v23 = vpop.f32.mrb[26].mxu1 }
 0x23b   :  { %v3101_v25 = vpop.f32.mrb[27].mxu1 }
 0x23c   :  { %v1406_v27 = vadd.f32 %v3099_v11, %v773_v21  ;;  %v1585_v21 = vld [vmem:[%s4054_s8] sm:$0x7] }
 0x23d   :  { %v1598_v22 = vrot.slane %v1585_v21, %v3990_v34  ;;  %v1590_v38 = vrot.slane %v1585_v21, %v3973_v32  ;;  %v1594_v39 = vrot.slane %v1585_v21, %v3976_v33 }
 0x258   :  { %v3119_v47 = vpop.f32.mrb[28].mxu1 }
 0x259   :  { %v3120_v48 = vpop.f32.mrb[29].mxu1 }
 0x25a   :  { %v3121_v49 = vadd.f32 %v3120_v48, %v3119_v47  ;;  %v3122_v50 = vpop.f32.mrb[30].mxu1 }
 0x25b   :  { %v3123_v52 = vpop.f32.mrb[31].mxu1 }
 0x25c   :  { %v4020_v54 = vadd.f32 %v3121_v49, %v1406_v27 }
 0x25e   :  { %v1453_v43 = vmax.f32 %v4020_v54, 0.0  ;;  %v3032_v54 = vld [vmem:[%s4056_s10] ss:$0 sm:$0xff] }
 0x260   :  { %v1456_v48 = vpack.c.bf16 %v1453_v43, %v1453_v43 }
 0x278   :  { %v1364_v58 = vpop.f32.mrb[8].mxu0 }
 0x279   :  { %v3235_v51 = vadd.f32 %v1364_v58, %v765_v57  ;;  %v1366_v59 = vpop.f32.mrb[9].mxu0 }
 0x27a   :  { %v3236_v60 = vadd.f32 %v1366_v59, %v769_v26  ;;  %v1368_v61 = vpop.f32.mrb[10].mxu0 }
 0x27b   :  { %v1451_v9 = vmax.f32 %v3235_v51, 0.0  ;;  %v1369_v62 = vpop.f32.mrb[11].mxu0 }
 0x27c   :  { %v1452_v56 = vmax.f32 %v3236_v60, 0.0 }
 0x27d   :  { %v1454_v1 = vpack.c.bf16 %v1451_v9, %v1451_v9 }
 0x27e   :  { %v1455_v63 = vpack.c.bf16 %v1452_v56, %v1452_v56 }
 0x280   :  { %2705 = vmatprep.mubr.bf16.mxu0 %v1455_v63 }
 0x281   :  { %2706 = vmatmul.mubr.bf16.vlgmr.msra.gmra.mrb[20].mxu0 %v1454_v1 }
 0x282   :  { %3214 = vmatpush3.bf16.msra.mxu0 %v3545_v0 }
 0x283   :  { %3215 = vmatprep.subr.bf16.mxu0 %v3547_v2 }
 0x286   :  { %3216 = vmatpush3.bf16.msra.mxu0 %v3549_v3 }
 0x287   :  { %3217 = vmatprep.subr.bf16.mxu0 %v3551_v4 }
 0x28a   :  { %3218 = vmatpush3.bf16.msra.mxu0 %v3553_v5 }
 0x28b   :  { %3219 = vmatprep.subr.bf16.mxu0 %v3555_v6 }
 0x28e   :  { %3220 = vmatpush3.bf16.msra.mxu0 %v3557_v7 }
 0x28f   :  { %3221 = vmatprep.subr.bf16.mxu0 %v3559_v8 }
 0x292   :  { %3222 = vmatpush3.bf16.msra.mxu0 %v3561_v10 }
 0x293   :  { %3223 = vmatprep.subr.bf16.mxu0 %v3563_v12 }
 0x296   :  { %3224 = vmatpush3.bf16.msra.mxu0 %v3565_v14 }
 0x297   :  { %3225 = vmatprep.subr.bf16.mxu0 %v3567_v15 }
 0x298   :  { %v3141_v17 = vpop.f32.mrb[12].mxu0 }
 0x299   :  { %v3142_v18 = vpop.f32.mrb[13].mxu0 }
 0x29a   :  { %v3143_v19 = vadd.f32 %v3142_v18, %v3141_v17  ;;  %v3144_v31 = vpop.f32.mrb[14].mxu0  ;;  %3226 = vmatpush3.bf16.msra.mxu0 %v3569_v16 }
 0x29b   :  { %v3145_v13 = vpop.f32.mrb[15].mxu0  ;;  %3227 = vmatprep.subr.bf16.mxu0 %v3571_v30 }
 0x29c   :  { %v2231_v25 = vadd.f32 %v3143_v19, %v1598_v22 }
 0x29e   :  { %3228 = vmatpush3.bf16.msra.mxu0 %v3573_v20 }
 0x2b9   :  { %v3163_v11 = vpop.f32.mrb[16].mxu0 }
 0x2ba   :  { %v3164_v23 = vpop.f32.mrb[17].mxu0 }
 0x2bb   :  { %v3165_v27 = vadd.f32 %v3164_v23, %v3163_v11  ;;  %v3166_v28 = vpop.f32.mrb[18].mxu0 }
 0x2bc   :  { %v3167_v29 = vpop.f32.mrb[19].mxu0 }
 0x2bd   :  { %v2271_v35 = vadd.f32 %v3165_v27, %v2231_v25 }
 0x2bf   :  { %v2278_v36 = vmax.f32 %v2271_v35, 0.0 }
 0x2c1   :  { %v2281_v37 = vpack.c.bf16 %v2278_v36, %v2278_v36 }
 0x2c3   :  { %2785 = vmatprep.mubr.bf16.mxu0 %v2281_v37 }
 0x2d8   :  { %v2189_v40 = vpop.f32.mrb[32].mxu1 }
 0x2d9   :  { %v3237_v41 = vadd.f32 %v2189_v40, %v1590_v38  ;;  %v2191_v42 = vpop.f32.mrb[33].mxu1 }
 0x2da   :  { %v3238_v34 = vadd.f32 %v2191_v42, %v1594_v39  ;;  %v2193_v44 = vpop.f32.mrb[34].mxu1 }
 0x2db   :  { %v2276_v45 = vmax.f32 %v3237_v41, 0.0  ;;  %v2194_v46 = vpop.f32.mrb[35].mxu1 }
 0x2dc   :  { %v2277_v47 = vmax.f32 %v3238_v34, 0.0 }
 0x2dd   :  { %v2279_v24 = vpack.c.bf16 %v2276_v45, %v2276_v45 }
 0x2de   :  { %v2280_v49 = vpack.c.bf16 %v2277_v47, %v2277_v47 }
 0x2df   :  { %2745 = vmatprep.mubr.bf16.mxu1 %v2279_v24 }
 0x2e0   :  { %2746 = vmatmul.mubr.bf16.vlgmr.msra.gmra.mrb[36].mxu1 %v1456_v48  ;;  %2786 = vmatmul.mubr.bf16.vlgmr.msra.gmra.mrb[24].mxu0 %v2280_v49 }
 0x354   :  { %v3185_v50 = vpop.f32.mrb[20].mxu0 }
 0x355   :  { %v3186_v32 = vpop.f32.mrb[21].mxu0 }
 0x356   :  { %v3187_v52 = vadd.f32 %v3186_v32, %v3185_v50  ;;  %v3188_v33 = vpop.f32.mrb[22].mxu0 }
 0x357   :  { %v3189_v53 = vpop.f32.mrb[23].mxu0 }
 0x358   :  { %v2708_v51 = vadd.f32 %v3187_v52, %v3032_v54 }
 0x3b3   :  { %v3207_v55 = vpop.f32.mrb[36].mxu1  ;;  %v3229_v57 = vpop.f32.mrb[24].mxu0 }
 0x3b4   :  { %v3208_v26 = vpop.f32.mrb[37].mxu1  ;;  %v3230_v58 = vpop.f32.mrb[25].mxu0 }
 0x3b5   :  { %v3209_v59 = vadd.f32 %v3208_v26, %v3207_v55  ;;  %v3231_v60 = vadd.f32 %v3230_v58, %v3229_v57  ;;  %v3210_v61 = vpop.f32.mrb[38].mxu1  ;;  %v3232_v9 = vpop.f32.mrb[26].mxu0 }
 0x3b6   :  { %v3211_v62 = vpop.f32.mrb[39].mxu1  ;;  %v3233_v56 = vpop.f32.mrb[27].mxu0 }
 0x3b7   :  { %v2748_v63 = vadd.f32 %v3209_v59, %v2708_v51 }
 0x3b9   :  { %v2788_v0 = vadd.f32 %v3231_v60, %v2748_v63 }
 0x3bb   :  { %2793 = vst [vmem:[#allocation14] sm:$0xff] %v2788_v0 }
 0x3bc   :  { %3739 = shalt.err (!%p3736_p4)
}
 0x3bd   :  { %s3740_s30 = scalar_lea.hbm %s4057_s11, 128 }
 0x3be   :  { %p3741_p5 = scmp.ne.s32.totalorder %s4057_s11, %s3740_s30  ;;  %p3744_p6 = scmp.lt.u32.totalorder %s3740_s30, %s4057_s11 }
 0x3c0   :  { %p3746_p7 = pnand %p3744_p6, %p3741_p5 }
 0x3c2   :  { %3749 = shalt.err (!%p3746_p7)
}
 0x3c3   :  { %2803 = dma.vmem_to_hbm [thread:$0]  %s2801_s23, 128, %s4057_s11, [#allocation4]  }
 0x3c4   :  { %3758 = dma.done.wait [#allocation4], 128  }
 0x3c5   :  { %3759 = vsyncadd [#allocation4], 4294967168 }
 0x3c6   :  { %2807 = vsyncpa [#allocation3], 1 }
 0x3c7   :  { %2808 = vsyncpa [#allocation6], 1 }
 0x3c8   :  { %2809 = vsyncpa [#allocation9], 1 }
 0x3c9   :  { %2810 = vsyncpa [#allocation12], 1 }
 0x3ca   :  { %2811 = vsyncpa [#allocation4], 1 }

// kernel: tpu_custom_call.1
= control target key start
LH: loop header
LB: loop body
LE: loop exit
PB: predicated region body
PF: predicated region fallthrough
CT: control target
= control target key end

     0   :  { %16 = vsyncpa [#allocation3], 0  ;;  %s4046_s0 = inlined_call_operand.hbm [shape: f32[8,16], index: 0, kind: input, shape index: {}]   ;;  %s4047_s1 = inlined_call_operand.hbm [shape: f32[8,8], index: 1, kind: input, shape index: {}]   ;;  %s4048_s2 = inlined_call_operand.hbm [shape: bf16[16,1024], index: 2, kind: input, shape index: {}]   ;;  %s4049_s3 = inlined_call_operand.hbm [shape: bf16[8,1024], index: 3, kind: input, shape index: {}]   ;;  %s4050_s4 = inlined_call_operand.vmem [shape: f32[1,1024], index: 4, kind: input, shape index: {}]   ;;  %s4051_s5 = inlined_call_operand.hbm [shape: bf16[512,384], index: 5, kind: input, shape index: {}]   ;;  %s4052_s6 = inlined_call_operand.vmem [shape: f32[1,384], index: 6, kind: input, shape index: {}]   ;;  %s4053_s7 = inlined_call_operand.hbm [shape: bf16[512,384], index: 7, kind: input, shape index: {}]   ;;  %s4054_s8 = inlined_call_operand.vmem [shape: f32[1,384], index: 8, kind: input, shape index: {}]   ;;  %s4055_s9 = inlined_call_operand.hbm [shape: bf16[768,128], index: 9, kind: input, shape index: {}]   ;;  %s4056_s10 = inlined_call_operand.vmem [shape: f32[1,128], index: 10, kind: input, shape index: {}]   ;;  %s4057_s11 = inlined_call_operand.hbm [shape: f32[8,128], index: 11, kind: output, shape index: {}]  }
   0x1   :  { %17 = vsyncpa [#allocation6], 0 }
   0x2   :  { %18 = vsyncpa [#allocation9], 0 }
   0x3   :  { %19 = vsyncpa [#allocation12], 0 }
   0x4   :  { %20 = vsyncpa [#allocation4], 0  ;;  %s3760_s17 = smov [#allocation5]   ;;  %s3761_s19 = smov [#allocation8]  }
   0x5   :  { %s37_s18 = sshll.u32 %s3760_s17, 4  ;;  %s59_s20 = sshll.u32 %s3761_s19, 4  ;;  %s38_s18 = int_to_ptr.vmem [resolvable:$true] %s37_s18  ;;  %s60_s20 = int_to_ptr.vmem [resolvable:$true] %s59_s20 }
   0x6   :  { %s3574_s23 = scalar_lea.hbm %s4047_s1, 128 }
   0x7   :  { %p3575_p0 = scmp.ne.s32.totalorder %s4047_s1, %s3574_s23  ;;  %p3578_p1 = scmp.lt.u32.totalorder %s3574_s23, %s4047_s1 }
   0x9   :  { %p3580_p2 = pnand %p3578_p1, %p3575_p0 }
   0xb   :  { %3583 = shalt.err (!%p3580_p2)
}
   0xc   :  { %s3584_s28 = scalar_lea.vmem %s38_s18, 128  ;;  %p3589_p4 = scmp.lt.s32.totalorder %s38_s18, %s38_s18 }
   0xd   :  { %p3585_p3 = scmp.ne.s32.totalorder %s38_s18, %s3584_s28  ;;  %p3590_p5 = scmp.lt.s32.totalorder %s3584_s28, %s3584_s28 }
   0xf   :  { %p3591_p6 = por %p3590_p5, %p3589_p4 }
  0x11   :  { %p3592_p7 = pnand %p3591_p6, %p3585_p3 }
  0x13   :  { %3595 = shalt.err (!%p3592_p7)
}
  0x14   :  { %40 = dma.hbm_to_vmem [thread:$0]  %s4047_s1, 128, %s38_s18, [#allocation6]  }
  0x15   :  { %s3596_s14 = scalar_lea.hbm %s4049_s3, 512 }
  0x16   :  { %p3597_p8 = scmp.ne.s32.totalorder %s4049_s3, %s3596_s14  ;;  %p3600_p9 = scmp.lt.u32.totalorder %s3596_s14, %s4049_s3 }
  0x18   :  { %p3602_p10 = pnand %p3600_p9, %p3597_p8 }
  0x1a   :  { %3605 = shalt.err (!%p3602_p10)
}
  0x1b   :  { %s3606_s21 = scalar_lea.vmem %s60_s20, 512  ;;  %p3611_p12 = scmp.lt.s32.totalorder %s60_s20, %s60_s20 }
  0x1c   :  { %p3607_p11 = scmp.ne.s32.totalorder %s60_s20, %s3606_s21  ;;  %p3612_p13 = scmp.lt.s32.totalorder %s3606_s21, %s3606_s21 }
  0x1e   :  { %p3613_p0 = por %p3612_p13, %p3611_p12 }
  0x20   :  { %p3614_p1 = pnand %p3613_p0, %p3607_p11 }
  0x22   :  { %3617 = shalt.err (!%p3614_p1)
}
  0x23   :  { %62 = dma.hbm_to_vmem [thread:$0]  %s4049_s3, 512, %s60_s20, [#allocation9]  }
  0x24   :  { %s3762_s22 = smov [#allocation11]   ;;  %s3763_s24 = smov [#allocation2]  }
  0x25   :  { %s84_s23 = sshll.u32 %s3762_s22, 4  ;;  %s27_s25 = sshll.u32 %s3763_s24, 4  ;;  %s85_s23 = int_to_ptr.vmem [resolvable:$true] %s84_s23  ;;  %s28_s25 = int_to_ptr.vmem [resolvable:$true] %s27_s25 }
  0x26   :  { %s3618_s28 = scalar_lea.hbm %s4053_s7, 12288 }
  0x27   :  { %p3619_p2 = scmp.ne.s32.totalorder %s4053_s7, %s3618_s28  ;;  %p3622_p3 = scmp.lt.u32.totalorder %s3618_s28, %s4053_s7 }
  0x29   :  { %p3624_p4 = pnand %p3622_p3, %p3619_p2 }
  0x2b   :  { %3627 = shalt.err (!%p3624_p4)
}
  0x2c   :  { %s3628_s3 = scalar_lea.vmem %s85_s23, 12288  ;;  %p3633_p6 = scmp.lt.s32.totalorder %s85_s23, %s85_s23 }
  0x2d   :  { %p3629_p5 = scmp.ne.s32.totalorder %s85_s23, %s3628_s3  ;;  %p3634_p7 = scmp.lt.s32.totalorder %s3628_s3, %s3628_s3 }
  0x2f   :  { %p3635_p8 = por %p3634_p7, %p3633_p6 }
  0x31   :  { %p3636_p9 = pnand %p3635_p8, %p3629_p5 }
  0x33   :  { %3639 = shalt.err (!%p3636_p9)
}
  0x34   :  { %s3764_s20 = smov 192   ;;  %s3765_s14 = smov 12  }
  0x35   :  { %90 = dma.hbm_to_vmem [thread:$0]  %s4053_s7, 12288, %s85_s23, [#allocation12], %s3764_s20, %s3764_s20, %s3765_s14  }
  0x36   :  { %s3640_s21 = scalar_lea.hbm %s4046_s0, 128 }
  0x37   :  { %p3641_p10 = scmp.ne.s32.totalorder %s4046_s0, %s3640_s21  ;;  %p3644_p11 = scmp.lt.u32.totalorder %s3640_s21, %s4046_s0 }
  0x39   :  { %p3646_p12 = pnand %p3644_p11, %p3641_p10 }
  0x3b   :  { %3649 = shalt.err (!%p3646_p12)
}
  0x3c   :  { %s3650_s26 = scalar_lea.vmem %s28_s25, 128  ;;  %p3655_p0 = scmp.lt.s32.totalorder %s28_s25, %s28_s25 }
  0x3d   :  { %p3651_p13 = scmp.ne.s32.totalorder %s28_s25, %s3650_s26  ;;  %p3656_p1 = scmp.lt.s32.totalorder %s3650_s26, %s3650_s26 }
  0x3f   :  { %p3657_p2 = por %p3656_p1, %p3655_p0 }
  0x41   :  { %p3658_p3 = pnand %p3657_p2, %p3651_p13 }
  0x43   :  { %3661 = shalt.err (!%p3658_p3)
}
  0x44   :  { %30 = dma.hbm_to_vmem [thread:$0]  %s4046_s0, 128, %s28_s25, [#allocation3]  }
  0x45   :  { %s3766_s27 = smov [#allocation7]   ;;  %s3662_s12 = scalar_lea.hbm %s4048_s2, 1024 }
  0x46   :  { %s46_s28 = sshll.u32 %s3766_s27, 4  ;;  %p3663_p4 = scmp.ne.s32.totalorder %s4048_s2, %s3662_s12  ;;  %s47_s28 = int_to_ptr.vmem [resolvable:$true] %s46_s28 }
  0x47   :  { %p3666_p5 = scmp.lt.u32.totalorder %s3662_s12, %s4048_s2 }
  0x49   :  { %p3668_p6 = pnand %p3666_p5, %p3663_p4 }
  0x4b   :  { %3671 = shalt.err (!%p3668_p6)
}
  0x4c   :  { %s3672_s17 = scalar_lea.vmem %s47_s28, 1024  ;;  %p3677_p8 = scmp.lt.s32.totalorder %s47_s28, %s47_s28 }
  0x4d   :  { %p3673_p7 = scmp.ne.s32.totalorder %s47_s28, %s3672_s17  ;;  %p3678_p9 = scmp.lt.s32.totalorder %s3672_s17, %s3672_s17 }
  0x4f   :  { %p3679_p10 = por %p3678_p9, %p3677_p8 }
  0x51   :  { %p3680_p11 = pnand %p3679_p10, %p3673_p7 }
  0x53   :  { %3683 = shalt.err (!%p3680_p11)
}
  0x54   :  { %s3767_s0 = smov 512   ;;  %s3768_s25 = smov 32  }
  0x55   :  { %52 = dma.hbm_to_vmem [thread:$0]  %s4048_s2, 1024, %s47_s28, [#allocation6], %s3767_s0, %s3767_s0, %s3768_s25  }
  0x56   :  { %s3769_s1 = smov [#allocation10]   ;;  %s3770_s22 = smov [#allocation13]  }
  0x57   :  { %s70_s18 = sshll.u32 %s3769_s1, 4  ;;  %s98_s24 = sshll.u32 %s3770_s22, 4  ;;  %s71_s18 = int_to_ptr.vmem [resolvable:$true] %s70_s18  ;;  %s99_s24 = int_to_ptr.vmem [resolvable:$true] %s98_s24 }
  0x58   :  { %s3684_s23 = scalar_lea.hbm %s4051_s5, 12288 }
  0x59   :  { %p3685_p12 = scmp.ne.s32.totalorder %s4051_s5, %s3684_s23  ;;  %p3688_p13 = scmp.lt.u32.totalorder %s3684_s23, %s4051_s5 }
  0x5b   :  { %p3690_p0 = pnand %p3688_p13, %p3685_p12 }
  0x5d   :  { %3693 = shalt.err (!%p3690_p0)
}
  0x5e   :  { %s3694_s2 = scalar_lea.vmem %s71_s18, 12288  ;;  %p3699_p2 = scmp.lt.s32.totalorder %s71_s18, %s71_s18 }
  0x5f   :  { %p3695_p1 = scmp.ne.s32.totalorder %s71_s18, %s3694_s2  ;;  %p3700_p3 = scmp.lt.s32.totalorder %s3694_s2, %s3694_s2 }
  0x61   :  { %p3701_p4 = por %p3700_p3, %p3699_p2 }
  0x63   :  { %p3702_p5 = pnand %p3701_p4, %p3695_p1 }
  0x65   :  { %3705 = shalt.err (!%p3702_p5)
}
  0x66   :  { %76 = dma.hbm_to_vmem [thread:$0]  %s4051_s5, 12288, %s71_s18, [#allocation9], %s3764_s20, %s3764_s20, %s3765_s14  }
  0x67   :  { %s3706_s16 = scalar_lea.hbm %s4055_s9, 6144 }
  0x68   :  { %p3707_p6 = scmp.ne.s32.totalorder %s4055_s9, %s3706_s16  ;;  %p3710_p7 = scmp.lt.u32.totalorder %s3706_s16, %s4055_s9 }
  0x6a   :  { %p3712_p8 = pnand %p3710_p7, %p3707_p6 }
  0x6c   :  { %3715 = shalt.err (!%p3712_p8)
}
  0x6d   :  { %s3716_s21 = scalar_lea.vmem %s99_s24, 6144  ;;  %p3721_p10 = scmp.lt.s32.totalorder %s99_s24, %s99_s24 }
  0x6e   :  { %p3717_p9 = scmp.ne.s32.totalorder %s99_s24, %s3716_s21  ;;  %p3722_p11 = scmp.lt.s32.totalorder %s3716_s21, %s3716_s21 }
  0x70   :  { %p3723_p12 = por %p3722_p11, %p3721_p10 }
  0x72   :  { %p3724_p13 = pnand %p3723_p12, %p3717_p9 }
  0x74   :  { %3727 = shalt.err (!%p3724_p13)
}
  0x75   :  { %s3771_s5 = smov 64   ;;  %s3772_s20 = smov 4  }
  0x76   :  { %104 = dma.hbm_to_vmem [thread:$0]  %s4055_s9, 6144, %s99_s24, [#allocation12], %s3771_s5, %s3771_s5, %s3772_s20  }
  0x77   :  { %3750 = dma.done.wait [#allocation3], 128  }
  0x78   :  { %3751 = vsyncadd [#allocation3], 4294967168 }
  0x79   :  { %3752 = dma.done.wait [#allocation6], 1152  }
  0x7a   :  { %3753 = vsyncadd [#allocation6], 4294966144 }
  0x7b   :  { %3754 = dma.done.wait [#allocation9], 12800  }
  0x7c   :  { %3755 = vsyncadd [#allocation9], 4294954496 }
  0x7d   :  { %3756 = dma.done.wait [#allocation12], 18432  }
  0x7e   :  { %3757 = vsyncadd [#allocation12], 4294948864  ;;  %v3773_v0 = vmov 0   ;;  %v141_v1 = vld [vmem:[#allocation8] sm:$0xff]  ;;  %vm169_vm0 = vcmask 1043456   ;;  %v131_v8 = vld [vmem:[#allocation5] sm:$0xff] }
  0x7f   :  { %226 = vmatprep.mubr.bf16.mxu1 %v3773_v0  ;;  %434 = vmatprep.mubr.bf16.mxu0 %v3773_v0  ;;  %v133_v2 = vld [vmem:[#allocation7] sm:$0xff]  ;;  %v2813_v4 = vcombine.high %v141_v1, %v141_v1  ;;  %v2812_v6 = vcombine.low %v141_v1, %v141_v1  ;;  %v142_v9 = vld [vmem:[#allocation8 + $0x8] sm:$0xff]  ;;  %v129_v10 = vld [vmem:[#allocation2] sm:$0xff]  ;;  %v132_v17 = vpack.c.bf16 %v131_v8, %v131_v8  ;;  %vm165_vm1 = vcmask 64512   ;;  %s3774_s7 = smov [#allocation14]  }
  0x80   :  { %v137_v3 = vld [vmem:[#allocation7 + $0x20] sm:$0xff]  ;;  %v2815_v11 = vcombine.high %v142_v9, %v142_v9  ;;  %v2814_v12 = vcombine.low %v142_v9, %v142_v9  ;;  %v143_v13 = vld [vmem:[#allocation8 + $0x10] sm:$0xff]  ;;  %v3929_v18 = vpack.c.bf16 %v129_v10, %v129_v10  ;;  %vm398_vm2 = vcmask 130048   ;;  %v144_v25 = vld [vmem:[#allocation8 + $0x18] sm:$0xff]  ;;  %s2800_s23 = sshll.u32 %s3774_s7, 4  ;;  %s2801_s23 = int_to_ptr.vmem [resolvable:$true] %s2800_s23 }
  0x81   :  { %v2829_v5 = vcombine.high %v133_v2, %v137_v3  ;;  %v2828_v7 = vcombine.low %v133_v2, %v137_v3  ;;  %v135_v14 = vld [vmem:[#allocation7 + $0x10] sm:$0xff]  ;;  %2820 = vmatprep.subr.msk.bf16.mxu1 %vm169_vm0, %v2813_v4  ;;  %v171_v16 = vsel %vm169_vm0, %v2812_v6, 0  ;;  %v2817_v21 = vcombine.high %v143_v13, %v143_v13  ;;  %v3270_v28 = vld [vmem:[#allocation10] ss:$12 sps:$4 sm:$0xff]   ;;  %v3275_v29 = vld [vmem:[#allocation10 + $0x1c] ss:$12 sps:$4 sm:$0xff]   ;;  %p3733_p1 = scmp.lt.s32.totalorder %s2801_s23, %s2801_s23 }
  0x82   :  { %v139_v15 = vld [vmem:[#allocation7 + $0x30] sm:$0xff]  ;;  %195 = vmatpush1.bf16.msra.mxu1 %v171_v16  ;;  %v177_v20 = vsel %vm169_vm0, %v2814_v12, 0  ;;  %v2816_v24 = vcombine.low %v143_v13, %v143_v13  ;;  %v2819_v27 = vcombine.high %v144_v25, %v144_v25  ;;  %v2818_v30 = vcombine.low %v144_v25, %v144_v25  ;;  %v134_v31 = vld [vmem:[#allocation7 + $0x8] sm:$0xff]  ;;  %v3273_v33 = vld [vmem:[#allocation10 + $0x18] ss:$12 sps:$4 sm:$0xff]   ;;  %s3728_s27 = scalar_lea.vmem %s2801_s23, 128 }
  0x83   :  { %402 = vmatprep.subr.bf16.mxu0 %v2829_v5  ;;  %v2833_v19 = vcombine.high %v135_v14, %v139_v15  ;;  %2822 = vmatprep.subr.msk.bf16.mxu1 %vm169_vm0, %v2815_v11  ;;  %v2832_v22 = vcombine.low %v135_v14, %v139_v15  ;;  %v3272_v23 = vld [vmem:[#allocation10 + $0x4] ss:$12 sps:$4 sm:$0xff]   ;;  %v138_v32 = vld [vmem:[#allocation7 + $0x28] sm:$0xff]  ;;  %v3278_v34 = vld [vmem:[#allocation10 + $0x34] ss:$12 sps:$4 sm:$0xff]   ;;  %p3729_p0 = scmp.ne.s32.totalorder %s2801_s23, %s3728_s27  ;;  %p3734_p2 = scmp.lt.s32.totalorder %s3728_s27, %s3728_s27 }
  0x84   :  { %403 = vmatpush1.bf16.msra.mxu0 %v2828_v7  ;;  %v183_v26 = vsel %vm169_vm0, %v2816_v24, 0  ;;  %v189_v35 = vsel %vm169_vm0, %v2818_v30, 0  ;;  %v2831_v36 = vcombine.high %v134_v31, %v138_v32  ;;  %v3276_v37 = vld [vmem:[#allocation10 + $0x30] ss:$12 sps:$4 sm:$0xff]   ;;  %v3281_v38 = vld [vmem:[#allocation10 + $0x4c] ss:$12 sps:$4 sm:$0xff]   ;;  %v2830_v43 = vcombine.low %v134_v31, %v138_v32 }
  0x85   :  { %484 = vmatprep.subr.bf16.mxu0 %v2833_v19  ;;  %2821 = vmatmul.mubr.msk.bf16.vlgmr.msra.gmra.mrb[0].mxu1 %vm165_vm1, %v132_v17  ;;  %v136_v39 = vld [vmem:[#allocation7 + $0x18] sm:$0xff]  ;;  %v3279_v40 = vld [vmem:[#allocation10 + $0x48] ss:$12 sps:$4 sm:$0xff]   ;;  %v3284_v42 = vld [vmem:[#allocation10 + $0x64] ss:$12 sps:$4 sm:$0xff]   ;;  %p3735_p3 = por %p3734_p2, %p3733_p1 }
  0x86   :  { %236 = vmatpush1.bf16.msra.mxu1 %v177_v20  ;;  %267 = vmatprep.mubr.bf16.mxu1 %v3773_v0  ;;  %v140_v41 = vld [vmem:[#allocation7 + $0x38] sm:$0xff]  ;;  %v3282_v45 = vld [vmem:[#allocation10 + $0x60] ss:$12 sps:$4 sm:$0xff]   ;;  %v3297_v50 = vld [vmem:[#allocation10 + $0xc8] ss:$12 sps:$4 sm:$0xff]  }
  0x87   :  { %2836 = vmatmul.mubr.msk.bf16.vlgmr.msra.gmra.mrb[0].mxu0 %vm398_vm2, %v3929_v18  ;;  %2824 = vmatprep.subr.msk.bf16.mxu1 %vm169_vm0, %v2817_v21  ;;  %v2835_v44 = vcombine.high %v136_v39, %v140_v41  ;;  %v3287_v46 = vld [vmem:[#allocation10 + $0x7c] ss:$12 sps:$4 sm:$0xff]   ;;  %v3285_v47 = vld [vmem:[#allocation10 + $0x78] ss:$12 sps:$4 sm:$0xff]   ;;  %v3290_v48 = vld [vmem:[#allocation10 + $0x94] ss:$12 sps:$4 sm:$0xff]   ;;  %v2834_v51 = vcombine.low %v136_v39, %v140_v41  ;;  %p3736_p4 = pnand %p3735_p3, %p3729_p0 }
  0x88   :  { %485 = vmatpush1.bf16.msra.mxu0 %v2832_v22  ;;  %516 = vmatprep.mubr.bf16.mxu0 %v3773_v0  ;;  %v3288_v49 = vld [vmem:[#allocation10 + $0x90] ss:$12 sps:$4 sm:$0xff]   ;;  %v3293_v52 = vld [vmem:[#allocation10 + $0xac] ss:$12 sps:$4 sm:$0xff]   ;;  %v3291_v53 = vld [vmem:[#allocation10 + $0xa8] ss:$12 sps:$4 sm:$0xff]  }
  0x89   :  { %1289 = vmatprep.subr.bf16.mxu0 %v3272_v23  ;;  %v3296_v54 = vld [vmem:[#allocation10 + $0xc4] ss:$12 sps:$4 sm:$0xff]   ;;  %v3298_v55 = vld [vmem:[#allocation10 + $0x8] ss:$12 sps:$4 sm:$0xff]   ;;  %v3294_v56 = vld [vmem:[#allocation10 + $0xc0] ss:$12 sps:$4 sm:$0xff]   ;;  %v568_v23 = vlaneseq }
  0x8a   :  { %v3302_v57 = vld [vmem:[#allocation10 + $0xe0] ss:$12 sps:$4 sm:$0xff]   ;;  %v3301_v58 = vld [vmem:[#allocation10 + $0xdc] ss:$12 sps:$4 sm:$0xff]   ;;  %v3299_v60 = vld [vmem:[#allocation10 + $0xd8] ss:$12 sps:$4 sm:$0xff]  }
  0x8b   :  { %v3303_v59 = vld [vmem:[#allocation10 + $0x20] ss:$12 sps:$4 sm:$0xff]   ;;  %v3307_v61 = vld [vmem:[#allocation10 + $0xf8] ss:$12 sps:$4 sm:$0xff]   ;;  %v3312_v1 = vld [vmem:[#allocation10 + $0x110] ss:$12 sps:$4 sm:$0xff]  }
  0x8c   :  { %v3306_v62 = vld [vmem:[#allocation10 + $0xf4] ss:$12 sps:$4 sm:$0xff]   ;;  %v3308_v63 = vld [vmem:[#allocation10 + $0x38] ss:$12 sps:$4 sm:$0xff]   ;;  %v3313_v3 = vld [vmem:[#allocation10 + $0x50] ss:$12 sps:$4 sm:$0xff]  }
  0x8d   :  { %2823 = vmatmul.mubr.msk.bf16.vlgmr.msra.gmra.mrb[4].mxu1 %vm165_vm1, %v132_v17  ;;  %v3311_v2 = vld [vmem:[#allocation10 + $0x10c] ss:$12 sps:$4 sm:$0xff]   ;;  %v3309_v4 = vld [vmem:[#allocation10 + $0x108] ss:$12 sps:$4 sm:$0xff]   ;;  %v3316_v6 = vld [vmem:[#allocation10 + $0x124] ss:$12 sps:$4 sm:$0xff]  }
  0x8e   :  { %277 = vmatpush1.bf16.msra.mxu1 %v183_v26  ;;  %308 = vmatprep.mubr.bf16.mxu1 %v3773_v0  ;;  %v3317_v5 = vld [vmem:[#allocation10 + $0x128] ss:$12 sps:$4 sm:$0xff]   ;;  %v3314_v8 = vld [vmem:[#allocation10 + $0x120] ss:$12 sps:$4 sm:$0xff]   ;;  %v3319_v12 = vld [vmem:[#allocation10 + $0x138] ss:$12 sps:$4 sm:$0xff]  }
  0x8f   :  { %2838 = vmatmul.mubr.msk.bf16.vlgmr.msra.gmra.mrb[4].mxu0 %vm398_vm2, %v3929_v18  ;;  %2826 = vmatprep.subr.msk.bf16.mxu1 %vm169_vm0, %v2819_v27  ;;  %v3318_v7 = vld [vmem:[#allocation10 + $0x68] ss:$12 sps:$4 sm:$0xff]   ;;  %v3322_v9 = vld [vmem:[#allocation10 + $0x140] ss:$12 sps:$4 sm:$0xff]   ;;  %v3327_v14 = vld [vmem:[#allocation10 + $0x158] ss:$12 sps:$4 sm:$0xff]  }
  0x90   :  { %1290 = vmatpush1.bf16.msra.mxu0 %v3270_v28  ;;  %v3321_v10 = vld [vmem:[#allocation10 + $0x13c] ss:$12 sps:$4 sm:$0xff]   ;;  %v3323_v11 = vld [vmem:[#allocation10 + $0x80] ss:$12 sps:$4 sm:$0xff]   ;;  %v3328_v16 = vld [vmem:[#allocation10 + $0x98] ss:$12 sps:$4 sm:$0xff]  }
  0x91   :  { %1291 = vmatprep.subr.bf16.mxu0 %v3275_v29  ;;  %v3326_v13 = vld [vmem:[#allocation10 + $0x154] ss:$12 sps:$4 sm:$0xff]   ;;  %v3324_v15 = vld [vmem:[#allocation10 + $0x150] ss:$12 sps:$4 sm:$0xff]   ;;  %v3955_v24 = vshrl.u32 %v568_v23, 7 }
  0x92   :  { %v3329_v19 = vld [vmem:[#allocation10 + $0x168] ss:$12 sps:$4 sm:$0xff]   ;;  %v3333_v20 = vld [vmem:[#allocation10 + $0xb0] ss:$12 sps:$4 sm:$0xff]  }
  0x93   :  { %v3336_v21 = vld [vmem:[#allocation10 + $0x184] ss:$12 sps:$4 sm:$0xff]   ;;  %v3337_v22 = vld [vmem:[#allocation10 + $0x248] ss:$12 sps:$4 sm:$0xff]   ;;  %v586_v25 = vsub.s32 4, %v3955_v24  ;;  %v594_v28 = vsub.s32 6, %v3955_v24 }
  0x94   :  { %1292 = vmatpush1.bf16.msra.mxu0 %v3273_v33  ;;  %v3961_v26 = vld [vmem:[%s4050_s4] sm:$0xff]  ;;  %v598_v29 = vsub.s32 7, %v3955_v24  ;;  %v3973_v32 = vsub.s32 0, %v3955_v24  ;;  %v3976_v33 = vsub.s32 1, %v3955_v24  ;;  %v3361_v23 = vld [vmem:[#allocation10 + $0x1fc] ss:$12 sps:$4 sm:$0xff]  }
  0x95   :  { %1293 = vmatprep.subr.bf16.mxu0 %v3278_v34  ;;  %2825 = vmatmul.mubr.msk.bf16.vlgmr.msra.gmra.mrb[8].mxu1 %vm165_vm1, %v132_v17  ;;  %v587_v27 = vrot.slane %v3961_v26, %v586_v25  ;;  %v3967_v30 = vrot.slane %v3961_v26, %v594_v28  ;;  %v3362_v25 = vld [vmem:[#allocation10 + $0x2c0] ss:$12 sps:$4 sm:$0xff]   ;;  %v590_v28 = vsub.s32 5, %v3955_v24 }
  0x96   :  { %318 = vmatpush1.bf16.msra.mxu1 %v189_v35  ;;  %349 = vmatprep.mubr.bf16.mxu1 %v3773_v0  ;;  %v3970_v31 = vrot.slane %v3961_v26, %v598_v29  ;;  %v571_v34 = vrot.slane %v3961_v26, %v3973_v32 }
  0x97   :  { %443 = vmatprep.subr.bf16.mxu1 %v2831_v36 }
  0x98   :  { %1294 = vmatpush1.bf16.msra.mxu0 %v3276_v37  ;;  %v575_v37 = vrot.slane %v3961_v26, %v3976_v33 }
  0x99   :  { %1295 = vmatprep.subr.bf16.mxu0 %v3281_v38 }
  0x9c   :  { %1296 = vmatpush1.bf16.msra.mxu0 %v3279_v40 }
  0x9d   :  { %1297 = vmatprep.subr.bf16.mxu0 %v3284_v42  ;;  %2827 = vmatmul.mubr.msk.bf16.vlgmr.msra.gmra.mrb[12].mxu1 %vm165_vm1, %v132_v17  ;;  %v3331_v17 = vld [vmem:[#allocation10 + $0x16c] ss:$12 sps:$4 sm:$0xff]  }
  0x9e   :  { %444 = vmatpush1.bf16.msra.mxu1 %v2830_v43  ;;  %475 = vmatprep.mubr.bf16.mxu1 %v3773_v0 }
  0x9f   :  { %525 = vmatprep.subr.bf16.mxu1 %v2835_v44 }
  0xa0   :  { %1298 = vmatpush1.bf16.msra.mxu0 %v3282_v45 }
  0xa1   :  { %1299 = vmatprep.subr.bf16.mxu0 %v3287_v46 }
  0xa4   :  { %1300 = vmatpush1.bf16.msra.mxu0 %v3285_v47 }
  0xa5   :  { %1301 = vmatprep.subr.bf16.mxu0 %v3290_v48  ;;  %2837 = vmatmul.mubr.msk.bf16.vlgmr.msra.gmra.mrb[16].mxu1 %vm398_vm2, %v3929_v18 }
  0xa6   :  { %526 = vmatpush1.bf16.msra.mxu1 %v2834_v51  ;;  %557 = vmatprep.mubr.bf16.mxu1 %v3773_v0  ;;  %v3304_v0 = vld [vmem:[#allocation10 + $0xf0] ss:$12 sps:$4 sm:$0xff]  }
  0xa7   :  { %3081 = vmatprep.subr.bf16.mxu1 %v3297_v50 }
  0xa8   :  { %1302 = vmatpush1.bf16.msra.mxu0 %v3288_v49 }
  0xa9   :  { %1303 = vmatprep.subr.bf16.mxu0 %v3293_v52  ;;  %v3334_v52 = vld [vmem:[#allocation10 + $0x180] ss:$12 sps:$4 sm:$0xff]  }
  0xac   :  { %1304 = vmatpush1.bf16.msra.mxu0 %v3291_v53  ;;  %v3338_v53 = vld [vmem:[#allocation10 + $0x188] ss:$12 sps:$4 sm:$0xff]  }
  0xad   :  { %1305 = vmatprep.subr.bf16.mxu0 %v3296_v54  ;;  %2839 = vmatmul.mubr.msk.bf16.vlgmr.msra.gmra.mrb[20].mxu1 %vm398_vm2, %v3929_v18  ;;  %v3332_v18 = vld [vmem:[#allocation10 + $0x170] ss:$12 sps:$4 sm:$0xff]  }
  0xae   :  { %3082 = vmatpush3.bf16.msra.mxu1 %v3298_v55 }
  0xaf   :  { %3083 = vmatprep.subr.bf16.mxu1 %v3302_v57  ;;  %v3341_v57 = vld [vmem:[#allocation10 + $0x19c] ss:$12 sps:$4 sm:$0xff]  }
  0xb0   :  { %1306 = vmatpush1.bf16.msra.mxu0 %v3294_v56 }
  0xb1   :  { %1307 = vmatprep.subr.bf16.mxu0 %v3301_v58  ;;  %v3342_v58 = vld [vmem:[#allocation10 + $0x260] ss:$12 sps:$4 sm:$0xff]  }
  0xb2   :  { %3084 = vmatpush3.bf16.msra.mxu1 %v3303_v59 }
  0xb3   :  { %3085 = vmatprep.subr.bf16.mxu1 %v3307_v61 }
  0xb4   :  { %1308 = vmatpush1.bf16.msra.mxu0 %v3299_v60 }
  0xb5   :  { %1309 = vmatprep.subr.bf16.mxu0 %v3306_v62 }
  0xb6   :  { %3086 = vmatpush3.bf16.msra.mxu1 %v3308_v63 }
  0xb7   :  { %3087 = vmatprep.subr.bf16.mxu1 %v3312_v1  ;;  %v3343_v1 = vld [vmem:[#allocation10 + $0x1a0] ss:$12 sps:$4 sm:$0xff]  }
  0xb8   :  { %1310 = vmatpush1.bf16.msra.mxu0 %v3304_v0  ;;  %v3339_v0 = vld [vmem:[#allocation10 + $0x198] ss:$12 sps:$4 sm:$0xff]  }
  0xb9   :  { %1311 = vmatprep.subr.bf16.mxu0 %v3311_v2  ;;  %v3346_v2 = vld [vmem:[#allocation10 + $0x1b4] ss:$12 sps:$4 sm:$0xff]  }
  0xba   :  { %3088 = vmatpush3.bf16.msra.mxu1 %v3313_v3  ;;  %v3347_v3 = vld [vmem:[#allocation10 + $0x278] ss:$12 sps:$4 sm:$0xff]  }
  0xbb   :  { %3089 = vmatprep.subr.bf16.mxu1 %v3317_v5  ;;  %v3344_v5 = vld [vmem:[#allocation10 + $0x1b0] ss:$12 sps:$4 sm:$0xff]  }
  0xbc   :  { %1312 = vmatpush1.bf16.msra.mxu0 %v3309_v4 }
  0xbd   :  { %1313 = vmatprep.subr.bf16.mxu0 %v3316_v6  ;;  %v3348_v6 = vld [vmem:[#allocation10 + $0x1b8] ss:$12 sps:$4 sm:$0xff]  }
  0xbe   :  { %3090 = vmatpush3.bf16.msra.mxu1 %v3318_v7 }
  0xbf   :  { %3091 = vmatprep.subr.bf16.mxu1 %v3322_v9  ;;  %v3351_v9 = vld [vmem:[#allocation10 + $0x1cc] ss:$12 sps:$4 sm:$0xff]  }
  0xc0   :  { %1314 = vmatpush1.bf16.msra.mxu0 %v3314_v8 }
  0xc1   :  { %1315 = vmatprep.subr.bf16.mxu0 %v3321_v10  ;;  %v3352_v10 = vld [vmem:[#allocation10 + $0x290] ss:$12 sps:$4 sm:$0xff]  }
  0xc2   :  { %3092 = vmatpush3.bf16.msra.mxu1 %v3323_v11 }
  0xc3   :  { %3093 = vmatprep.subr.bf16.mxu1 %v3327_v14 }
  0xc4   :  { %1316 = vmatpush1.bf16.msra.mxu0 %v3319_v12 }
  0xc5   :  { %1317 = vmatprep.subr.bf16.mxu0 %v3326_v13 }
  0xc6   :  { %3094 = vmatpush3.bf16.msra.mxu1 %v3328_v16  ;;  %v3353_v16 = vld [vmem:[#allocation10 + $0x1d0] ss:$12 sps:$4 sm:$0xff]  }
  0xc7   :  { %3095 = vmatprep.subr.bf16.mxu1 %v3332_v18  ;;  %v3357_v18 = vld [vmem:[#allocation10 + $0x2a8] ss:$12 sps:$4 sm:$0xff]  }
  0xc8   :  { %1318 = vmatpush1.bf16.msra.mxu0 %v3324_v15  ;;  %v3349_v15 = vld [vmem:[#allocation10 + $0x1c8] ss:$12 sps:$4 sm:$0xff]  }
  0xc9   :  { %1319 = vmatprep.subr.bf16.mxu0 %v3331_v17  ;;  %v3356_v17 = vld [vmem:[#allocation10 + $0x1e4] ss:$12 sps:$4 sm:$0xff]  }
  0xca   :  { %3096 = vmatpush3.bf16.msra.mxu1 %v3333_v20  ;;  %v3354_v20 = vld [vmem:[#allocation10 + $0x1e0] ss:$12 sps:$4 sm:$0xff]  }
  0xcb   :  { %3103 = vmatprep.subr.bf16.mxu1 %v3337_v22 }
  0xcc   :  { %1320 = vmatpush1.bf16.msra.mxu0 %v3329_v19 }
  0xcd   :  { %1330 = vmatprep.subr.bf16.mxu0 %v3336_v21  ;;  %v3358_v21 = vld [vmem:[#allocation10 + $0x1e8] ss:$12 sps:$4 sm:$0xff]  }
 0x158   :  { %v228_v35 = vpop.f32.mrb[0].mxu1 }
 0x159   :  { %v230_v39 = vpop.f32.mrb[1].mxu1 }
 0x15a   :  { %v436_v36 = vpop.f32.mrb[0].mxu0  ;;  %v232_v42 = vpop.f32.mrb[2].mxu1 }
 0x15b   :  { %v437_v38 = vadd.f32 %v436_v36, %v228_v35  ;;  %v438_v40 = vpop.f32.mrb[1].mxu0  ;;  %v233_v45 = vpop.f32.mrb[3].mxu1  ;;  %v3359_v35 = vld [vmem:[#allocation10 + $0x1f8] ss:$12 sps:$4 sm:$0xff]   ;;  %v3363_v36 = vld [vmem:[#allocation10 + $0x200] ss:$12 sps:$4 sm:$0xff]  }
 0x15c   :  { %v439_v41 = vadd.f32 %v438_v40, %v230_v39  ;;  %v440_v43 = vpop.f32.mrb[2].mxu0  ;;  %v3367_v39 = vld [vmem:[#allocation10 + $0x2d8] ss:$12 sps:$4 sm:$0xff]   ;;  %v591_v40 = vrot.slane %v3961_v26, %v590_v28  ;;  %v3409_v28 = vld [vmem:[#allocation11 + $0x7c] ss:$12 sps:$4 sm:$0xff]  }
 0x15d   :  { %v608_v44 = vadd.f32 %v571_v34, %v437_v38  ;;  %v441_v46 = vpop.f32.mrb[3].mxu0  ;;  %v3990_v34 = vsub.s32 2, %v3955_v24  ;;  %v3366_v38 = vld [vmem:[#allocation10 + $0x214] ss:$12 sps:$4 sm:$0xff]   ;;  %v3368_v45 = vld [vmem:[#allocation10 + $0x218] ss:$12 sps:$4 sm:$0xff]  }
 0x15e   :  { %v609_v47 = vadd.f32 %v575_v37, %v439_v41  ;;  %v582_v37 = vsub.s32 3, %v3955_v24  ;;  %v3371_v24 = vld [vmem:[#allocation10 + $0x22c] ss:$12 sps:$4 sm:$0xff]  }
 0x15f   :  { %v616_v48 = vmax.f32 %v608_v44, 0.0  ;;  %v579_v41 = vrot.slane %v3961_v26, %v3990_v34  ;;  %v3364_v44 = vld [vmem:[#allocation10 + $0x210] ss:$12 sps:$4 sm:$0xff]  }
 0x160   :  { %v617_v49 = vmax.f32 %v609_v47, 0.0  ;;  %v3982_v51 = vpop.f32.mrb[4].mxu1  ;;  %v583_v43 = vrot.slane %v3961_v26, %v582_v37  ;;  %v3373_v26 = vld [vmem:[#allocation10 + $0x230] ss:$12 sps:$4 sm:$0xff]   ;;  %v3415_v37 = vld [vmem:[#allocation11 + $0x94] ss:$12 sps:$4 sm:$0xff]  }
 0x161   :  { %v624_v55 = vpack.c.bf16 %v616_v48, %v616_v48  ;;  %v3984_v56 = vpop.f32.mrb[5].mxu1  ;;  %v3372_v48 = vld [vmem:[#allocation10 + $0x2f0] ss:$12 sps:$4 sm:$0xff]  }
 0x162   :  { %v625_v50 = vpack.c.bf16 %v617_v49, %v617_v49  ;;  %v518_v54 = vpop.f32.mrb[4].mxu0  ;;  %v273_v60 = vpop.f32.mrb[6].mxu1 }
 0x163   :  { %v520_v59 = vpop.f32.mrb[5].mxu0  ;;  %v274_v62 = vpop.f32.mrb[7].mxu1 }
 0x164   :  { %1321 = vmatprep.mubr.bf16.mxu0 %v625_v50  ;;  %1403 = vmatprep.mubr.bf16.mxu1 %v625_v50  ;;  %v522_v61 = vpop.f32.mrb[6].mxu0 }
 0x165   :  { %1322 = vmatmul.mubr.bf16.vlgmr.msra.gmra.mrb[8].mxu0 %v624_v55  ;;  %1404 = vmatmul.mubr.bf16.vlgmr.msra.gmra.mrb[24].mxu1 %v624_v55  ;;  %v523_v63 = vpop.f32.mrb[7].mxu0 }
 0x166   :  { %1331 = vmatpush1.bf16.msra.mxu0 %v3334_v52  ;;  %3104 = vmatpush3.bf16.msra.mxu1 %v3338_v53  ;;  %v3374_v63 = vld [vmem:[#allocation10 + $0x240] ss:$12 sps:$4 sm:$0xff]  }
 0x167   :  { %1332 = vmatprep.subr.bf16.mxu0 %v3341_v57  ;;  %3105 = vmatprep.subr.bf16.mxu1 %v3342_v58  ;;  %v3369_v57 = vld [vmem:[#allocation10 + $0x228] ss:$12 sps:$4 sm:$0xff]  }
 0x168   :  { %v310_v4 = vpop.f32.mrb[8].mxu1 }
 0x169   :  { %v519_v7 = vadd.f32 %v518_v54, %v310_v4  ;;  %v312_v8 = vpop.f32.mrb[9].mxu1  ;;  %v3382_v4 = vld [vmem:[#allocation10 + $0x25c] ss:$12 sps:$4 sm:$0xff]  }
 0x16a   :  { %1333 = vmatpush1.bf16.msra.mxu0 %v3339_v0  ;;  %3106 = vmatpush3.bf16.msra.mxu1 %v3343_v1  ;;  %v521_v11 = vadd.f32 %v520_v59, %v312_v8  ;;  %v314_v12 = vpop.f32.mrb[10].mxu1  ;;  %v3379_v59 = vld [vmem:[#allocation11 + $0x4] ss:$12 sps:$4 sm:$0xff]   ;;  %v3377_v0 = vld [vmem:[#allocation11] ss:$12 sps:$4 sm:$0xff]  }
 0x16b   :  { %1334 = vmatprep.subr.bf16.mxu0 %v3346_v2  ;;  %3107 = vmatprep.subr.bf16.mxu1 %v3347_v3  ;;  %v3986_v13 = vadd.f32 %v587_v27, %v519_v7  ;;  %v315_v14 = vpop.f32.mrb[11].mxu1  ;;  %v3380_v12 = vld [vmem:[#allocation10 + $0x258] ss:$12 sps:$4 sm:$0xff]  }
 0x16c   :  { %v613_v52 = vadd.f32 %v591_v40, %v521_v11  ;;  %v3383_v14 = vld [vmem:[#allocation11 + $0x18] ss:$12 sps:$4 sm:$0xff]  }
 0x16d   :  { %v3418_v40 = vld [vmem:[#allocation10 + $0x2ec] ss:$12 sps:$4 sm:$0xff]  }
 0x16e   :  { %1335 = vmatpush1.bf16.msra.mxu0 %v3344_v5  ;;  %3108 = vmatpush3.bf16.msra.mxu1 %v3348_v6  ;;  %v621_v61 = vmax.f32 %v613_v52, 0.0  ;;  %v3385_v6 = vld [vmem:[#allocation11 + $0x1c] ss:$12 sps:$4 sm:$0xff]   ;;  %v3434_v52 = vld [vmem:[#allocation11 + $0xf4] ss:$12 sps:$4 sm:$0xff]  }
 0x16f   :  { %1336 = vmatprep.subr.bf16.mxu0 %v3351_v9  ;;  %3109 = vmatprep.subr.bf16.mxu1 %v3352_v10 }
 0x170   :  { %v351_v19 = vpop.f32.mrb[12].mxu1  ;;  %v4001_v8 = vpack.c.bf16 %v621_v61, %v621_v61  ;;  %v3442_v61 = vld [vmem:[#allocation11 + $0x120] ss:$12 sps:$4 sm:$0xff]  }
 0x171   :  { %v353_v22 = vpop.f32.mrb[13].mxu1 }
 0x172   :  { %1337 = vmatpush1.bf16.msra.mxu0 %v3349_v15  ;;  %3110 = vmatpush3.bf16.msra.mxu1 %v3353_v16  ;;  %v355_v27 = vpop.f32.mrb[14].mxu1  ;;  %v3388_v15 = vld [vmem:[#allocation10 + $0x274] ss:$12 sps:$4 sm:$0xff]  }
 0x173   :  { %1338 = vmatprep.subr.bf16.mxu0 %v3356_v17  ;;  %3111 = vmatprep.subr.bf16.mxu1 %v3357_v18  ;;  %v356_v29 = vpop.f32.mrb[15].mxu1  ;;  %v3391_v16 = vld [vmem:[#allocation11 + $0x34] ss:$12 sps:$4 sm:$0xff]   ;;  %v3389_v17 = vld [vmem:[#allocation11 + $0x30] ss:$12 sps:$4 sm:$0xff]  }
 0x174   :  { %v3394_v18 = vld [vmem:[#allocation10 + $0x28c] ss:$12 sps:$4 sm:$0xff]   ;;  %v3406_v27 = vld [vmem:[#allocation10 + $0x2bc] ss:$12 sps:$4 sm:$0xff]  }
 0x175   :  { %v3404_v29 = vld [vmem:[#allocation10 + $0x2b8] ss:$12 sps:$4 sm:$0xff]  }
 0x176   :  { %1339 = vmatpush1.bf16.msra.mxu0 %v3354_v20  ;;  %3112 = vmatpush3.bf16.msra.mxu1 %v3358_v21  ;;  %v3395_v20 = vld [vmem:[#allocation11 + $0x48] ss:$12 sps:$4 sm:$0xff]   ;;  %v3400_v21 = vld [vmem:[#allocation10 + $0x2a4] ss:$12 sps:$4 sm:$0xff]  }
 0x177   :  { %1340 = vmatprep.subr.bf16.mxu0 %v3361_v23  ;;  %3113 = vmatprep.subr.bf16.mxu1 %v3362_v25  ;;  %v3398_v23 = vld [vmem:[#allocation10 + $0x2a0] ss:$12 sps:$4 sm:$0xff]  }
 0x178   :  { %v477_v42 = vpop.f32.mrb[16].mxu1  ;;  %v3401_v25 = vld [vmem:[#allocation11 + $0x60] ss:$12 sps:$4 sm:$0xff]  }
 0x179   :  { %v478_v46 = vadd.f32 %v477_v42, %v3982_v51  ;;  %v479_v47 = vpop.f32.mrb[17].mxu1  ;;  %v3376_v51 = vld [vmem:[#allocation10 + $0x244] ss:$12 sps:$4 sm:$0xff]   ;;  %v3416_v42 = vld [vmem:[#allocation10 + $0x2e8] ss:$12 sps:$4 sm:$0xff]  }
 0x17a   :  { %1341 = vmatpush1.bf16.msra.mxu0 %v3359_v35  ;;  %3114 = vmatpush3.bf16.msra.mxu1 %v3363_v36  ;;  %v480_v49 = vadd.f32 %v479_v47, %v3984_v56  ;;  %v481_v50 = vpop.f32.mrb[18].mxu1  ;;  %v3407_v35 = vld [vmem:[#allocation11 + $0x78] ss:$12 sps:$4 sm:$0xff]   ;;  %v3412_v36 = vld [vmem:[#allocation10 + $0x2d4] ss:$12 sps:$4 sm:$0xff]  }
 0x17b   :  { %1342 = vmatprep.subr.bf16.mxu0 %v3366_v38  ;;  %3115 = vmatprep.subr.bf16.mxu1 %v3367_v39  ;;  %v610_v53 = vadd.f32 %v579_v41, %v478_v46  ;;  %v482_v54 = vpop.f32.mrb[19].mxu1  ;;  %v3410_v38 = vld [vmem:[#allocation10 + $0x2d0] ss:$12 sps:$4 sm:$0xff]   ;;  %v3421_v41 = vld [vmem:[#allocation11 + $0xac] ss:$12 sps:$4 sm:$0xff]  }
 0x17c   :  { %v611_v55 = vadd.f32 %v583_v43, %v480_v49  ;;  %v3413_v39 = vld [vmem:[#allocation11 + $0x90] ss:$12 sps:$4 sm:$0xff]   ;;  %v3419_v43 = vld [vmem:[#allocation11 + $0xa8] ss:$12 sps:$4 sm:$0xff]   ;;  %v3422_v46 = vld [vmem:[#allocation11 + $0xc0] ss:$12 sps:$4 sm:$0xff]  }
 0x17d   :  { %v618_v58 = vmax.f32 %v610_v53, 0.0  ;;  %v3426_v47 = vld [vmem:[#allocation11 + $0x8] ss:$12 sps:$4 sm:$0xff]   ;;  %v3427_v49 = vld [vmem:[#allocation11 + $0xd8] ss:$12 sps:$4 sm:$0xff]  }
 0x17e   :  { %1343 = vmatpush1.bf16.msra.mxu0 %v3364_v44  ;;  %3116 = vmatpush3.bf16.msra.mxu1 %v3368_v45  ;;  %v619_v60 = vmax.f32 %v611_v55, 0.0  ;;  %v3424_v44 = vld [vmem:[#allocation11 + $0xc4] ss:$12 sps:$4 sm:$0xff]   ;;  %v3425_v45 = vld [vmem:[#allocation11 + $0xc8] ss:$12 sps:$4 sm:$0xff]  }
 0x17f   :  { %1344 = vmatprep.subr.bf16.mxu0 %v3371_v24  ;;  %3117 = vmatprep.subr.bf16.mxu1 %v3372_v48  ;;  %v3999_v1 = vpack.c.bf16 %v618_v58, %v618_v58  ;;  %v3429_v24 = vld [vmem:[#allocation11 + $0xdc] ss:$12 sps:$4 sm:$0xff]   ;;  %v3430_v48 = vld [vmem:[#allocation11 + $0xe0] ss:$12 sps:$4 sm:$0xff]   ;;  %v3435_v53 = vld [vmem:[#allocation11 + $0xf8] ss:$12 sps:$4 sm:$0xff]  }
 0x180   :  { %v627_v62 = vpack.c.bf16 %v619_v60, %v619_v60  ;;  %v559_v56 = vpop.f32.mrb[20].mxu1  ;;  %v3431_v50 = vld [vmem:[#allocation11 + $0x20] ss:$12 sps:$4 sm:$0xff]   ;;  %v3432_v54 = vld [vmem:[#allocation11 + $0xf0] ss:$12 sps:$4 sm:$0xff]  }
 0x181   :  { %v560_v2 = vadd.f32 %v559_v56, %v351_v19  ;;  %v561_v3 = vpop.f32.mrb[21].mxu1  ;;  %v3397_v19 = vld [vmem:[#allocation11 + $0x4c] ss:$12 sps:$4 sm:$0xff]   ;;  %v3437_v58 = vld [vmem:[#allocation11 + $0x108] ss:$12 sps:$4 sm:$0xff]  }
 0x182   :  { %1345 = vmatpush1.bf16.msra.mxu0 %v3369_v57  ;;  %3118 = vmatpush3.bf16.msra.mxu1 %v3373_v26  ;;  %v562_v5 = vadd.f32 %v561_v3, %v353_v22  ;;  %v563_v7 = vpop.f32.mrb[22].mxu1  ;;  %v3403_v22 = vld [vmem:[#allocation11 + $0x64] ss:$12 sps:$4 sm:$0xff]   ;;  %v3439_v57 = vld [vmem:[#allocation11 + $0x10c] ss:$12 sps:$4 sm:$0xff]  }
 0x183   :  { %1346 = vmatprep.subr.bf16.mxu0 %v3376_v51  ;;  %2114 = vmatprep.subr.bf16.mxu1 %v3379_v59  ;;  %v4004_v9 = vadd.f32 %v3967_v30, %v560_v2  ;;  %v564_v10 = vpop.f32.mrb[23].mxu1  ;;  %v3386_v30 = vld [vmem:[#allocation10 + $0x270] ss:$12 sps:$4 sm:$0xff]   ;;  %v3436_v55 = vld [vmem:[#allocation11 + $0x38] ss:$12 sps:$4 sm:$0xff]  }
 0x184   :  { %1362 = vmatprep.mubr.bf16.mxu0 %v627_v62  ;;  %1443 = vmatprep.mubr.bf16.mxu1 %v627_v62  ;;  %v4008_v11 = vadd.f32 %v3970_v31, %v562_v5  ;;  %v3392_v31 = vld [vmem:[#allocation10 + $0x288] ss:$12 sps:$4 sm:$0xff]   ;;  %v3440_v26 = vld [vmem:[#allocation11 + $0x110] ss:$12 sps:$4 sm:$0xff]   ;;  %v3455_v3 = vld [vmem:[#allocation11 + $0x158] ss:$12 sps:$4 sm:$0xff]  }
 0x185   :  { %1444 = vmatmul.mubr.bf16.vlgmr.msra.gmra.mrb[28].mxu1 %v3999_v1  ;;  %v3441_v51 = vld [vmem:[#allocation11 + $0x50] ss:$12 sps:$4 sm:$0xff]   ;;  %v3445_v60 = vld [vmem:[#allocation11 + $0x128] ss:$12 sps:$4 sm:$0xff]   ;;  %v3456_v5 = vld [vmem:[#allocation11 + $0x98] ss:$12 sps:$4 sm:$0xff]  }
 0x186   :  { %1347 = vmatpush1.bf16.msra.mxu0 %v3374_v63  ;;  %2115 = vmatpush1.bf16.msra.mxu1 %v3377_v0  ;;  %v3444_v59 = vld [vmem:[#allocation11 + $0x124] ss:$12 sps:$4 sm:$0xff]   ;;  %v3446_v62 = vld [vmem:[#allocation11 + $0x68] ss:$12 sps:$4 sm:$0xff]   ;;  %v3450_v63 = vld [vmem:[#allocation11 + $0x140] ss:$12 sps:$4 sm:$0xff]  }
 0x187   :  { %2146 = vmatprep.mubr.bf16.mxu1 %v4001_v8  ;;  %1348 = vmatprep.subr.bf16.mxu0 %v3382_v4  ;;  %v3449_v56 = vld [vmem:[#allocation11 + $0x13c] ss:$12 sps:$4 sm:$0xff]   ;;  %v3447_v0 = vld [vmem:[#allocation11 + $0x138] ss:$12 sps:$4 sm:$0xff]   ;;  %v3454_v2 = vld [vmem:[#allocation11 + $0x154] ss:$12 sps:$4 sm:$0xff]  }
 0x188   :  { %2116 = vmatprep.subr.bf16.mxu1 %v3385_v6  ;;  %v3452_v4 = vld [vmem:[#allocation11 + $0x150] ss:$12 sps:$4 sm:$0xff]   ;;  %v3459_v6 = vld [vmem:[#allocation11 + $0x16c] ss:$12 sps:$4 sm:$0xff]  }
 0x189   :  { %v3460_v7 = vld [vmem:[#allocation11 + $0x170] ss:$12 sps:$4 sm:$0xff]  }
 0x18a   :  { %1349 = vmatpush1.bf16.msra.mxu0 %v3380_v12  ;;  %2117 = vmatpush1.bf16.msra.mxu1 %v3383_v14  ;;  %v3461_v10 = vld [vmem:[#allocation11 + $0xb0] ss:$12 sps:$4 sm:$0xff]   ;;  %v620_v12 = vmax.f32 %v3986_v13, 0.0  ;;  %v3467_v13 = vld [vmem:[#allocation11 + $0x198] ss:$12 sps:$4 sm:$0xff]  }
 0x18b   :  { %1350 = vmatprep.subr.bf16.mxu0 %v3388_v15  ;;  %2118 = vmatprep.subr.bf16.mxu1 %v3391_v16  ;;  %v3464_v14 = vld [vmem:[#allocation11 + $0x184] ss:$12 sps:$4 sm:$0xff]   ;;  %v3465_v15 = vld [vmem:[#allocation11 + $0x248] ss:$12 sps:$4 sm:$0xff]   ;;  %v623_v16 = vmax.f32 %v4008_v11, 0.0 }
 0x18c   :  { %v3475_v11 = vld [vmem:[#allocation11 + $0x278] ss:$12 sps:$4 sm:$0xff]  }
 0x18e   :  { %1351 = vmatpush1.bf16.msra.mxu0 %v3386_v30  ;;  %2119 = vmatpush1.bf16.msra.mxu1 %v3389_v17  ;;  %v3462_v30 = vld [vmem:[#allocation11 + $0x180] ss:$12 sps:$4 sm:$0xff]   ;;  %v628_v17 = vpack.c.bf16 %v620_v12, %v620_v12 }
 0x18f   :  { %1352 = vmatprep.subr.bf16.mxu0 %v3394_v18  ;;  %2120 = vmatprep.subr.bf16.mxu1 %v3397_v19  ;;  %v3466_v18 = vld [vmem:[#allocation11 + $0x188] ss:$12 sps:$4 sm:$0xff]   ;;  %v631_v19 = vpack.c.bf16 %v623_v16, %v623_v16  ;;  %v3520_v16 = vld [vmem:[#allocation11 + $0x2d0] ss:$12 sps:$4 sm:$0xff]  }
 0x190   :  { %v3522_v12 = vld [vmem:[#allocation11 + $0x2d4] ss:$12 sps:$4 sm:$0xff]  }
 0x192   :  { %1353 = vmatpush1.bf16.msra.mxu0 %v3392_v31  ;;  %2121 = vmatpush1.bf16.msra.mxu1 %v3395_v20  ;;  %v3469_v31 = vld [vmem:[#allocation11 + $0x19c] ss:$12 sps:$4 sm:$0xff]   ;;  %v3470_v20 = vld [vmem:[#allocation11 + $0x260] ss:$12 sps:$4 sm:$0xff]  }
 0x193   :  { %1354 = vmatprep.subr.bf16.mxu0 %v3400_v21  ;;  %2122 = vmatprep.subr.bf16.mxu1 %v3403_v22  ;;  %v3471_v21 = vld [vmem:[#allocation11 + $0x1a0] ss:$12 sps:$4 sm:$0xff]  }
 0x194   :  { %v3474_v22 = vld [vmem:[#allocation11 + $0x1b4] ss:$12 sps:$4 sm:$0xff]  }
 0x196   :  { %1355 = vmatpush1.bf16.msra.mxu0 %v3398_v23  ;;  %2123 = vmatpush1.bf16.msra.mxu1 %v3401_v25  ;;  %v3472_v23 = vld [vmem:[#allocation11 + $0x1b0] ss:$12 sps:$4 sm:$0xff]   ;;  %v3476_v25 = vld [vmem:[#allocation11 + $0x1b8] ss:$12 sps:$4 sm:$0xff]  }
 0x197   :  { %1356 = vmatprep.subr.bf16.mxu0 %v3406_v27  ;;  %2124 = vmatprep.subr.bf16.mxu1 %v3409_v28  ;;  %v3479_v27 = vld [vmem:[#allocation11 + $0x1cc] ss:$12 sps:$4 sm:$0xff]   ;;  %v3480_v28 = vld [vmem:[#allocation11 + $0x290] ss:$12 sps:$4 sm:$0xff]  }
 0x19a   :  { %1357 = vmatpush1.bf16.msra.mxu0 %v3404_v29  ;;  %2125 = vmatpush1.bf16.msra.mxu1 %v3407_v35  ;;  %v3477_v29 = vld [vmem:[#allocation11 + $0x1c8] ss:$12 sps:$4 sm:$0xff]   ;;  %v3481_v35 = vld [vmem:[#allocation11 + $0x1d0] ss:$12 sps:$4 sm:$0xff]  }
 0x19b   :  { %1358 = vmatprep.subr.bf16.mxu0 %v3412_v36  ;;  %2126 = vmatprep.subr.bf16.mxu1 %v3415_v37  ;;  %v3484_v36 = vld [vmem:[#allocation11 + $0x1e4] ss:$12 sps:$4 sm:$0xff]   ;;  %v3485_v37 = vld [vmem:[#allocation11 + $0x2a8] ss:$12 sps:$4 sm:$0xff]  }
 0x19e   :  { %1359 = vmatpush1.bf16.msra.mxu0 %v3410_v38  ;;  %2127 = vmatpush1.bf16.msra.mxu1 %v3413_v39  ;;  %v3482_v38 = vld [vmem:[#allocation11 + $0x1e0] ss:$12 sps:$4 sm:$0xff]   ;;  %v3486_v39 = vld [vmem:[#allocation11 + $0x1e8] ss:$12 sps:$4 sm:$0xff]  }
 0x19f   :  { %1360 = vmatprep.subr.bf16.mxu0 %v3418_v40  ;;  %2128 = vmatprep.subr.bf16.mxu1 %v3421_v41  ;;  %v3489_v40 = vld [vmem:[#allocation11 + $0x1fc] ss:$12 sps:$4 sm:$0xff]   ;;  %v3490_v41 = vld [vmem:[#allocation11 + $0x2c0] ss:$12 sps:$4 sm:$0xff]  }
 0x1a2   :  { %1361 = vmatpush1.bf16.msra.mxu0 %v3416_v42  ;;  %2129 = vmatpush1.bf16.msra.mxu1 %v3419_v43  ;;  %v3487_v42 = vld [vmem:[#allocation11 + $0x1f8] ss:$12 sps:$4 sm:$0xff]   ;;  %v3491_v43 = vld [vmem:[#allocation11 + $0x200] ss:$12 sps:$4 sm:$0xff]  }
 0x1a3   :  { %2130 = vmatprep.subr.bf16.mxu1 %v3424_v44  ;;  %3125 = vmatprep.subr.bf16.mxu0 %v3425_v45  ;;  %v3494_v44 = vld [vmem:[#allocation11 + $0x214] ss:$12 sps:$4 sm:$0xff]   ;;  %v3495_v45 = vld [vmem:[#allocation11 + $0x2d8] ss:$12 sps:$4 sm:$0xff]  }
 0x1a5   :  { %1363 = vmatmul.mubr.bf16.vlgmr.msra.gmra.mrb[8].mxu0 %v3999_v1  ;;  %v3451_v1 = vld [vmem:[#allocation11 + $0x80] ss:$12 sps:$4 sm:$0xff]  }
 0x1a6   :  { %2131 = vmatpush1.bf16.msra.mxu1 %v3422_v46  ;;  %3126 = vmatpush3.bf16.msra.mxu0 %v3426_v47  ;;  %v3492_v46 = vld [vmem:[#allocation11 + $0x210] ss:$12 sps:$4 sm:$0xff]   ;;  %v3496_v47 = vld [vmem:[#allocation11 + $0x218] ss:$12 sps:$4 sm:$0xff]  }
 0x1a7   :  { %2228 = vmatprep.mubr.bf16.mxu0 %v4001_v8  ;;  %2132 = vmatprep.subr.bf16.mxu1 %v3429_v24  ;;  %v3457_v8 = vld [vmem:[#allocation11 + $0x168] ss:$12 sps:$4 sm:$0xff]   ;;  %v3499_v24 = vld [vmem:[#allocation11 + $0x22c] ss:$12 sps:$4 sm:$0xff]  }
 0x1a8   :  { %3127 = vmatprep.subr.bf16.mxu0 %v3430_v48  ;;  %v3500_v48 = vld [vmem:[#allocation11 + $0x2f0] ss:$12 sps:$4 sm:$0xff]  }
 0x1aa   :  { %2133 = vmatpush1.bf16.msra.mxu1 %v3427_v49  ;;  %3128 = vmatpush3.bf16.msra.mxu0 %v3431_v50  ;;  %v3497_v49 = vld [vmem:[#allocation11 + $0x228] ss:$12 sps:$4 sm:$0xff]   ;;  %v3501_v50 = vld [vmem:[#allocation11 + $0x230] ss:$12 sps:$4 sm:$0xff]  }
 0x1ab   :  { %2134 = vmatprep.subr.bf16.mxu1 %v3434_v52  ;;  %3129 = vmatprep.subr.bf16.mxu0 %v3435_v53  ;;  %v3504_v52 = vld [vmem:[#allocation11 + $0x244] ss:$12 sps:$4 sm:$0xff]   ;;  %v622_v53 = vmax.f32 %v4004_v9, 0.0 }
 0x1ac   :  { %v3530_v9 = vld [vmem:[#allocation13 + $0x50] sm:$0xff]  }
 0x1ae   :  { %2135 = vmatpush1.bf16.msra.mxu1 %v3432_v54  ;;  %3130 = vmatpush3.bf16.msra.mxu0 %v3436_v55  ;;  %v3526_v54 = vld [vmem:[#allocation13 + $0x40] sm:$0xff]  }
 0x1af   :  { %2136 = vmatprep.subr.bf16.mxu1 %v3439_v57  ;;  %3131 = vmatprep.subr.bf16.mxu0 %v3440_v26  ;;  %v3502_v55 = vld [vmem:[#allocation11 + $0x240] ss:$12 sps:$4 sm:$0xff]   ;;  %v3507_v57 = vld [vmem:[#allocation11 + $0x25c] ss:$12 sps:$4 sm:$0xff]  }
 0x1b0   :  { %v3527_v26 = vld [vmem:[#allocation13] sm:$0xff]  }
 0x1b2   :  { %2137 = vmatpush1.bf16.msra.mxu1 %v3437_v58  ;;  %3132 = vmatpush3.bf16.msra.mxu0 %v3441_v51  ;;  %v630_v58 = vpack.c.bf16 %v622_v53, %v622_v53  ;;  %v3528_v51 = vld [vmem:[#allocation13 + $0x48] sm:$0xff]   ;;  %v3570_v53 = vld [vmem:[#allocation13 + $0xf8] sm:$0xff]  }
 0x1b3   :  { %2138 = vmatprep.subr.bf16.mxu1 %v3444_v59  ;;  %3133 = vmatprep.subr.bf16.mxu0 %v3445_v60  ;;  %v3505_v59 = vld [vmem:[#allocation11 + $0x258] ss:$12 sps:$4 sm:$0xff]   ;;  %v3510_v60 = vld [vmem:[#allocation11 + $0x274] ss:$12 sps:$4 sm:$0xff]  }
 0x1b6   :  { %2139 = vmatpush1.bf16.msra.mxu1 %v3442_v61  ;;  %3134 = vmatpush3.bf16.msra.mxu0 %v3446_v62  ;;  %v3529_v61 = vld [vmem:[#allocation13 + $0x8] sm:$0xff]   ;;  %v3508_v62 = vld [vmem:[#allocation11 + $0x270] ss:$12 sps:$4 sm:$0xff]  }
 0x1b7   :  { %2140 = vmatprep.subr.bf16.mxu1 %v3449_v56  ;;  %3135 = vmatprep.subr.bf16.mxu0 %v3450_v63  ;;  %v3513_v56 = vld [vmem:[#allocation11 + $0x28c] ss:$12 sps:$4 sm:$0xff]   ;;  %v3531_v63 = vld [vmem:[#allocation13 + $0x10] sm:$0xff]  }
 0x1ba   :  { %2141 = vmatpush1.bf16.msra.mxu1 %v3447_v0  ;;  %3136 = vmatpush3.bf16.msra.mxu0 %v3451_v1  ;;  %v3532_v0 = vld [vmem:[#allocation13 + $0x58] sm:$0xff]   ;;  %v3511_v1 = vld [vmem:[#allocation11 + $0x288] ss:$12 sps:$4 sm:$0xff]  }
 0x1bb   :  { %2142 = vmatprep.subr.bf16.mxu1 %v3454_v2  ;;  %3137 = vmatprep.subr.bf16.mxu0 %v3455_v3  ;;  %v3516_v2 = vld [vmem:[#allocation11 + $0x2a4] ss:$12 sps:$4 sm:$0xff]   ;;  %v3533_v3 = vld [vmem:[#allocation13 + $0x18] sm:$0xff]  }
 0x1be   :  { %2143 = vmatpush1.bf16.msra.mxu1 %v3452_v4  ;;  %3138 = vmatpush3.bf16.msra.mxu0 %v3456_v5  ;;  %v3534_v4 = vld [vmem:[#allocation13 + $0x60] sm:$0xff]  }
 0x1bf   :  { %2144 = vmatprep.subr.bf16.mxu1 %v3459_v6  ;;  %3139 = vmatprep.subr.bf16.mxu0 %v3460_v7  ;;  %v3514_v5 = vld [vmem:[#allocation11 + $0x2a0] ss:$12 sps:$4 sm:$0xff]   ;;  %v3519_v6 = vld [vmem:[#allocation11 + $0x2bc] ss:$12 sps:$4 sm:$0xff]  }
 0x1c0   :  { %v3535_v7 = vld [vmem:[#allocation13 + $0x20] sm:$0xff]  }
 0x1c2   :  { %2145 = vmatpush1.bf16.msra.mxu1 %v3457_v8  ;;  %3140 = vmatpush3.bf16.msra.mxu0 %v3461_v10  ;;  %v3536_v8 = vld [vmem:[#allocation13 + $0x68] sm:$0xff]   ;;  %v3517_v10 = vld [vmem:[#allocation11 + $0x2b8] ss:$12 sps:$4 sm:$0xff]  }
 0x1c3   :  { %2155 = vmatprep.subr.bf16.mxu1 %v3464_v14  ;;  %3147 = vmatprep.subr.bf16.mxu0 %v3465_v15  ;;  %v3537_v14 = vld [vmem:[#allocation13 + $0x28] sm:$0xff]   ;;  %v3538_v15 = vld [vmem:[#allocation13 + $0x70] sm:$0xff]  }
 0x1c5   :  { %2147 = vmatmul.mubr.bf16.vlgmr.msra.gmra.mrb[32].mxu1 %v628_v17  ;;  %2229 = vmatmul.mubr.bf16.vlgmr.msra.gmra.mrb[12].mxu0 %v628_v17  ;;  %v3539_v17 = vld [vmem:[#allocation13 + $0x30] sm:$0xff]  }
 0x1c6   :  { %2156 = vmatpush1.bf16.msra.mxu1 %v3462_v30  ;;  %2187 = vmatprep.mubr.bf16.mxu1 %v631_v19  ;;  %v3525_v30 = vld [vmem:[#allocation11 + $0x2ec] ss:$12 sps:$4 sm:$0xff]  }
 0x1c7   :  { %3148 = vmatpush3.bf16.msra.mxu0 %v3466_v18  ;;  %2268 = vmatprep.mubr.bf16.mxu0 %v631_v19  ;;  %v3540_v18 = vld [vmem:[#allocation13 + $0x78] sm:$0xff]   ;;  %v3523_v19 = vld [vmem:[#allocation11 + $0x2e8] ss:$12 sps:$4 sm:$0xff]  }
 0x1c8   :  { %2157 = vmatprep.subr.bf16.mxu1 %v3469_v31  ;;  %3149 = vmatprep.subr.bf16.mxu0 %v3470_v20  ;;  %v3541_v31 = vld [vmem:[#allocation13 + $0x38] sm:$0xff]   ;;  %v760_v20 = vld [vmem:[%s4052_s6] sm:$0x7] }
 0x1ca   :  { %2158 = vmatpush1.bf16.msra.mxu1 %v3467_v13 }
 0x1cb   :  { %3150 = vmatpush3.bf16.msra.mxu0 %v3471_v21  ;;  %2159 = vmatprep.subr.bf16.mxu1 %v3474_v22  ;;  %v773_v21 = vrot.slane %v760_v20, %v3990_v34 }
 0x1cc   :  { %3151 = vmatprep.subr.bf16.mxu0 %v3475_v11 }
 0x1ce   :  { %2160 = vmatpush1.bf16.msra.mxu1 %v3472_v23 }
 0x1cf   :  { %3152 = vmatpush3.bf16.msra.mxu0 %v3476_v25  ;;  %2161 = vmatprep.subr.bf16.mxu1 %v3479_v27 }
 0x1d0   :  { %3153 = vmatprep.subr.bf16.mxu0 %v3480_v28  ;;  %v3542_v28 = vld [vmem:[#allocation13 + $0xc0] sm:$0xff]  }
 0x1d2   :  { %2162 = vmatpush1.bf16.msra.mxu1 %v3477_v29  ;;  %v3543_v29 = vld [vmem:[#allocation13 + $0x140] sm:$0xff]  }
 0x1d3   :  { %3154 = vmatpush3.bf16.msra.mxu0 %v3481_v35  ;;  %2163 = vmatprep.subr.bf16.mxu1 %v3484_v36  ;;  %v3544_v35 = vld [vmem:[#allocation13 + $0x80] sm:$0xff]   ;;  %v3546_v36 = vld [vmem:[#allocation13 + $0xc8] sm:$0xff]  }
 0x1d4   :  { %3155 = vmatprep.subr.bf16.mxu0 %v3485_v37  ;;  %v3548_v37 = vld [vmem:[#allocation13 + $0x88] sm:$0xff]  }
 0x1d6   :  { %2164 = vmatpush1.bf16.msra.mxu1 %v3482_v38  ;;  %v3550_v38 = vld [vmem:[#allocation13 + $0xd0] sm:$0xff]  }
 0x1d7   :  { %3156 = vmatpush3.bf16.msra.mxu0 %v3486_v39  ;;  %2165 = vmatprep.subr.bf16.mxu1 %v3489_v40  ;;  %v3552_v39 = vld [vmem:[#allocation13 + $0x90] sm:$0xff]   ;;  %v3554_v40 = vld [vmem:[#allocation13 + $0xd8] sm:$0xff]  }
 0x1d8   :  { %3157 = vmatprep.subr.bf16.mxu0 %v3490_v41  ;;  %v3556_v41 = vld [vmem:[#allocation13 + $0x98] sm:$0xff]  }
 0x1da   :  { %2166 = vmatpush1.bf16.msra.mxu1 %v3487_v42  ;;  %v3558_v42 = vld [vmem:[#allocation13 + $0xe0] sm:$0xff]  }
 0x1db   :  { %3158 = vmatpush3.bf16.msra.mxu0 %v3491_v43  ;;  %2167 = vmatprep.subr.bf16.mxu1 %v3494_v44  ;;  %v3560_v43 = vld [vmem:[#allocation13 + $0xa0] sm:$0xff]   ;;  %v3562_v44 = vld [vmem:[#allocation13 + $0xe8] sm:$0xff]  }
 0x1dc   :  { %3159 = vmatprep.subr.bf16.mxu0 %v3495_v45  ;;  %v3564_v45 = vld [vmem:[#allocation13 + $0xa8] sm:$0xff]  }
 0x1de   :  { %2168 = vmatpush1.bf16.msra.mxu1 %v3492_v46  ;;  %v3566_v46 = vld [vmem:[#allocation13 + $0xf0] sm:$0xff]  }
 0x1df   :  { %3160 = vmatpush3.bf16.msra.mxu0 %v3496_v47  ;;  %2169 = vmatprep.subr.bf16.mxu1 %v3499_v24  ;;  %v3568_v24 = vld [vmem:[#allocation13 + $0xb0] sm:$0xff]  }
 0x1e0   :  { %3161 = vmatprep.subr.bf16.mxu0 %v3500_v48 }
 0x1e2   :  { %2170 = vmatpush1.bf16.msra.mxu1 %v3497_v49 }
 0x1e3   :  { %3162 = vmatpush3.bf16.msra.mxu0 %v3501_v50  ;;  %2171 = vmatprep.subr.bf16.mxu1 %v3504_v52 }
 0x1e4   :  { %3169 = vmatprep.subr.bf16.mxu0 %v3526_v54 }
 0x1e6   :  { %2269 = vmatmul.mubr.bf16.vlgmr.msra.gmra.mrb[16].mxu0 %v630_v58  ;;  %2172 = vmatpush1.bf16.msra.mxu1 %v3502_v55  ;;  %v3572_v55 = vld [vmem:[#allocation13 + $0xb8] sm:$0xff]  }
 0x1e7   :  { %2173 = vmatprep.subr.bf16.mxu1 %v3507_v57  ;;  %3170 = vmatpush3.bf16.msra.mxu0 %v3527_v26  ;;  %v765_v57 = vrot.slane %v760_v20, %v3973_v32  ;;  %v769_v26 = vrot.slane %v760_v20, %v3976_v33  ;;  %v3573_v20 = vld [vmem:[#allocation13 + $0x138] sm:$0xff]  }
 0x1e8   :  { %3171 = vmatprep.subr.bf16.mxu0 %v3528_v51 }
 0x1ea   :  { %2174 = vmatpush1.bf16.msra.mxu1 %v3505_v59 }
 0x1eb   :  { %2175 = vmatprep.subr.bf16.mxu1 %v3510_v60  ;;  %3172 = vmatpush3.bf16.msra.mxu0 %v3529_v61 }
 0x1ec   :  { %3173 = vmatprep.subr.bf16.mxu0 %v3530_v9 }
 0x1ee   :  { %2176 = vmatpush1.bf16.msra.mxu1 %v3508_v62 }
 0x1ef   :  { %2177 = vmatprep.subr.bf16.mxu1 %v3513_v56  ;;  %3174 = vmatpush3.bf16.msra.mxu0 %v3531_v63 }
 0x1f0   :  { %3175 = vmatprep.subr.bf16.mxu0 %v3532_v0  ;;  %v3545_v0 = vld [vmem:[#allocation13 + $0x100] sm:$0xff]  }
 0x1f2   :  { %2178 = vmatpush1.bf16.msra.mxu1 %v3511_v1 }
 0x1f3   :  { %2179 = vmatprep.subr.bf16.mxu1 %v3516_v2  ;;  %3176 = vmatpush3.bf16.msra.mxu0 %v3533_v3  ;;  %v3547_v2 = vld [vmem:[#allocation13 + $0x148] sm:$0xff]  }
 0x1f4   :  { %3177 = vmatprep.subr.bf16.mxu0 %v3534_v4  ;;  %v3549_v3 = vld [vmem:[#allocation13 + $0x108] sm:$0xff]   ;;  %v3551_v4 = vld [vmem:[#allocation13 + $0x150] sm:$0xff]  }
 0x1f6   :  { %2180 = vmatpush1.bf16.msra.mxu1 %v3514_v5  ;;  %v3553_v5 = vld [vmem:[#allocation13 + $0x110] sm:$0xff]  }
 0x1f7   :  { %2181 = vmatprep.subr.bf16.mxu1 %v3519_v6  ;;  %3178 = vmatpush3.bf16.msra.mxu0 %v3535_v7  ;;  %v3555_v6 = vld [vmem:[#allocation13 + $0x158] sm:$0xff]  }
 0x1f8   :  { %3179 = vmatprep.subr.bf16.mxu0 %v3536_v8  ;;  %v3557_v7 = vld [vmem:[#allocation13 + $0x118] sm:$0xff]   ;;  %v3559_v8 = vld [vmem:[#allocation13 + $0x160] sm:$0xff]  }
 0x1fa   :  { %2182 = vmatpush1.bf16.msra.mxu1 %v3517_v10  ;;  %v3561_v10 = vld [vmem:[#allocation13 + $0x120] sm:$0xff]  }
 0x1fb   :  { %2183 = vmatprep.subr.bf16.mxu1 %v3522_v12  ;;  %3180 = vmatpush3.bf16.msra.mxu0 %v3537_v14  ;;  %v3563_v12 = vld [vmem:[#allocation13 + $0x168] sm:$0xff]  }
 0x1fc   :  { %3181 = vmatprep.subr.bf16.mxu0 %v3538_v15  ;;  %v3565_v14 = vld [vmem:[#allocation13 + $0x128] sm:$0xff]   ;;  %v3567_v15 = vld [vmem:[#allocation13 + $0x170] sm:$0xff]  }
 0x1fe   :  { %2184 = vmatpush1.bf16.msra.mxu1 %v3520_v16  ;;  %v3569_v16 = vld [vmem:[#allocation13 + $0x130] sm:$0xff]  }
 0x1ff   :  { %2185 = vmatprep.subr.bf16.mxu1 %v3525_v30  ;;  %3182 = vmatpush3.bf16.msra.mxu0 %v3539_v17  ;;  %v3571_v30 = vld [vmem:[#allocation13 + $0x178] sm:$0xff]  }
 0x200   :  { %3183 = vmatprep.subr.bf16.mxu0 %v3540_v18 }
 0x202   :  { %2186 = vmatpush1.bf16.msra.mxu1 %v3523_v19 }
 0x203   :  { %3184 = vmatpush3.bf16.msra.mxu0 %v3541_v31  ;;  %3191 = vmatprep.subr.bf16.mxu1 %v3542_v28 }
 0x204   :  { %3213 = vmatprep.subr.bf16.mxu0 %v3543_v29 }
 0x205   :  { %2188 = vmatmul.mubr.bf16.vlgmr.msra.gmra.mrb[32].mxu1 %v630_v58 }
 0x206   :  { %3192 = vmatpush3.bf16.msra.mxu1 %v3544_v35 }
 0x207   :  { %3193 = vmatprep.subr.bf16.mxu1 %v3546_v36 }
 0x20a   :  { %3194 = vmatpush3.bf16.msra.mxu1 %v3548_v37 }
 0x20b   :  { %3195 = vmatprep.subr.bf16.mxu1 %v3550_v38 }
 0x20e   :  { %3196 = vmatpush3.bf16.msra.mxu1 %v3552_v39 }
 0x20f   :  { %3197 = vmatprep.subr.bf16.mxu1 %v3554_v40 }
 0x212   :  { %3198 = vmatpush3.bf16.msra.mxu1 %v3556_v41 }
 0x213   :  { %3199 = vmatprep.subr.bf16.mxu1 %v3558_v42 }
 0x216   :  { %3200 = vmatpush3.bf16.msra.mxu1 %v3560_v43 }
 0x217   :  { %3201 = vmatprep.subr.bf16.mxu1 %v3562_v44 }
 0x21a   :  { %3202 = vmatpush3.bf16.msra.mxu1 %v3564_v45 }
 0x21b   :  { %3203 = vmatprep.subr.bf16.mxu1 %v3566_v46 }
 0x21e   :  { %3204 = vmatpush3.bf16.msra.mxu1 %v3568_v24 }
 0x21f   :  { %3205 = vmatprep.subr.bf16.mxu1 %v3570_v53 }
 0x222   :  { %3206 = vmatpush3.bf16.msra.mxu1 %v3572_v55 }
 0x238   :  { %v3097_v13 = vpop.f32.mrb[24].mxu1 }
 0x239   :  { %v3098_v22 = vpop.f32.mrb[25].mxu1 }
 0x23a   :  { %v3099_v11 = vadd.f32 %v3098_v22, %v3097_v13  ;;  %v3100_v23 = vpop.f32.mrb[26].mxu1 }
 0x23b   :  { %v3101_v25 = vpop.f32.mrb[27].mxu1 }
 0x23c   :  { %v1406_v27 = vadd.f32 %v3099_v11, %v773_v21  ;;  %v1585_v21 = vld [vmem:[%s4054_s8] sm:$0x7] }
 0x23d   :  { %v1598_v22 = vrot.slane %v1585_v21, %v3990_v34  ;;  %v1590_v38 = vrot.slane %v1585_v21, %v3973_v32  ;;  %v1594_v39 = vrot.slane %v1585_v21, %v3976_v33 }
 0x258   :  { %v3119_v47 = vpop.f32.mrb[28].mxu1 }
 0x259   :  { %v3120_v48 = vpop.f32.mrb[29].mxu1 }
 0x25a   :  { %v3121_v49 = vadd.f32 %v3120_v48, %v3119_v47  ;;  %v3122_v50 = vpop.f32.mrb[30].mxu1 }
 0x25b   :  { %v3123_v52 = vpop.f32.mrb[31].mxu1 }
 0x25c   :  { %v4020_v54 = vadd.f32 %v3121_v49, %v1406_v27 }
 0x25e   :  { %v1453_v43 = vmax.f32 %v4020_v54, 0.0  ;;  %v3032_v54 = vld [vmem:[%s4056_s10] ss:$0 sm:$0xff] }
 0x260   :  { %v1456_v48 = vpack.c.bf16 %v1453_v43, %v1453_v43 }
 0x278   :  { %v1364_v58 = vpop.f32.mrb[8].mxu0 }
 0x279   :  { %v3235_v51 = vadd.f32 %v1364_v58, %v765_v57  ;;  %v1366_v59 = vpop.f32.mrb[9].mxu0 }
 0x27a   :  { %v3236_v60 = vadd.f32 %v1366_v59, %v769_v26  ;;  %v1368_v61 = vpop.f32.mrb[10].mxu0 }
 0x27b   :  { %v1451_v9 = vmax.f32 %v3235_v51, 0.0  ;;  %v1369_v62 = vpop.f32.mrb[11].mxu0 }
 0x27c   :  { %v1452_v56 = vmax.f32 %v3236_v60, 0.0 }
 0x27d   :  { %v1454_v1 = vpack.c.bf16 %v1451_v9, %v1451_v9 }
 0x27e   :  { %v1455_v63 = vpack.c.bf16 %v1452_v56, %v1452_v56 }
 0x280   :  { %2705 = vmatprep.mubr.bf16.mxu0 %v1455_v63 }
 0x281   :  { %2706 = vmatmul.mubr.bf16.vlgmr.msra.gmra.mrb[20].mxu0 %v1454_v1 }
 0x282   :  { %3214 = vmatpush3.bf16.msra.mxu0 %v3545_v0 }
 0x283   :  { %3215 = vmatprep.subr.bf16.mxu0 %v3547_v2 }
 0x286   :  { %3216 = vmatpush3.bf16.msra.mxu0 %v3549_v3 }
 0x287   :  { %3217 = vmatprep.subr.bf16.mxu0 %v3551_v4 }
 0x28a   :  { %3218 = vmatpush3.bf16.msra.mxu0 %v3553_v5 }
 0x28b   :  { %3219 = vmatprep.subr.bf16.mxu0 %v3555_v6 }
 0x28e   :  { %3220 = vmatpush3.bf16.msra.mxu0 %v3557_v7 }
 0x28f   :  { %3221 = vmatprep.subr.bf16.mxu0 %v3559_v8 }
 0x292   :  { %3222 = vmatpush3.bf16.msra.mxu0 %v3561_v10 }
 0x293   :  { %3223 = vmatprep.subr.bf16.mxu0 %v3563_v12 }
 0x296   :  { %3224 = vmatpush3.bf16.msra.mxu0 %v3565_v14 }
 0x297   :  { %3225 = vmatprep.subr.bf16.mxu0 %v3567_v15 }
 0x298   :  { %v3141_v17 = vpop.f32.mrb[12].mxu0 }
 0x299   :  { %v3142_v18 = vpop.f32.mrb[13].mxu0 }
 0x29a   :  { %v3143_v19 = vadd.f32 %v3142_v18, %v3141_v17  ;;  %v3144_v31 = vpop.f32.mrb[14].mxu0  ;;  %3226 = vmatpush3.bf16.msra.mxu0 %v3569_v16 }
 0x29b   :  { %v3145_v13 = vpop.f32.mrb[15].mxu0  ;;  %3227 = vmatprep.subr.bf16.mxu0 %v3571_v30 }
 0x29c   :  { %v2231_v25 = vadd.f32 %v3143_v19, %v1598_v22 }
 0x29e   :  { %3228 = vmatpush3.bf16.msra.mxu0 %v3573_v20 }
 0x2b9   :  { %v3163_v11 = vpop.f32.mrb[16].mxu0 }
 0x2ba   :  { %v3164_v23 = vpop.f32.mrb[17].mxu0 }
 0x2bb   :  { %v3165_v27 = vadd.f32 %v3164_v23, %v3163_v11  ;;  %v3166_v28 = vpop.f32.mrb[18].mxu0 }
 0x2bc   :  { %v3167_v29 = vpop.f32.mrb[19].mxu0 }
 0x2bd   :  { %v2271_v35 = vadd.f32 %v3165_v27, %v2231_v25 }
 0x2bf   :  { %v2278_v36 = vmax.f32 %v2271_v35, 0.0 }
 0x2c1   :  { %v2281_v37 = vpack.c.bf16 %v2278_v36, %v2278_v36 }
 0x2c3   :  { %2785 = vmatprep.mubr.bf16.mxu0 %v2281_v37 }
 0x2d8   :  { %v2189_v40 = vpop.f32.mrb[32].mxu1 }
 0x2d9   :  { %v3237_v41 = vadd.f32 %v2189_v40, %v1590_v38  ;;  %v2191_v42 = vpop.f32.mrb[33].mxu1 }
 0x2da   :  { %v3238_v34 = vadd.f32 %v2191_v42, %v1594_v39  ;;  %v2193_v44 = vpop.f32.mrb[34].mxu1 }
 0x2db   :  { %v2276_v45 = vmax.f32 %v3237_v41, 0.0  ;;  %v2194_v46 = vpop.f32.mrb[35].mxu1 }
 0x2dc   :  { %v2277_v47 = vmax.f32 %v3238_v34, 0.0 }
 0x2dd   :  { %v2279_v24 = vpack.c.bf16 %v2276_v45, %v2276_v45 }
 0x2de   :  { %v2280_v49 = vpack.c.bf16 %v2277_v47, %v2277_v47 }
 0x2df   :  { %2745 = vmatprep.mubr.bf16.mxu1 %v2279_v24 }
 0x2e0   :  { %2746 = vmatmul.mubr.bf16.vlgmr.msra.gmra.mrb[36].mxu1 %v1456_v48  ;;  %2786 = vmatmul.mubr.bf16.vlgmr.msra.gmra.mrb[24].mxu0 %v2280_v49 }
 0x354   :  { %v3185_v50 = vpop.f32.mrb[20].mxu0 }
 0x355   :  { %v3186_v32 = vpop.f32.mrb[21].mxu0 }
 0x356   :  { %v3187_v52 = vadd.f32 %v3186_v32, %v3185_v50  ;;  %v3188_v33 = vpop.f32.mrb[22].mxu0 }
 0x357   :  { %v3189_v53 = vpop.f32.mrb[23].mxu0 }
 0x358   :  { %v2708_v51 = vadd.f32 %v3187_v52, %v3032_v54 }
 0x3b3   :  { %v3207_v55 = vpop.f32.mrb[36].mxu1  ;;  %v3229_v57 = vpop.f32.mrb[24].mxu0 }
 0x3b4   :  { %v3208_v26 = vpop.f32.mrb[37].mxu1  ;;  %v3230_v58 = vpop.f32.mrb[25].mxu0 }
 0x3b5   :  { %v3209_v59 = vadd.f32 %v3208_v26, %v3207_v55  ;;  %v3231_v60 = vadd.f32 %v3230_v58, %v3229_v57  ;;  %v3210_v61 = vpop.f32.mrb[38].mxu1  ;;  %v3232_v9 = vpop.f32.mrb[26].mxu0 }
 0x3b6   :  { %v3211_v62 = vpop.f32.mrb[39].mxu1  ;;  %v3233_v56 = vpop.f32.mrb[27].mxu0 }
 0x3b7   :  { %v2748_v63 = vadd.f32 %v3209_v59, %v2708_v51 }
 0x3b9   :  { %v2788_v0 = vadd.f32 %v3231_v60, %v2748_v63 }
 0x3bb   :  { %2793 = vst [vmem:[#allocation14] sm:$0xff] %v2788_v0 }
 0x3bc   :  { %3739 = shalt.err (!%p3736_p4)
}
 0x3bd   :  { %s3740_s30 = scalar_lea.hbm %s4057_s11, 128 }
 0x3be   :  { %p3741_p5 = scmp.ne.s32.totalorder %s4057_s11, %s3740_s30  ;;  %p3744_p6 = scmp.lt.u32.totalorder %s3740_s30, %s4057_s11 }
 0x3c0   :  { %p3746_p7 = pnand %p3744_p6, %p3741_p5 }
 0x3c2   :  { %3749 = shalt.err (!%p3746_p7)
}
 0x3c3   :  { %2803 = dma.vmem_to_hbm [thread:$0]  %s2801_s23, 128, %s4057_s11, [#allocation4]  }
 0x3c4   :  { %3758 = dma.done.wait [#allocation4], 128  }
 0x3c5   :  { %3759 = vsyncadd [#allocation4], 4294967168 }
 0x3c6   :  { %2807 = vsyncpa [#allocation3], 1 }
 0x3c7   :  { %2808 = vsyncpa [#allocation6], 1 }
 0x3c8   :  { %2809 = vsyncpa [#allocation9], 1 }
 0x3c9   :  { %2810 = vsyncpa [#allocation12], 1 }
 0x3ca   :  { %2811 = vsyncpa [#allocation4], 1 }

</bundles_post_ra>
